<compile_context>
chip_gen: v6e
topology: v6e:2x2x1
jax: 0.10.0
libtpu: 0.0.40
codegen_flags: <defaults>
</compile_context>

<pallas_src>
import jax
import jax.numpy as jnp
from jax import lax
from jax.experimental import pallas as pl
from jax.experimental.pallas import tpu as pltpu

K = 7     # PixelAttention conv kernel size
PAD = 3   # reflect padding


def _round_up(n, m):
    return -(-n // m) * m


# --------------------------------------------------------------------------
# Pallas kernel: fused PixelAttention (7x7 reflect dual-depthwise + sigmoid)
# + EAGFM gating epilogue (outer sigmoid + blend).
# --------------------------------------------------------------------------
def _make_tail_kernel(CB, H, W, HB, compute_dtype):
    NS = H // HB
    KK = K * K
    cdt = compute_dtype

    def fill_plane(dst_ref, center):
        """Reflect-pad `center` (H, W) into dst_ref (H+6, W+6) with 3 wide stores."""
        # reflect in W (lane axis): cols [3,2,1] | centre | cols [W-2,W-3,W-4]
        left = jnp.concatenate(
            [center[:, i:i + 1] for i in range(PAD, 0, -1)], axis=1)
        right = jnp.concatenate(
            [center[:, W - 1 - i:W - i] for i in range(1, PAD + 1)], axis=1)
        rows = jnp.concatenate([left, center, right], axis=1)            # (H, W+6)
        dst_ref[PAD:PAD + H, :] = rows
        # reflect in H (sublane axis): rows [3,2,1] on top, [H-2,H-3,H-4] below
        dst_ref[0:PAD, :] = jnp.concatenate(
            [rows[i:i + 1, :] for i in range(PAD, 0, -1)], axis=0)
        dst_ref[PAD + H:PAD + H + PAD, :] = jnp.concatenate(
            [rows[H - 1 - i:H - i, :] for i in range(1, PAD + 1)], axis=0)

    def kernel(xl_ref, xr_ref, f_ref, w0_sm, w1_sm, b_sm, out_ref,
               padx_ref, padf_ref):
        # xl/xr/f/out : (CB, H, W)  NCHW channel block (batch dim squeezed)
        # w0/w1       : (C*K*K,) f32 in SMEM (per-channel taps, channel-major)
        # b           : (C,)     f32 in SMEM
        # padx/padf   : (H+6, W+6) VMEM scratch, one channel at a time
        cblk = pl.program_id(1)

        def channel_body(c, carry):
            cg = cblk * CB + c            # global channel -> SMEM weight index
            wbase = cg * KK
            bias = b_sm[cg]

            # Build reflect-padded planes for this channel (values -> 3 stores
            # each); the full-plane temporaries die before the tap loop.
            fill_plane(padx_ref, xl_ref[c].astype(cdt) + xr_ref[c].astype(cdt))
            fill_plane(padf_ref, f_ref[c].astype(cdt))

            def strip_body(s, carry2):
                h0 = s * HB
                if HB % 8 == 0:
                    h0 = pl.multiple_of(h0, 8)
                # f32 accumulator (kept f32 even under bf16 compute).
                acc = jnp.full((HB, W), bias, jnp.float32)
                for dh in range(K):
                    sx = padx_ref[pl.ds(h0 + dh, HB), :]      # (HB, W+6)
                    sf = padf_ref[pl.ds(h0 + dh, HB), :]
                    for dw in range(K):
                        w0 = w0_sm[wbase + dh * K + dw].astype(cdt)
                        w1 = w1_sm[wbase + dh * K + dw].astype(cdt)
                        acc = acc + w0 * sx[:, dw:dw + W]      # scalar-operand muls
                        acc = acc + w1 * sf[:, dw:dw + W]
                # PixelAttention sigmoid, EAGFM outer sigmoid, then blend.
                a = jax.nn.sigmoid(jax.nn.sigmoid(acc))
                xls = xl_ref[c, pl.ds(h0, HB), :].astype(jnp.float32)
                xrs = xr_ref[c, pl.ds(h0, HB), :].astype(jnp.float32)
                out_ref[c, pl.ds(h0, HB), :] = (
                    a * xls + (1.0 - a) * xrs).astype(out_ref.dtype)
                return carry2

            lax.fori_loop(0, NS, strip_body, 0)
            return carry

        lax.fori_loop(0, CB, channel_body, 0)

    return kernel


def eagfm_tail(x_l, x_r, f, pa_weight, pa_bias, *, channel_block=None,
               compute_dtype=jnp.float32, vmem_budget_bytes=40 * 2**20):
    """Fused PixelAttention + gating tail of EAGFM.

    x_l, x_r, f : (B, C, H, W) NCHW
    pa_weight   : (C, 2, K, K) grouped-conv weight (tap 0 -> x, tap 1 -> pattn1)
    pa_bias     : (C,)
    Returns a * x_l + (1 - a) * x_r with a = sigmoid(PixelAttention(x_l + x_r, f)).
    """
    B, C, H, W = x_l.shape
    assert x_r.shape == x_l.shape and f.shape == x_l.shape
    assert pa_weight.shape == (C, 2, K, K) and pa_bias.shape == (C,)
    # Reflect padding reads rows/cols 1..3 of the centre plane.
    assert H >= PAD + 1 and W >= PAD + 1, "EAGFM tail requires H, W >= 4"

    in_bytes = jnp.dtype(x_l.dtype).itemsize
    cdt_bytes = jnp.dtype(compute_dtype).itemsize

    # Per-grid-step VMEM: (3 in + 1 out) blocks double-buffered + 2 padded
    # single-channel scratch planes (lane/sublane-padded sizes).
    per_chan = 8 * _round_up(H, 8) * _round_up(W, 128) * in_bytes
    scratch_bytes = (2 * _round_up(H + 2 * PAD, 8)
                     * _round_up(W + 2 * PAD, 128) * cdt_bytes)
    if channel_block is None:
        cb = int(max(1, (vmem_budget_bytes - scratch_bytes) // per_chan))
        cb = min(cb, C)
        while C % cb:
            cb -= 1
        channel_block = cb
    CB = channel_block
    assert C % CB == 0

    # H-strip height for the in-kernel loop: biggest divisor of H whose
    # (strip x padded-W) working set stays within a handful of vregs.
    HB = 1
    for h in (32, 16, 8, 4, 2):
        if H % h == 0 and _round_up(h, 8) * _round_up(W + 2 * PAD, 128) <= 16384:
            HB = h
            break

    # Flattened 1-D weights/bias -> SMEM (avoids 2-D SMEM padding blowup).
    w0_flat = pa_weight[:, 0, :, :].reshape(C * K * K).astype(jnp.float32)
    w1_flat = pa_weight[:, 1, :, :].reshape(C * K * K).astype(jnp.float32)
    b_flat = pa_bias.reshape(C).astype(jnp.float32)

    kernel = _make_tail_kernel(CB, H, W, HB, compute_dtype)

    img_spec = pl.BlockSpec((None, CB, H, W), lambda b, c: (b, c, 0, 0))
    smem_spec = pl.BlockSpec(memory_space=pltpu.MemorySpace.SMEM)

    est_vmem = per_chan * CB + scratch_bytes
    vmem_limit = int(min(96 * 2**20, max(32 * 2**20, int(est_vmem * 1.25))))

    n_elems = B * C * H * W
    cost = pl.CostEstimate(
        flops=int((4 * K * K + 8) * n_elems),          # 98 mul + 98 add + epilogue
        transcendentals=int(2 * n_elems),              # two sigmoids
        bytes_accessed=int(4 * n_elems * in_bytes),    # 3 inputs + 1 output
    )

    # TODO(synk): add an H-tile "parallel" grid axis when B * (C // CB) < 2 so
    # both v7x TensorCores stay busy.
    return pl.pallas_call(
        kernel,
        out_shape=jax.ShapeDtypeStruct((B, C, H, W), x_l.dtype),
        grid_spec=pltpu.PrefetchScalarGridSpec(
            num_scalar_prefetch=0,
            grid=(B, C // CB),
            in_specs=[img_spec, img_spec, img_spec,
                      smem_spec, smem_spec, smem_spec],
            out_specs=img_spec,
            scratch_shapes=[
                pltpu.VMEM((H + 2 * PAD, W + 2 * PAD), compute_dtype),
                pltpu.VMEM((H + 2 * PAD, W + 2 * PAD), compute_dtype),
            ]),
        compiler_params=pltpu.CompilerParams(
            dimension_semantics=("parallel", "parallel"),
            vmem_limit_bytes=vmem_limit),
        cost_estimate=cost,
    )(x_l, x_r, f, w0_flat, w1_flat, b_flat)


# --------------------------------------------------------------------------
# Plain-JAX glue for the rest of EAGFM (projections + cross attention).
# --------------------------------------------------------------------------
def _conv1x1(x, w, b):
    # x: (B, C, H, W); w: (Cout, Cin); b: (Cout,)
    return jnp.einsum('oc,bchw->bohw', w, x) + b[None, :, None, None]


def _dwconv3x3(x, w, b):
    # depthwise 3x3, zero padding 1; w: (C, 3, 3); b: (C,)
    B, C, H, W = x.shape
    xp = jnp.pad(x, ((0, 0), (0, 0), (1, 1), (1, 1)))
    acc = jnp.zeros_like(x) + b[None, :, None, None]
    for di in range(3):
        for dj in range(3):
            acc = acc + w[None, :, di, dj, None, None] * xp[:, :, di:di + H, dj:dj + W]
    return acc


def _proj(x, pw_params, dw_params):
    return _dwconv3x3(_conv1x1(x, *pw_params), *dw_params)


def _eagfm_features(params, x_l, x_r):
    """Cross-attention feature f = l_proj3(F_r2l) + r_proj3(F_l2r), NCHW."""
    B, C, H, W = x_l.shape
    scale = C ** (-0.5)

    Q_l = _proj(x_l, params['l1_pw'], params['l1_dw'])
    Q_r = _proj(x_r, params['r1_pw'], params['r1_dw'])
    V_l = _proj(x_l, params['l2_pw'], params['l2_dw'])
    V_r = _proj(x_r, params['r2_pw'], params['r2_dw'])

    Ql = jnp.transpose(Q_l, (0, 2, 3, 1))    # (B, H, W, C)
    Qr = jnp.transpose(Q_r, (0, 2, 3, 1))
    Vl = jnp.transpose(V_l, (0, 2, 3, 1))
    Vr = jnp.transpose(V_r, (0, 2, 3, 1))

    att = jnp.einsum('bhwc,bhvc->bhwv', Ql, Qr) * scale                    # (B, H, Wl, Wr)
    F_r2l = jnp.einsum('bhwv,bhvc->bhwc', jax.nn.softmax(att, axis=-1), Vr)
    attT = jnp.swapaxes(att, 2, 3)                                         # (B, H, Wr, Wl)
    F_l2r = jnp.einsum('bhrw,bhwc->bhrc', jax.nn.softmax(attT, axis=-1), Vl)

    F_r2l = _conv1x1(jnp.transpose(F_r2l, (0, 3, 1, 2)), *params['l3'])
    F_l2r = _conv1x1(jnp.transpose(F_l2r, (0, 3, 1, 2)), *params['r3'])
    return F_l2r + F_r2l


def eagfm_forward(params, x_l, x_r):
    f = _eagfm_features(params, x_l, x_r)
    return eagfm_tail(x_l, x_r, f, params['pa_w'], params['pa_b'])


# --------------------------------------------------------------------------
# Pure-JAX reference of the fused tail (validates the Pallas kernel).
# --------------------------------------------------------------------------
def _eagfm_tail_reference(x_l, x_r, f, pa_weight, pa_bias):
    B, C, H, W = x_l.shape
    initial = x_l + x_r
    pad_cfg = ((0, 0), (0, 0), (PAD, PAD), (PAD, PAD))
    xp = jnp.pad(initial, pad_cfg, mode="reflect")
    fp = jnp.pad(f, pad_cfg, mode="reflect")
    acc = jnp.zeros((B, C, H, W), jnp.float32) + pa_bias[None, :, None, None]
    for dh in range(K):
        for dw in range(K):
            acc = acc + pa_weight[None, :, 0, dh, dw, None, None] * xp[:, :, dh:dh + H, dw:dw + W]
            acc = acc + pa_weight[None, :, 1, dh, dw, None, None] * fp[:, :, dh:dh + H, dw:dw + W]
    a = jax.nn.sigmoid(jax.nn.sigmoid(acc))
    return (a * x_l + (1.0 - a) * x_r).astype(x_l.dtype)


def eagfm_reference(params, x_l, x_r):
    f = _eagfm_features(params, x_l, x_r)
    return _eagfm_tail_reference(x_l, x_r, f, params['pa_w'], params['pa_b'])


# --------------------------------------------------------------------------
# Parameter construction (matches the nn.Module's conv shapes).
# --------------------------------------------------------------------------
def init_params(key, C):
    ks = jax.random.split(key, 12)

    def pw(k):
        kw, kb = jax.random.split(k)
        return (jax.random.normal(kw, (C, C), jnp.float32) * 0.1,
                jax.random.normal(kb, (C,), jnp.float32) * 0.1)

    def dw(k):
        kw, kb = jax.random.split(k)
        return (jax.random.normal(kw, (C, 3, 3), jnp.float32) * 0.1,
                jax.random.normal(kb, (C,), jnp.float32) * 0.1)

    return {
        'l1_pw': pw(ks[0]), 'l1_dw': dw(ks[1]),
        'r1_pw': pw(ks[2]), 'r1_dw': dw(ks[3]),
        'l2_pw': pw(ks[4]), 'l2_dw': dw(ks[5]),
        'r2_pw': pw(ks[6]), 'r2_dw': dw(ks[7]),
        'l3': pw(ks[8]), 'r3': pw(ks[9]),
        # PixelAttention Conv2d(2C -> C, k=7, groups=C): weight (C, 2, 7, 7), bias (C,)
        'pa_w': jax.random.normal(ks[10], (C, 2, K, K), jnp.float32) * 0.05,
        'pa_b': jax.random.normal(ks[11], (C,), jnp.float32) * 0.05,
    }


if __name__ == "__main__":
    B, C, H, W = 2, 4, 16, 16   # EAGFM(c=4), stereo inputs x_l / x_r
    key = jax.random.PRNGKey(0)
    kp, kl, kr = jax.random.split(key, 3)

    params = init_params(kp, C)
    x_l = jax.random.normal(kl, (B, C, H, W), dtype=jnp.float32)
    x_r = jax.random.normal(kr, (B, C, H, W), dtype=jnp.float32)

    out = jax.block_until_ready(eagfm_forward(params, x_l, x_r))
    ref = jax.block_until_ready(eagfm_reference(params, x_l, x_r))

    assert out.shape == (B, C, H, W)
    err = jnp.max(jnp.abs(out - ref))
    assert jnp.allclose(out, ref, atol=1e-5, rtol=1e-5), f"mismatch vs reference, max abs err {err}"
    print("KERNEL_OK")
</pallas_src>

<mosaic_0001>
module attributes {stable_mosaic.version = 11 : i64} {
  func.func @kernel(%arg0: i32, %arg1: i32, %arg2: memref<1x4x16x16xf32, #tpu.memory_space<vmem>>, %arg3: memref<1x4x16x16xf32, #tpu.memory_space<vmem>>, %arg4: memref<1x4x16x16xf32, #tpu.memory_space<vmem>>, %arg5: memref<196xf32, #tpu.memory_space<smem>>, %arg6: memref<196xf32, #tpu.memory_space<smem>>, %arg7: memref<4xf32, #tpu.memory_space<smem>>, %arg8: memref<1x4x16x16xf32, #tpu.memory_space<vmem>>, %arg9: memref<22x22xf32, #tpu.memory_space<vmem>>, %arg10: memref<22x22xf32, #tpu.memory_space<vmem>>) attributes {dimension_semantics = [#tpu.dimension_semantics<parallel>, #tpu.dimension_semantics<parallel>], iteration_bounds = array<i64: 2, 1>, scalar_prefetch = 0 : i64, scratch_operands = 2 : i64, tpu.core_type = #tpu.core_type<tc>, window_params = [{transform_indices = @transform_0, window_bounds = array<i64: 1, 4, 16, 16>}, {transform_indices = @transform_1, window_bounds = array<i64: 1, 4, 16, 16>}, {transform_indices = @transform_2, window_bounds = array<i64: 1, 4, 16, 16>}, {transform_indices = @transform_3, window_bounds = array<i64: 196>}, {transform_indices = @transform_4, window_bounds = array<i64: 196>}, {transform_indices = @transform_5, window_bounds = array<i64: 4>}, {transform_indices = @transform_6, window_bounds = array<i64: 1, 4, 16, 16>}]} {
    %c0_i32 = arith.constant 0 : i32
    %c4_i32 = arith.constant 4 : i32
    %0 = arith.addi %c0_i32, %c4_i32 : i32
    %c1_i32 = arith.constant 1 : i32
    scf.for %arg11 = %c0_i32 to %0 step %c1_i32  : i32 {
      %c4_i32_1 = arith.constant 4 : i32
      %1 = arith.muli %arg1, %c4_i32_1 : i32
      %2 = arith.addi %1, %arg11 : i32
      %c49_i32 = arith.constant 49 : i32
      %3 = arith.muli %2, %c49_i32 : i32
      %4 = arith.index_cast %2 : i32 to index
      %5 = memref.load %arg7[%4] : memref<4xf32, #tpu.memory_space<smem>>
      %c0 = arith.constant 0 : index
      %6 = arith.index_cast %arg11 : i32 to index
      %c0_2 = arith.constant 0 : index
      %c0_3 = arith.constant 0 : index
      %7 = vector.load %arg2[%c0, %6, %c0_2, %c0_3] : memref<1x4x16x16xf32, #tpu.memory_space<vmem>>, vector<1x1x16x16xf32>
      %8 = vector.shape_cast %7 : vector<1x1x16x16xf32> to vector<16x16xf32>
      %c0_4 = arith.constant 0 : index
      %9 = arith.index_cast %arg11 : i32 to index
      %c0_5 = arith.constant 0 : index
      %c0_6 = arith.constant 0 : index
      %10 = vector.load %arg3[%c0_4, %9, %c0_5, %c0_6] : memref<1x4x16x16xf32, #tpu.memory_space<vmem>>, vector<1x1x16x16xf32>
      %11 = vector.shape_cast %10 : vector<1x1x16x16xf32> to vector<16x16xf32>
      %12 = arith.addf %8, %11 : vector<16x16xf32>
      %13 = vector.extract_strided_slice %12 {offsets = [0, 3], sizes = [16, 1], strides = [1, 1]} : vector<16x16xf32> to vector<16x1xf32>
      %14 = vector.extract_strided_slice %12 {offsets = [0, 2], sizes = [16, 1], strides = [1, 1]} : vector<16x16xf32> to vector<16x1xf32>
      %15 = vector.extract_strided_slice %12 {offsets = [0, 1], sizes = [16, 1], strides = [1, 1]} : vector<16x16xf32> to vector<16x1xf32>
      %16 = tpu.concatenate %13, %14, %15 in 1 : vector<16x1xf32>, vector<16x1xf32>, vector<16x1xf32> -> vector<16x3xf32>
      %17 = vector.extract_strided_slice %12 {offsets = [0, 14], sizes = [16, 1], strides = [1, 1]} : vector<16x16xf32> to vector<16x1xf32>
      %18 = vector.extract_strided_slice %12 {offsets = [0, 13], sizes = [16, 1], strides = [1, 1]} : vector<16x16xf32> to vector<16x1xf32>
      %19 = vector.extract_strided_slice %12 {offsets = [0, 12], sizes = [16, 1], strides = [1, 1]} : vector<16x16xf32> to vector<16x1xf32>
      %20 = tpu.concatenate %17, %18, %19 in 1 : vector<16x1xf32>, vector<16x1xf32>, vector<16x1xf32> -> vector<16x3xf32>
      %21 = tpu.concatenate %16, %12, %20 in 1 : vector<16x3xf32>, vector<16x16xf32>, vector<16x3xf32> -> vector<16x22xf32>
      %c3 = arith.constant 3 : index
      %c0_7 = arith.constant 0 : index
      %22 = vector.load %arg9[%c3, %c0_7] : memref<22x22xf32, #tpu.memory_space<vmem>>, vector<16x22xf32>
      tpu.vector_store %arg9[%c3, %c0_7], %21 {strides = array<i32>} : memref<22x22xf32, #tpu.memory_space<vmem>>, vector<16x22xf32>,
      %23 = vector.extract_strided_slice %21 {offsets = [3, 0], sizes = [1, 22], strides = [1, 1]} : vector<16x22xf32> to vector<1x22xf32>
      %24 = vector.extract_strided_slice %21 {offsets = [2, 0], sizes = [1, 22], strides = [1, 1]} : vector<16x22xf32> to vector<1x22xf32>
      %25 = vector.extract_strided_slice %21 {offsets = [1, 0], sizes = [1, 22], strides = [1, 1]} : vector<16x22xf32> to vector<1x22xf32>
      %26 = tpu.concatenate %23, %24, %25 in 0 : vector<1x22xf32>, vector<1x22xf32>, vector<1x22xf32> -> vector<3x22xf32>
      %c0_8 = arith.constant 0 : index
      %c0_9 = arith.constant 0 : index
      %27 = vector.load %arg9[%c0_8, %c0_9] : memref<22x22xf32, #tpu.memory_space<vmem>>, vector<3x22xf32>
      tpu.vector_store %arg9[%c0_8, %c0_9], %26 {strides = array<i32>} : memref<22x22xf32, #tpu.memory_space<vmem>>, vector<3x22xf32>,
      %28 = vector.extract_strided_slice %21 {offsets = [14, 0], sizes = [1, 22], strides = [1, 1]} : vector<16x22xf32> to vector<1x22xf32>
      %29 = vector.extract_strided_slice %21 {offsets = [13, 0], sizes = [1, 22], strides = [1, 1]} : vector<16x22xf32> to vector<1x22xf32>
      %30 = vector.extract_strided_slice %21 {offsets = [12, 0], sizes = [1, 22], strides = [1, 1]} : vector<16x22xf32> to vector<1x22xf32>
      %31 = tpu.concatenate %28, %29, %30 in 0 : vector<1x22xf32>, vector<1x22xf32>, vector<1x22xf32> -> vector<3x22xf32>
      %c19 = arith.constant 19 : index
      %c0_10 = arith.constant 0 : index
      %32 = vector.load %arg9[%c19, %c0_10] : memref<22x22xf32, #tpu.memory_space<vmem>>, vector<3x22xf32>
      tpu.vector_store %arg9[%c19, %c0_10], %31 {strides = array<i32>} : memref<22x22xf32, #tpu.memory_space<vmem>>, vector<3x22xf32>,
      %c0_11 = arith.constant 0 : index
      %33 = arith.index_cast %arg11 : i32 to index
      %c0_12 = arith.constant 0 : index
      %c0_13 = arith.constant 0 : index
      %34 = vector.load %arg4[%c0_11, %33, %c0_12, %c0_13] : memref<1x4x16x16xf32, #tpu.memory_space<vmem>>, vector<1x1x16x16xf32>
      %35 = vector.shape_cast %34 : vector<1x1x16x16xf32> to vector<16x16xf32>
      %36 = vector.extract_strided_slice %35 {offsets = [0, 3], sizes = [16, 1], strides = [1, 1]} : vector<16x16xf32> to vector<16x1xf32>
      %37 = vector.extract_strided_slice %35 {offsets = [0, 2], sizes = [16, 1], strides = [1, 1]} : vector<16x16xf32> to vector<16x1xf32>
      %38 = vector.extract_strided_slice %35 {offsets = [0, 1], sizes = [16, 1], strides = [1, 1]} : vector<16x16xf32> to vector<16x1xf32>
      %39 = tpu.concatenate %36, %37, %38 in 1 : vector<16x1xf32>, vector<16x1xf32>, vector<16x1xf32> -> vector<16x3xf32>
      %40 = vector.extract_strided_slice %35 {offsets = [0, 14], sizes = [16, 1], strides = [1, 1]} : vector<16x16xf32> to vector<16x1xf32>
      %41 = vector.extract_strided_slice %35 {offsets = [0, 13], sizes = [16, 1], strides = [1, 1]} : vector<16x16xf32> to vector<16x1xf32>
      %42 = vector.extract_strided_slice %35 {offsets = [0, 12], sizes = [16, 1], strides = [1, 1]} : vector<16x16xf32> to vector<16x1xf32>
      %43 = tpu.concatenate %40, %41, %42 in 1 : vector<16x1xf32>, vector<16x1xf32>, vector<16x1xf32> -> vector<16x3xf32>
      %44 = tpu.concatenate %39, %35, %43 in 1 : vector<16x3xf32>, vector<16x16xf32>, vector<16x3xf32> -> vector<16x22xf32>
      %c3_14 = arith.constant 3 : index
      %c0_15 = arith.constant 0 : index
      %45 = vector.load %arg10[%c3_14, %c0_15] : memref<22x22xf32, #tpu.memory_space<vmem>>, vector<16x22xf32>
      tpu.vector_store %arg10[%c3_14, %c0_15], %44 {strides = array<i32>} : memref<22x22xf32, #tpu.memory_space<vmem>>, vector<16x22xf32>,
      %46 = vector.extract_strided_slice %44 {offsets = [3, 0], sizes = [1, 22], strides = [1, 1]} : vector<16x22xf32> to vector<1x22xf32>
      %47 = vector.extract_strided_slice %44 {offsets = [2, 0], sizes = [1, 22], strides = [1, 1]} : vector<16x22xf32> to vector<1x22xf32>
      %48 = vector.extract_strided_slice %44 {offsets = [1, 0], sizes = [1, 22], strides = [1, 1]} : vector<16x22xf32> to vector<1x22xf32>
      %49 = tpu.concatenate %46, %47, %48 in 0 : vector<1x22xf32>, vector<1x22xf32>, vector<1x22xf32> -> vector<3x22xf32>
      %c0_16 = arith.constant 0 : index
      %c0_17 = arith.constant 0 : index
      %50 = vector.load %arg10[%c0_16, %c0_17] : memref<22x22xf32, #tpu.memory_space<vmem>>, vector<3x22xf32>
      tpu.vector_store %arg10[%c0_16, %c0_17], %49 {strides = array<i32>} : memref<22x22xf32, #tpu.memory_space<vmem>>, vector<3x22xf32>,
      %51 = vector.extract_strided_slice %44 {offsets = [14, 0], sizes = [1, 22], strides = [1, 1]} : vector<16x22xf32> to vector<1x22xf32>
      %52 = vector.extract_strided_slice %44 {offsets = [13, 0], sizes = [1, 22], strides = [1, 1]} : vector<16x22xf32> to vector<1x22xf32>
      %53 = vector.extract_strided_slice %44 {offsets = [12, 0], sizes = [1, 22], strides = [1, 1]} : vector<16x22xf32> to vector<1x22xf32>
      %54 = tpu.concatenate %51, %52, %53 in 0 : vector<1x22xf32>, vector<1x22xf32>, vector<1x22xf32> -> vector<3x22xf32>
      %c19_18 = arith.constant 19 : index
      %c0_19 = arith.constant 0 : index
      %55 = vector.load %arg10[%c19_18, %c0_19] : memref<22x22xf32, #tpu.memory_space<vmem>>, vector<3x22xf32>
      tpu.vector_store %arg10[%c19_18, %c0_19], %54 {strides = array<i32>} : memref<22x22xf32, #tpu.memory_space<vmem>>, vector<3x22xf32>,
      %c0_i32_20 = arith.constant 0 : i32
      %c16_i32 = arith.constant 16 : i32
      %56 = arith.muli %c0_i32_20, %c16_i32 : i32
      %57 = tpu.assume_multiple %56, 8 : i32
      %58 = vector.broadcast %5 : f32 to vector<16x16xf32>
      %c0_i32_21 = arith.constant 0 : i32
      %59 = arith.addi %57, %c0_i32_21 : i32
      %60 = arith.index_cast %59 : i32 to index
      %c0_22 = arith.constant 0 : index
      %61 = vector.load %arg9[%60, %c0_22] : memref<22x22xf32, #tpu.memory_space<vmem>>, vector<16x22xf32>
      %c0_i32_23 = arith.constant 0 : i32
      %62 = arith.addi %57, %c0_i32_23 : i32
      %63 = arith.index_cast %62 : i32 to index
      %c0_24 = arith.constant 0 : index
      %64 = vector.load %arg10[%63, %c0_24] : memref<22x22xf32, #tpu.memory_space<vmem>>, vector<16x22xf32>
      %c0_i32_25 = arith.constant 0 : i32
      %65 = arith.addi %3, %c0_i32_25 : i32
      %c0_i32_26 = arith.constant 0 : i32
      %66 = arith.addi %65, %c0_i32_26 : i32
      %67 = arith.index_cast %66 : i32 to index
      %68 = memref.load %arg5[%67] : memref<196xf32, #tpu.memory_space<smem>>
      %c0_i32_27 = arith.constant 0 : i32
      %69 = arith.addi %3, %c0_i32_27 : i32
      %c0_i32_28 = arith.constant 0 : i32
      %70 = arith.addi %69, %c0_i32_28 : i32
      %71 = arith.index_cast %70 : i32 to index
      %72 = memref.load %arg6[%71] : memref<196xf32, #tpu.memory_space<smem>>
      %73 = vector.extract_strided_slice %61 {offsets = [0, 0], sizes = [16, 16], strides = [1, 1]} : vector<16x22xf32> to vector<16x16xf32>
      %74 = vector.broadcast %68 : f32 to vector<16x16xf32>
      %75 = arith.mulf %74, %73 : vector<16x16xf32>
      %76 = arith.addf %58, %75 : vector<16x16xf32>
      %77 = vector.extract_strided_slice %64 {offsets = [0, 0], sizes = [16, 16], strides = [1, 1]} : vector<16x22xf32> to vector<16x16xf32>
      %78 = vector.broadcast %72 : f32 to vector<16x16xf32>
      %79 = arith.mulf %78, %77 : vector<16x16xf32>
      %80 = arith.addf %76, %79 : vector<16x16xf32>
      %c0_i32_29 = arith.constant 0 : i32
      %81 = arith.addi %3, %c0_i32_29 : i32
      %c1_i32_30 = arith.constant 1 : i32
      %82 = arith.addi %81, %c1_i32_30 : i32
      %83 = arith.index_cast %82 : i32 to index
      %84 = memref.load %arg5[%83] : memref<196xf32, #tpu.memory_space<smem>>
      %c0_i32_31 = arith.constant 0 : i32
      %85 = arith.addi %3, %c0_i32_31 : i32
      %c1_i32_32 = arith.constant 1 : i32
      %86 = arith.addi %85, %c1_i32_32 : i32
      %87 = arith.index_cast %86 : i32 to index
      %88 = memref.load %arg6[%87] : memref<196xf32, #tpu.memory_space<smem>>
      %89 = vector.extract_strided_slice %61 {offsets = [0, 1], sizes = [16, 16], strides = [1, 1]} : vector<16x22xf32> to vector<16x16xf32>
      %90 = vector.broadcast %84 : f32 to vector<16x16xf32>
      %91 = arith.mulf %90, %89 : vector<16x16xf32>
      %92 = arith.addf %80, %91 : vector<16x16xf32>
      %93 = vector.extract_strided_slice %64 {offsets = [0, 1], sizes = [16, 16], strides = [1, 1]} : vector<16x22xf32> to vector<16x16xf32>
      %94 = vector.broadcast %88 : f32 to vector<16x16xf32>
      %95 = arith.mulf %94, %93 : vector<16x16xf32>
      %96 = arith.addf %92, %95 : vector<16x16xf32>
      %c0_i32_33 = arith.constant 0 : i32
      %97 = arith.addi %3, %c0_i32_33 : i32
      %c2_i32 = arith.constant 2 : i32
      %98 = arith.addi %97, %c2_i32 : i32
      %99 = arith.index_cast %98 : i32 to index
      %100 = memref.load %arg5[%99] : memref<196xf32, #tpu.memory_space<smem>>
      %c0_i32_34 = arith.constant 0 : i32
      %101 = arith.addi %3, %c0_i32_34 : i32
      %c2_i32_35 = arith.constant 2 : i32
      %102 = arith.addi %101, %c2_i32_35 : i32
      %103 = arith.index_cast %102 : i32 to index
      %104 = memref.load %arg6[%103] : memref<196xf32, #tpu.memory_space<smem>>
      %105 = vector.extract_strided_slice %61 {offsets = [0, 2], sizes = [16, 16], strides = [1, 1]} : vector<16x22xf32> to vector<16x16xf32>
      %106 = vector.broadcast %100 : f32 to vector<16x16xf32>
      %107 = arith.mulf %106, %105 : vector<16x16xf32>
      %108 = arith.addf %96, %107 : vector<16x16xf32>
      %109 = vector.extract_strided_slice %64 {offsets = [0, 2], sizes = [16, 16], strides = [1, 1]} : vector<16x22xf32> to vector<16x16xf32>
      %110 = vector.broadcast %104 : f32 to vector<16x16xf32>
      %111 = arith.mulf %110, %109 : vector<16x16xf32>
      %112 = arith.addf %108, %111 : vector<16x16xf32>
      %c0_i32_36 = arith.constant 0 : i32
      %113 = arith.addi %3, %c0_i32_36 : i32
      %c3_i32 = arith.constant 3 : i32
      %114 = arith.addi %113, %c3_i32 : i32
      %115 = arith.index_cast %114 : i32 to index
      %116 = memref.load %arg5[%115] : memref<196xf32, #tpu.memory_space<smem>>
      %c0_i32_37 = arith.constant 0 : i32
      %117 = arith.addi %3, %c0_i32_37 : i32
      %c3_i32_38 = arith.constant 3 : i32
      %118 = arith.addi %117, %c3_i32_38 : i32
      %119 = arith.index_cast %118 : i32 to index
      %120 = memref.load %arg6[%119] : memref<196xf32, #tpu.memory_space<smem>>
      %121 = vector.extract_strided_slice %61 {offsets = [0, 3], sizes = [16, 16], strides = [1, 1]} : vector<16x22xf32> to vector<16x16xf32>
      %122 = vector.broadcast %116 : f32 to vector<16x16xf32>
      %123 = arith.mulf %122, %121 : vector<16x16xf32>
      %124 = arith.addf %112, %123 : vector<16x16xf32>
      %125 = vector.extract_strided_slice %64 {offsets = [0, 3], sizes = [16, 16], strides = [1, 1]} : vector<16x22xf32> to vector<16x16xf32>
      %126 = vector.broadcast %120 : f32 to vector<16x16xf32>
      %127 = arith.mulf %126, %125 : vector<16x16xf32>
      %128 = arith.addf %124, %127 : vector<16x16xf32>
      %c0_i32_39 = arith.constant 0 : i32
      %129 = arith.addi %3, %c0_i32_39 : i32
      %c4_i32_40 = arith.constant 4 : i32
      %130 = arith.addi %129, %c4_i32_40 : i32
      %131 = arith.index_cast %130 : i32 to index
      %132 = memref.load %arg5[%131] : memref<196xf32, #tpu.memory_space<smem>>
      %c0_i32_41 = arith.constant 0 : i32
      %133 = arith.addi %3, %c0_i32_41 : i32
      %c4_i32_42 = arith.constant 4 : i32
      %134 = arith.addi %133, %c4_i32_42 : i32
      %135 = arith.index_cast %134 : i32 to index
      %136 = memref.load %arg6[%135] : memref<196xf32, #tpu.memory_space<smem>>
      %137 = vector.extract_strided_slice %61 {offsets = [0, 4], sizes = [16, 16], strides = [1, 1]} : vector<16x22xf32> to vector<16x16xf32>
      %138 = vector.broadcast %132 : f32 to vector<16x16xf32>
      %139 = arith.mulf %138, %137 : vector<16x16xf32>
      %140 = arith.addf %128, %139 : vector<16x16xf32>
      %141 = vector.extract_strided_slice %64 {offsets = [0, 4], sizes = [16, 16], strides = [1, 1]} : vector<16x22xf32> to vector<16x16xf32>
      %142 = vector.broadcast %136 : f32 to vector<16x16xf32>
      %143 = arith.mulf %142, %141 : vector<16x16xf32>
      %144 = arith.addf %140, %143 : vector<16x16xf32>
      %c0_i32_43 = arith.constant 0 : i32
      %145 = arith.addi %3, %c0_i32_43 : i32
      %c5_i32 = arith.constant 5 : i32
      %146 = arith.addi %145, %c5_i32 : i32
      %147 = arith.index_cast %146 : i32 to index
      %148 = memref.load %arg5[%147] : memref<196xf32, #tpu.memory_space<smem>>
      %c0_i32_44 = arith.constant 0 : i32
      %149 = arith.addi %3, %c0_i32_44 : i32
      %c5_i32_45 = arith.constant 5 : i32
      %150 = arith.addi %149, %c5_i32_45 : i32
      %151 = arith.index_cast %150 : i32 to index
      %152 = memref.load %arg6[%151] : memref<196xf32, #tpu.memory_space<smem>>
      %153 = vector.extract_strided_slice %61 {offsets = [0, 5], sizes = [16, 16], strides = [1, 1]} : vector<16x22xf32> to vector<16x16xf32>
      %154 = vector.broadcast %148 : f32 to vector<16x16xf32>
      %155 = arith.mulf %154, %153 : vector<16x16xf32>
      %156 = arith.addf %144, %155 : vector<16x16xf32>
      %157 = vector.extract_strided_slice %64 {offsets = [0, 5], sizes = [16, 16], strides = [1, 1]} : vector<16x22xf32> to vector<16x16xf32>
      %158 = vector.broadcast %152 : f32 to vector<16x16xf32>
      %159 = arith.mulf %158, %157 : vector<16x16xf32>
      %160 = arith.addf %156, %159 : vector<16x16xf32>
      %c0_i32_46 = arith.constant 0 : i32
      %161 = arith.addi %3, %c0_i32_46 : i32
      %c6_i32 = arith.constant 6 : i32
      %162 = arith.addi %161, %c6_i32 : i32
      %163 = arith.index_cast %162 : i32 to index
      %164 = memref.load %arg5[%163] : memref<196xf32, #tpu.memory_space<smem>>
      %c0_i32_47 = arith.constant 0 : i32
      %165 = arith.addi %3, %c0_i32_47 : i32
      %c6_i32_48 = arith.constant 6 : i32
      %166 = arith.addi %165, %c6_i32_48 : i32
      %167 = arith.index_cast %166 : i32 to index
      %168 = memref.load %arg6[%167] : memref<196xf32, #tpu.memory_space<smem>>
      %169 = vector.extract_strided_slice %61 {offsets = [0, 6], sizes = [16, 16], strides = [1, 1]} : vector<16x22xf32> to vector<16x16xf32>
      %170 = vector.broadcast %164 : f32 to vector<16x16xf32>
      %171 = arith.mulf %170, %169 : vector<16x16xf32>
      %172 = arith.addf %160, %171 : vector<16x16xf32>
      %173 = vector.extract_strided_slice %64 {offsets = [0, 6], sizes = [16, 16], strides = [1, 1]} : vector<16x22xf32> to vector<16x16xf32>
      %174 = vector.broadcast %168 : f32 to vector<16x16xf32>
      %175 = arith.mulf %174, %173 : vector<16x16xf32>
      %176 = arith.addf %172, %175 : vector<16x16xf32>
      %c1_i32_49 = arith.constant 1 : i32
      %177 = arith.addi %57, %c1_i32_49 : i32
      %178 = arith.index_cast %177 : i32 to index
      %c0_50 = arith.constant 0 : index
      %179 = vector.load %arg9[%178, %c0_50] : memref<22x22xf32, #tpu.memory_space<vmem>>, vector<16x22xf32>
      %c1_i32_51 = arith.constant 1 : i32
      %180 = arith.addi %57, %c1_i32_51 : i32
      %181 = arith.index_cast %180 : i32 to index
      %c0_52 = arith.constant 0 : index
      %182 = vector.load %arg10[%181, %c0_52] : memref<22x22xf32, #tpu.memory_space<vmem>>, vector<16x22xf32>
      %c7_i32 = arith.constant 7 : i32
      %183 = arith.addi %3, %c7_i32 : i32
      %c0_i32_53 = arith.constant 0 : i32
      %184 = arith.addi %183, %c0_i32_53 : i32
      %185 = arith.index_cast %184 : i32 to index
      %186 = memref.load %arg5[%185] : memref<196xf32, #tpu.memory_space<smem>>
      %c7_i32_54 = arith.constant 7 : i32
      %187 = arith.addi %3, %c7_i32_54 : i32
      %c0_i32_55 = arith.constant 0 : i32
      %188 = arith.addi %187, %c0_i32_55 : i32
      %189 = arith.index_cast %188 : i32 to index
      %190 = memref.load %arg6[%189] : memref<196xf32, #tpu.memory_space<smem>>
      %191 = vector.extract_strided_slice %179 {offsets = [0, 0], sizes = [16, 16], strides = [1, 1]} : vector<16x22xf32> to vector<16x16xf32>
      %192 = vector.broadcast %186 : f32 to vector<16x16xf32>
      %193 = arith.mulf %192, %191 : vector<16x16xf32>
      %194 = arith.addf %176, %193 : vector<16x16xf32>
      %195 = vector.extract_strided_slice %182 {offsets = [0, 0], sizes = [16, 16], strides = [1, 1]} : vector<16x22xf32> to vector<16x16xf32>
      %196 = vector.broadcast %190 : f32 to vector<16x16xf32>
      %197 = arith.mulf %196, %195 : vector<16x16xf32>
      %198 = arith.addf %194, %197 : vector<16x16xf32>
      %c7_i32_56 = arith.constant 7 : i32
      %199 = arith.addi %3, %c7_i32_56 : i32
      %c1_i32_57 = arith.constant 1 : i32
      %200 = arith.addi %199, %c1_i32_57 : i32
      %201 = arith.index_cast %200 : i32 to index
      %202 = memref.load %arg5[%201] : memref<196xf32, #tpu.memory_space<smem>>
      %c7_i32_58 = arith.constant 7 : i32
      %203 = arith.addi %3, %c7_i32_58 : i32
      %c1_i32_59 = arith.constant 1 : i32
      %204 = arith.addi %203, %c1_i32_59 : i32
      %205 = arith.index_cast %204 : i32 to index
      %206 = memref.load %arg6[%205] : memref<196xf32, #tpu.memory_space<smem>>
      %207 = vector.extract_strided_slice %179 {offsets = [0, 1], sizes = [16, 16], strides = [1, 1]} : vector<16x22xf32> to vector<16x16xf32>
      %208 = vector.broadcast %202 : f32 to vector<16x16xf32>
      %209 = arith.mulf %208, %207 : vector<16x16xf32>
      %210 = arith.addf %198, %209 : vector<16x16xf32>
      %211 = vector.extract_strided_slice %182 {offsets = [0, 1], sizes = [16, 16], strides = [1, 1]} : vector<16x22xf32> to vector<16x16xf32>
      %212 = vector.broadcast %206 : f32 to vector<16x16xf32>
      %213 = arith.mulf %212, %211 : vector<16x16xf32>
      %214 = arith.addf %210, %213 : vector<16x16xf32>
      %c7_i32_60 = arith.constant 7 : i32
      %215 = arith.addi %3, %c7_i32_60 : i32
      %c2_i32_61 = arith.constant 2 : i32
      %216 = arith.addi %215, %c2_i32_61 : i32
      %217 = arith.index_cast %216 : i32 to index
      %218 = memref.load %arg5[%217] : memref<196xf32, #tpu.memory_space<smem>>
      %c7_i32_62 = arith.constant 7 : i32
      %219 = arith.addi %3, %c7_i32_62 : i32
      %c2_i32_63 = arith.constant 2 : i32
      %220 = arith.addi %219, %c2_i32_63 : i32
      %221 = arith.index_cast %220 : i32 to index
      %222 = memref.load %arg6[%221] : memref<196xf32, #tpu.memory_space<smem>>
      %223 = vector.extract_strided_slice %179 {offsets = [0, 2], sizes = [16, 16], strides = [1, 1]} : vector<16x22xf32> to vector<16x16xf32>
      %224 = vector.broadcast %218 : f32 to vector<16x16xf32>
      %225 = arith.mulf %224, %223 : vector<16x16xf32>
      %226 = arith.addf %214, %225 : vector<16x16xf32>
      %227 = vector.extract_strided_slice %182 {offsets = [0, 2], sizes = [16, 16], strides = [1, 1]} : vector<16x22xf32> to vector<16x16xf32>
      %228 = vector.broadcast %222 : f32 to vector<16x16xf32>
      %229 = arith.mulf %228, %227 : vector<16x16xf32>
      %230 = arith.addf %226, %229 : vector<16x16xf32>
      %c7_i32_64 = arith.constant 7 : i32
      %231 = arith.addi %3, %c7_i32_64 : i32
      %c3_i32_65 = arith.constant 3 : i32
      %232 = arith.addi %231, %c3_i32_65 : i32
      %233 = arith.index_cast %232 : i32 to index
      %234 = memref.load %arg5[%233] : memref<196xf32, #tpu.memory_space<smem>>
      %c7_i32_66 = arith.constant 7 : i32
      %235 = arith.addi %3, %c7_i32_66 : i32
      %c3_i32_67 = arith.constant 3 : i32
      %236 = arith.addi %235, %c3_i32_67 : i32
      %237 = arith.index_cast %236 : i32 to index
      %238 = memref.load %arg6[%237] : memref<196xf32, #tpu.memory_space<smem>>
      %239 = vector.extract_strided_slice %179 {offsets = [0, 3], sizes = [16, 16], strides = [1, 1]} : vector<16x22xf32> to vector<16x16xf32>
      %240 = vector.broadcast %234 : f32 to vector<16x16xf32>
      %241 = arith.mulf %240, %239 : vector<16x16xf32>
      %242 = arith.addf %230, %241 : vector<16x16xf32>
      %243 = vector.extract_strided_slice %182 {offsets = [0, 3], sizes = [16, 16], strides = [1, 1]} : vector<16x22xf32> to vector<16x16xf32>
      %244 = vector.broadcast %238 : f32 to vector<16x16xf32>
      %245 = arith.mulf %244, %243 : vector<16x16xf32>
      %246 = arith.addf %242, %245 : vector<16x16xf32>
      %c7_i32_68 = arith.constant 7 : i32
      %247 = arith.addi %3, %c7_i32_68 : i32
      %c4_i32_69 = arith.constant 4 : i32
      %248 = arith.addi %247, %c4_i32_69 : i32
      %249 = arith.index_cast %248 : i32 to index
      %250 = memref.load %arg5[%249] : memref<196xf32, #tpu.memory_space<smem>>
      %c7_i32_70 = arith.constant 7 : i32
      %251 = arith.addi %3, %c7_i32_70 : i32
      %c4_i32_71 = arith.constant 4 : i32
      %252 = arith.addi %251, %c4_i32_71 : i32
      %253 = arith.index_cast %252 : i32 to index
      %254 = memref.load %arg6[%253] : memref<196xf32, #tpu.memory_space<smem>>
      %255 = vector.extract_strided_slice %179 {offsets = [0, 4], sizes = [16, 16], strides = [1, 1]} : vector<16x22xf32> to vector<16x16xf32>
      %256 = vector.broadcast %250 : f32 to vector<16x16xf32>
      %257 = arith.mulf %256, %255 : vector<16x16xf32>
      %258 = arith.addf %246, %257 : vector<16x16xf32>
      %259 = vector.extract_strided_slice %182 {offsets = [0, 4], sizes = [16, 16], strides = [1, 1]} : vector<16x22xf32> to vector<16x16xf32>
      %260 = vector.broadcast %254 : f32 to vector<16x16xf32>
      %261 = arith.mulf %260, %259 : vector<16x16xf32>
      %262 = arith.addf %258, %261 : vector<16x16xf32>
      %c7_i32_72 = arith.constant 7 : i32
      %263 = arith.addi %3, %c7_i32_72 : i32
      %c5_i32_73 = arith.constant 5 : i32
      %264 = arith.addi %263, %c5_i32_73 : i32
      %265 = arith.index_cast %264 : i32 to index
      %266 = memref.load %arg5[%265] : memref<196xf32, #tpu.memory_space<smem>>
      %c7_i32_74 = arith.constant 7 : i32
      %267 = arith.addi %3, %c7_i32_74 : i32
      %c5_i32_75 = arith.constant 5 : i32
      %268 = arith.addi %267, %c5_i32_75 : i32
      %269 = arith.index_cast %268 : i32 to index
      %270 = memref.load %arg6[%269] : memref<196xf32, #tpu.memory_space<smem>>
      %271 = vector.extract_strided_slice %179 {offsets = [0, 5], sizes = [16, 16], strides = [1, 1]} : vector<16x22xf32> to vector<16x16xf32>
      %272 = vector.broadcast %266 : f32 to vector<16x16xf32>
      %273 = arith.mulf %272, %271 : vector<16x16xf32>
      %274 = arith.addf %262, %273 : vector<16x16xf32>
      %275 = vector.extract_strided_slice %182 {offsets = [0, 5], sizes = [16, 16], strides = [1, 1]} : vector<16x22xf32> to vector<16x16xf32>
      %276 = vector.broadcast %270 : f32 to vector<16x16xf32>
      %277 = arith.mulf %276, %275 : vector<16x16xf32>
      %278 = arith.addf %274, %277 : vector<16x16xf32>
      %c7_i32_76 = arith.constant 7 : i32
      %279 = arith.addi %3, %c7_i32_76 : i32
      %c6_i32_77 = arith.constant 6 : i32
      %280 = arith.addi %279, %c6_i32_77 : i32
      %281 = arith.index_cast %280 : i32 to index
      %282 = memref.load %arg5[%281] : memref<196xf32, #tpu.memory_space<smem>>
      %c7_i32_78 = arith.constant 7 : i32
      %283 = arith.addi %3, %c7_i32_78 : i32
      %c6_i32_79 = arith.constant 6 : i32
      %284 = arith.addi %283, %c6_i32_79 : i32
      %285 = arith.index_cast %284 : i32 to index
      %286 = memref.load %arg6[%285] : memref<196xf32, #tpu.memory_space<smem>>
      %287 = vector.extract_strided_slice %179 {offsets = [0, 6], sizes = [16, 16], strides = [1, 1]} : vector<16x22xf32> to vector<16x16xf32>
      %288 = vector.broadcast %282 : f32 to vector<16x16xf32>
      %289 = arith.mulf %288, %287 : vector<16x16xf32>
      %290 = arith.addf %278, %289 : vector<16x16xf32>
      %291 = vector.extract_strided_slice %182 {offsets = [0, 6], sizes = [16, 16], strides = [1, 1]} : vector<16x22xf32> to vector<16x16xf32>
      %292 = vector.broadcast %286 : f32 to vector<16x16xf32>
      %293 = arith.mulf %292, %291 : vector<16x16xf32>
      %294 = arith.addf %290, %293 : vector<16x16xf32>
      %c2_i32_80 = arith.constant 2 : i32
      %295 = arith.addi %57, %c2_i32_80 : i32
      %296 = arith.index_cast %295 : i32 to index
      %c0_81 = arith.constant 0 : index
      %297 = vector.load %arg9[%296, %c0_81] : memref<22x22xf32, #tpu.memory_space<vmem>>, vector<16x22xf32>
      %c2_i32_82 = arith.constant 2 : i32
      %298 = arith.addi %57, %c2_i32_82 : i32
      %299 = arith.index_cast %298 : i32 to index
      %c0_83 = arith.constant 0 : index
      %300 = vector.load %arg10[%299, %c0_83] : memref<22x22xf32, #tpu.memory_space<vmem>>, vector<16x22xf32>
      %c14_i32 = arith.constant 14 : i32
      %301 = arith.addi %3, %c14_i32 : i32
      %c0_i32_84 = arith.constant 0 : i32
      %302 = arith.addi %301, %c0_i32_84 : i32
      %303 = arith.index_cast %302 : i32 to index
      %304 = memref.load %arg5[%303] : memref<196xf32, #tpu.memory_space<smem>>
      %c14_i32_85 = arith.constant 14 : i32
      %305 = arith.addi %3, %c14_i32_85 : i32
      %c0_i32_86 = arith.constant 0 : i32
      %306 = arith.addi %305, %c0_i32_86 : i32
      %307 = arith.index_cast %306 : i32 to index
      %308 = memref.load %arg6[%307] : memref<196xf32, #tpu.memory_space<smem>>
      %309 = vector.extract_strided_slice %297 {offsets = [0, 0], sizes = [16, 16], strides = [1, 1]} : vector<16x22xf32> to vector<16x16xf32>
      %310 = vector.broadcast %304 : f32 to vector<16x16xf32>
      %311 = arith.mulf %310, %309 : vector<16x16xf32>
      %312 = arith.addf %294, %311 : vector<16x16xf32>
      %313 = vector.extract_strided_slice %300 {offsets = [0, 0], sizes = [16, 16], strides = [1, 1]} : vector<16x22xf32> to vector<16x16xf32>
      %314 = vector.broadcast %308 : f32 to vector<16x16xf32>
      %315 = arith.mulf %314, %313 : vector<16x16xf32>
      %316 = arith.addf %312, %315 : vector<16x16xf32>
      %c14_i32_87 = arith.constant 14 : i32
      %317 = arith.addi %3, %c14_i32_87 : i32
      %c1_i32_88 = arith.constant 1 : i32
      %318 = arith.addi %317, %c1_i32_88 : i32
      %319 = arith.index_cast %318 : i32 to index
      %320 = memref.load %arg5[%319] : memref<196xf32, #tpu.memory_space<smem>>
      %c14_i32_89 = arith.constant 14 : i32
      %321 = arith.addi %3, %c14_i32_89 : i32
      %c1_i32_90 = arith.constant 1 : i32
      %322 = arith.addi %321, %c1_i32_90 : i32
      %323 = arith.index_cast %322 : i32 to index
      %324 = memref.load %arg6[%323] : memref<196xf32, #tpu.memory_space<smem>>
      %325 = vector.extract_strided_slice %297 {offsets = [0, 1], sizes = [16, 16], strides = [1, 1]} : vector<16x22xf32> to vector<16x16xf32>
      %326 = vector.broadcast %320 : f32 to vector<16x16xf32>
      %327 = arith.mulf %326, %325 : vector<16x16xf32>
      %328 = arith.addf %316, %327 : vector<16x16xf32>
      %329 = vector.extract_strided_slice %300 {offsets = [0, 1], sizes = [16, 16], strides = [1, 1]} : vector<16x22xf32> to vector<16x16xf32>
      %330 = vector.broadcast %324 : f32 to vector<16x16xf32>
      %331 = arith.mulf %330, %329 : vector<16x16xf32>
      %332 = arith.addf %328, %331 : vector<16x16xf32>
      %c14_i32_91 = arith.constant 14 : i32
      %333 = arith.addi %3, %c14_i32_91 : i32
      %c2_i32_92 = arith.constant 2 : i32
      %334 = arith.addi %333, %c2_i32_92 : i32
      %335 = arith.index_cast %334 : i32 to index
      %336 = memref.load %arg5[%335] : memref<196xf32, #tpu.memory_space<smem>>
      %c14_i32_93 = arith.constant 14 : i32
      %337 = arith.addi %3, %c14_i32_93 : i32
      %c2_i32_94 = arith.constant 2 : i32
      %338 = arith.addi %337, %c2_i32_94 : i32
      %339 = arith.index_cast %338 : i32 to index
      %340 = memref.load %arg6[%339] : memref<196xf32, #tpu.memory_space<smem>>
      %341 = vector.extract_strided_slice %297 {offsets = [0, 2], sizes = [16, 16], strides = [1, 1]} : vector<16x22xf32> to vector<16x16xf32>
      %342 = vector.broadcast %336 : f32 to vector<16x16xf32>
      %343 = arith.mulf %342, %341 : vector<16x16xf32>
      %344 = arith.addf %332, %343 : vector<16x16xf32>
      %345 = vector.extract_strided_slice %300 {offsets = [0, 2], sizes = [16, 16], strides = [1, 1]} : vector<16x22xf32> to vector<16x16xf32>
      %346 = vector.broadcast %340 : f32 to vector<16x16xf32>
      %347 = arith.mulf %346, %345 : vector<16x16xf32>
      %348 = arith.addf %344, %347 : vector<16x16xf32>
      %c14_i32_95 = arith.constant 14 : i32
      %349 = arith.addi %3, %c14_i32_95 : i32
      %c3_i32_96 = arith.constant 3 : i32
      %350 = arith.addi %349, %c3_i32_96 : i32
      %351 = arith.index_cast %350 : i32 to index
      %352 = memref.load %arg5[%351] : memref<196xf32, #tpu.memory_space<smem>>
      %c14_i32_97 = arith.constant 14 : i32
      %353 = arith.addi %3, %c14_i32_97 : i32
      %c3_i32_98 = arith.constant 3 : i32
      %354 = arith.addi %353, %c3_i32_98 : i32
      %355 = arith.index_cast %354 : i32 to index
      %356 = memref.load %arg6[%355] : memref<196xf32, #tpu.memory_space<smem>>
      %357 = vector.extract_strided_slice %297 {offsets = [0, 3], sizes = [16, 16], strides = [1, 1]} : vector<16x22xf32> to vector<16x16xf32>
      %358 = vector.broadcast %352 : f32 to vector<16x16xf32>
      %359 = arith.mulf %358, %357 : vector<16x16xf32>
      %360 = arith.addf %348, %359 : vector<16x16xf32>
      %361 = vector.extract_strided_slice %300 {offsets = [0, 3], sizes = [16, 16], strides = [1, 1]} : vector<16x22xf32> to vector<16x16xf32>
      %362 = vector.broadcast %356 : f32 to vector<16x16xf32>
      %363 = arith.mulf %362, %361 : vector<16x16xf32>
      %364 = arith.addf %360, %363 : vector<16x16xf32>
      %c14_i32_99 = arith.constant 14 : i32
      %365 = arith.addi %3, %c14_i32_99 : i32
      %c4_i32_100 = arith.constant 4 : i32
      %366 = arith.addi %365, %c4_i32_100 : i32
      %367 = arith.index_cast %366 : i32 to index
      %368 = memref.load %arg5[%367] : memref<196xf32, #tpu.memory_space<smem>>
      %c14_i32_101 = arith.constant 14 : i32
      %369 = arith.addi %3, %c14_i32_101 : i32
      %c4_i32_102 = arith.constant 4 : i32
      %370 = arith.addi %369, %c4_i32_102 : i32
      %371 = arith.index_cast %370 : i32 to index
      %372 = memref.load %arg6[%371] : memref<196xf32, #tpu.memory_space<smem>>
      %373 = vector.extract_strided_slice %297 {offsets = [0, 4], sizes = [16, 16], strides = [1, 1]} : vector<16x22xf32> to vector<16x16xf32>
      %374 = vector.broadcast %368 : f32 to vector<16x16xf32>
      %375 = arith.mulf %374, %373 : vector<16x16xf32>
      %376 = arith.addf %364, %375 : vector<16x16xf32>
      %377 = vector.extract_strided_slice %300 {offsets = [0, 4], sizes = [16, 16], strides = [1, 1]} : vector<16x22xf32> to vector<16x16xf32>
      %378 = vector.broadcast %372 : f32 to vector<16x16xf32>
      %379 = arith.mulf %378, %377 : vector<16x16xf32>
      %380 = arith.addf %376, %379 : vector<16x16xf32>
      %c14_i32_103 = arith.constant 14 : i32
      %381 = arith.addi %3, %c14_i32_103 : i32
      %c5_i32_104 = arith.constant 5 : i32
      %382 = arith.addi %381, %c5_i32_104 : i32
      %383 = arith.index_cast %382 : i32 to index
      %384 = memref.load %arg5[%383] : memref<196xf32, #tpu.memory_space<smem>>
      %c14_i32_105 = arith.constant 14 : i32
      %385 = arith.addi %3, %c14_i32_105 : i32
      %c5_i32_106 = arith.constant 5 : i32
      %386 = arith.addi %385, %c5_i32_106 : i32
      %387 = arith.index_cast %386 : i32 to index
      %388 = memref.load %arg6[%387] : memref<196xf32, #tpu.memory_space<smem>>
      %389 = vector.extract_strided_slice %297 {offsets = [0, 5], sizes = [16, 16], strides = [1, 1]} : vector<16x22xf32> to vector<16x16xf32>
      %390 = vector.broadcast %384 : f32 to vector<16x16xf32>
      %391 = arith.mulf %390, %389 : vector<16x16xf32>
      %392 = arith.addf %380, %391 : vector<16x16xf32>
      %393 = vector.extract_strided_slice %300 {offsets = [0, 5], sizes = [16, 16], strides = [1, 1]} : vector<16x22xf32> to vector<16x16xf32>
      %394 = vector.broadcast %388 : f32 to vector<16x16xf32>
      %395 = arith.mulf %394, %393 : vector<16x16xf32>
      %396 = arith.addf %392, %395 : vector<16x16xf32>
      %c14_i32_107 = arith.constant 14 : i32
      %397 = arith.addi %3, %c14_i32_107 : i32
      %c6_i32_108 = arith.constant 6 : i32
      %398 = arith.addi %397, %c6_i32_108 : i32
      %399 = arith.index_cast %398 : i32 to index
      %400 = memref.load %arg5[%399] : memref<196xf32, #tpu.memory_space<smem>>
      %c14_i32_109 = arith.constant 14 : i32
      %401 = arith.addi %3, %c14_i32_109 : i32
      %c6_i32_110 = arith.constant 6 : i32
      %402 = arith.addi %401, %c6_i32_110 : i32
      %403 = arith.index_cast %402 : i32 to index
      %404 = memref.load %arg6[%403] : memref<196xf32, #tpu.memory_space<smem>>
      %405 = vector.extract_strided_slice %297 {offsets = [0, 6], sizes = [16, 16], strides = [1, 1]} : vector<16x22xf32> to vector<16x16xf32>
      %406 = vector.broadcast %400 : f32 to vector<16x16xf32>
      %407 = arith.mulf %406, %405 : vector<16x16xf32>
      %408 = arith.addf %396, %407 : vector<16x16xf32>
      %409 = vector.extract_strided_slice %300 {offsets = [0, 6], sizes = [16, 16], strides = [1, 1]} : vector<16x22xf32> to vector<16x16xf32>
      %410 = vector.broadcast %404 : f32 to vector<16x16xf32>
      %411 = arith.mulf %410, %409 : vector<16x16xf32>
      %412 = arith.addf %408, %411 : vector<16x16xf32>
      %c3_i32_111 = arith.constant 3 : i32
      %413 = arith.addi %57, %c3_i32_111 : i32
      %414 = arith.index_cast %413 : i32 to index
      %c0_112 = arith.constant 0 : index
      %415 = vector.load %arg9[%414, %c0_112] : memref<22x22xf32, #tpu.memory_space<vmem>>, vector<16x22xf32>
      %c3_i32_113 = arith.constant 3 : i32
      %416 = arith.addi %57, %c3_i32_113 : i32
      %417 = arith.index_cast %416 : i32 to index
      %c0_114 = arith.constant 0 : index
      %418 = vector.load %arg10[%417, %c0_114] : memref<22x22xf32, #tpu.memory_space<vmem>>, vector<16x22xf32>
      %c21_i32 = arith.constant 21 : i32
      %419 = arith.addi %3, %c21_i32 : i32
      %c0_i32_115 = arith.constant 0 : i32
      %420 = arith.addi %419, %c0_i32_115 : i32
      %421 = arith.index_cast %420 : i32 to index
      %422 = memref.load %arg5[%421] : memref<196xf32, #tpu.memory_space<smem>>
      %c21_i32_116 = arith.constant 21 : i32
      %423 = arith.addi %3, %c21_i32_116 : i32
      %c0_i32_117 = arith.constant 0 : i32
      %424 = arith.addi %423, %c0_i32_117 : i32
      %425 = arith.index_cast %424 : i32 to index
      %426 = memref.load %arg6[%425] : memref<196xf32, #tpu.memory_space<smem>>
      %427 = vector.extract_strided_slice %415 {offsets = [0, 0], sizes = [16, 16], strides = [1, 1]} : vector<16x22xf32> to vector<16x16xf32>
      %428 = vector.broadcast %422 : f32 to vector<16x16xf32>
      %429 = arith.mulf %428, %427 : vector<16x16xf32>
      %430 = arith.addf %412, %429 : vector<16x16xf32>
      %431 = vector.extract_strided_slice %418 {offsets = [0, 0], sizes = [16, 16], strides = [1, 1]} : vector<16x22xf32> to vector<16x16xf32>
      %432 = vector.broadcast %426 : f32 to vector<16x16xf32>
      %433 = arith.mulf %432, %431 : vector<16x16xf32>
      %434 = arith.addf %430, %433 : vector<16x16xf32>
      %c21_i32_118 = arith.constant 21 : i32
      %435 = arith.addi %3, %c21_i32_118 : i32
      %c1_i32_119 = arith.constant 1 : i32
      %436 = arith.addi %435, %c1_i32_119 : i32
      %437 = arith.index_cast %436 : i32 to index
      %438 = memref.load %arg5[%437] : memref<196xf32, #tpu.memory_space<smem>>
      %c21_i32_120 = arith.constant 21 : i32
      %439 = arith.addi %3, %c21_i32_120 : i32
      %c1_i32_121 = arith.constant 1 : i32
      %440 = arith.addi %439, %c1_i32_121 : i32
      %441 = arith.index_cast %440 : i32 to index
      %442 = memref.load %arg6[%441] : memref<196xf32, #tpu.memory_space<smem>>
      %443 = vector.extract_strided_slice %415 {offsets = [0, 1], sizes = [16, 16], strides = [1, 1]} : vector<16x22xf32> to vector<16x16xf32>
      %444 = vector.broadcast %438 : f32 to vector<16x16xf32>
      %445 = arith.mulf %444, %443 : vector<16x16xf32>
      %446 = arith.addf %434, %445 : vector<16x16xf32>
      %447 = vector.extract_strided_slice %418 {offsets = [0, 1], sizes = [16, 16], strides = [1, 1]} : vector<16x22xf32> to vector<16x16xf32>
      %448 = vector.broadcast %442 : f32 to vector<16x16xf32>
      %449 = arith.mulf %448, %447 : vector<16x16xf32>
      %450 = arith.addf %446, %449 : vector<16x16xf32>
      %c21_i32_122 = arith.constant 21 : i32
      %451 = arith.addi %3, %c21_i32_122 : i32
      %c2_i32_123 = arith.constant 2 : i32
      %452 = arith.addi %451, %c2_i32_123 : i32
      %453 = arith.index_cast %452 : i32 to index
      %454 = memref.load %arg5[%453] : memref<196xf32, #tpu.memory_space<smem>>
      %c21_i32_124 = arith.constant 21 : i32
      %455 = arith.addi %3, %c21_i32_124 : i32
      %c2_i32_125 = arith.constant 2 : i32
      %456 = arith.addi %455, %c2_i32_125 : i32
      %457 = arith.index_cast %456 : i32 to index
      %458 = memref.load %arg6[%457] : memref<196xf32, #tpu.memory_space<smem>>
      %459 = vector.extract_strided_slice %415 {offsets = [0, 2], sizes = [16, 16], strides = [1, 1]} : vector<16x22xf32> to vector<16x16xf32>
      %460 = vector.broadcast %454 : f32 to vector<16x16xf32>
      %461 = arith.mulf %460, %459 : vector<16x16xf32>
      %462 = arith.addf %450, %461 : vector<16x16xf32>
      %463 = vector.extract_strided_slice %418 {offsets = [0, 2], sizes = [16, 16], strides = [1, 1]} : vector<16x22xf32> to vector<16x16xf32>
      %464 = vector.broadcast %458 : f32 to vector<16x16xf32>
      %465 = arith.mulf %464, %463 : vector<16x16xf32>
      %466 = arith.addf %462, %465 : vector<16x16xf32>
      %c21_i32_126 = arith.constant 21 : i32
      %467 = arith.addi %3, %c21_i32_126 : i32
      %c3_i32_127 = arith.constant 3 : i32
      %468 = arith.addi %467, %c3_i32_127 : i32
      %469 = arith.index_cast %468 : i32 to index
      %470 = memref.load %arg5[%469] : memref<196xf32, #tpu.memory_space<smem>>
      %c21_i32_128 = arith.constant 21 : i32
      %471 = arith.addi %3, %c21_i32_128 : i32
      %c3_i32_129 = arith.constant 3 : i32
      %472 = arith.addi %471, %c3_i32_129 : i32
      %473 = arith.index_cast %472 : i32 to index
      %474 = memref.load %arg6[%473] : memref<196xf32, #tpu.memory_space<smem>>
      %475 = vector.extract_strided_slice %415 {offsets = [0, 3], sizes = [16, 16], strides = [1, 1]} : vector<16x22xf32> to vector<16x16xf32>
      %476 = vector.broadcast %470 : f32 to vector<16x16xf32>
      %477 = arith.mulf %476, %475 : vector<16x16xf32>
      %478 = arith.addf %466, %477 : vector<16x16xf32>
      %479 = vector.extract_strided_slice %418 {offsets = [0, 3], sizes = [16, 16], strides = [1, 1]} : vector<16x22xf32> to vector<16x16xf32>
      %480 = vector.broadcast %474 : f32 to vector<16x16xf32>
      %481 = arith.mulf %480, %479 : vector<16x16xf32>
      %482 = arith.addf %478, %481 : vector<16x16xf32>
      %c21_i32_130 = arith.constant 21 : i32
      %483 = arith.addi %3, %c21_i32_130 : i32
      %c4_i32_131 = arith.constant 4 : i32
      %484 = arith.addi %483, %c4_i32_131 : i32
      %485 = arith.index_cast %484 : i32 to index
      %486 = memref.load %arg5[%485] : memref<196xf32, #tpu.memory_space<smem>>
      %c21_i32_132 = arith.constant 21 : i32
      %487 = arith.addi %3, %c21_i32_132 : i32
      %c4_i32_133 = arith.constant 4 : i32
      %488 = arith.addi %487, %c4_i32_133 : i32
      %489 = arith.index_cast %488 : i32 to index
      %490 = memref.load %arg6[%489] : memref<196xf32, #tpu.memory_space<smem>>
      %491 = vector.extract_strided_slice %415 {offsets = [0, 4], sizes = [16, 16], strides = [1, 1]} : vector<16x22xf32> to vector<16x16xf32>
      %492 = vector.broadcast %486 : f32 to vector<16x16xf32>
      %493 = arith.mulf %492, %491 : vector<16x16xf32>
      %494 = arith.addf %482, %493 : vector<16x16xf32>
      %495 = vector.extract_strided_slice %418 {offsets = [0, 4], sizes = [16, 16], strides = [1, 1]} : vector<16x22xf32> to vector<16x16xf32>
      %496 = vector.broadcast %490 : f32 to vector<16x16xf32>
      %497 = arith.mulf %496, %495 : vector<16x16xf32>
      %498 = arith.addf %494, %497 : vector<16x16xf32>
      %c21_i32_134 = arith.constant 21 : i32
      %499 = arith.addi %3, %c21_i32_134 : i32
      %c5_i32_135 = arith.constant 5 : i32
      %500 = arith.addi %499, %c5_i32_135 : i32
      %501 = arith.index_cast %500 : i32 to index
      %502 = memref.load %arg5[%501] : memref<196xf32, #tpu.memory_space<smem>>
      %c21_i32_136 = arith.constant 21 : i32
      %503 = arith.addi %3, %c21_i32_136 : i32
      %c5_i32_137 = arith.constant 5 : i32
      %504 = arith.addi %503, %c5_i32_137 : i32
      %505 = arith.index_cast %504 : i32 to index
      %506 = memref.load %arg6[%505] : memref<196xf32, #tpu.memory_space<smem>>
      %507 = vector.extract_strided_slice %415 {offsets = [0, 5], sizes = [16, 16], strides = [1, 1]} : vector<16x22xf32> to vector<16x16xf32>
      %508 = vector.broadcast %502 : f32 to vector<16x16xf32>
      %509 = arith.mulf %508, %507 : vector<16x16xf32>
      %510 = arith.addf %498, %509 : vector<16x16xf32>
      %511 = vector.extract_strided_slice %418 {offsets = [0, 5], sizes = [16, 16], strides = [1, 1]} : vector<16x22xf32> to vector<16x16xf32>
      %512 = vector.broadcast %506 : f32 to vector<16x16xf32>
      %513 = arith.mulf %512, %511 : vector<16x16xf32>
      %514 = arith.addf %510, %513 : vector<16x16xf32>
      %c21_i32_138 = arith.constant 21 : i32
      %515 = arith.addi %3, %c21_i32_138 : i32
      %c6_i32_139 = arith.constant 6 : i32
      %516 = arith.addi %515, %c6_i32_139 : i32
      %517 = arith.index_cast %516 : i32 to index
      %518 = memref.load %arg5[%517] : memref<196xf32, #tpu.memory_space<smem>>
      %c21_i32_140 = arith.constant 21 : i32
      %519 = arith.addi %3, %c21_i32_140 : i32
      %c6_i32_141 = arith.constant 6 : i32
      %520 = arith.addi %519, %c6_i32_141 : i32
      %521 = arith.index_cast %520 : i32 to index
      %522 = memref.load %arg6[%521] : memref<196xf32, #tpu.memory_space<smem>>
      %523 = vector.extract_strided_slice %415 {offsets = [0, 6], sizes = [16, 16], strides = [1, 1]} : vector<16x22xf32> to vector<16x16xf32>
      %524 = vector.broadcast %518 : f32 to vector<16x16xf32>
      %525 = arith.mulf %524, %523 : vector<16x16xf32>
      %526 = arith.addf %514, %525 : vector<16x16xf32>
      %527 = vector.extract_strided_slice %418 {offsets = [0, 6], sizes = [16, 16], strides = [1, 1]} : vector<16x22xf32> to vector<16x16xf32>
      %528 = vector.broadcast %522 : f32 to vector<16x16xf32>
      %529 = arith.mulf %528, %527 : vector<16x16xf32>
      %530 = arith.addf %526, %529 : vector<16x16xf32>
      %c4_i32_142 = arith.constant 4 : i32
      %531 = arith.addi %57, %c4_i32_142 : i32
      %532 = arith.index_cast %531 : i32 to index
      %c0_143 = arith.constant 0 : index
      %533 = vector.load %arg9[%532, %c0_143] : memref<22x22xf32, #tpu.memory_space<vmem>>, vector<16x22xf32>
      %c4_i32_144 = arith.constant 4 : i32
      %534 = arith.addi %57, %c4_i32_144 : i32
      %535 = arith.index_cast %534 : i32 to index
      %c0_145 = arith.constant 0 : index
      %536 = vector.load %arg10[%535, %c0_145] : memref<22x22xf32, #tpu.memory_space<vmem>>, vector<16x22xf32>
      %c28_i32 = arith.constant 28 : i32
      %537 = arith.addi %3, %c28_i32 : i32
      %c0_i32_146 = arith.constant 0 : i32
      %538 = arith.addi %537, %c0_i32_146 : i32
      %539 = arith.index_cast %538 : i32 to index
      %540 = memref.load %arg5[%539] : memref<196xf32, #tpu.memory_space<smem>>
      %c28_i32_147 = arith.constant 28 : i32
      %541 = arith.addi %3, %c28_i32_147 : i32
      %c0_i32_148 = arith.constant 0 : i32
      %542 = arith.addi %541, %c0_i32_148 : i32
      %543 = arith.index_cast %542 : i32 to index
      %544 = memref.load %arg6[%543] : memref<196xf32, #tpu.memory_space<smem>>
      %545 = vector.extract_strided_slice %533 {offsets = [0, 0], sizes = [16, 16], strides = [1, 1]} : vector<16x22xf32> to vector<16x16xf32>
      %546 = vector.broadcast %540 : f32 to vector<16x16xf32>
      %547 = arith.mulf %546, %545 : vector<16x16xf32>
      %548 = arith.addf %530, %547 : vector<16x16xf32>
      %549 = vector.extract_strided_slice %536 {offsets = [0, 0], sizes = [16, 16], strides = [1, 1]} : vector<16x22xf32> to vector<16x16xf32>
      %550 = vector.broadcast %544 : f32 to vector<16x16xf32>
      %551 = arith.mulf %550, %549 : vector<16x16xf32>
      %552 = arith.addf %548, %551 : vector<16x16xf32>
      %c28_i32_149 = arith.constant 28 : i32
      %553 = arith.addi %3, %c28_i32_149 : i32
      %c1_i32_150 = arith.constant 1 : i32
      %554 = arith.addi %553, %c1_i32_150 : i32
      %555 = arith.index_cast %554 : i32 to index
      %556 = memref.load %arg5[%555] : memref<196xf32, #tpu.memory_space<smem>>
      %c28_i32_151 = arith.constant 28 : i32
      %557 = arith.addi %3, %c28_i32_151 : i32
      %c1_i32_152 = arith.constant 1 : i32
      %558 = arith.addi %557, %c1_i32_152 : i32
      %559 = arith.index_cast %558 : i32 to index
      %560 = memref.load %arg6[%559] : memref<196xf32, #tpu.memory_space<smem>>
      %561 = vector.extract_strided_slice %533 {offsets = [0, 1], sizes = [16, 16], strides = [1, 1]} : vector<16x22xf32> to vector<16x16xf32>
      %562 = vector.broadcast %556 : f32 to vector<16x16xf32>
      %563 = arith.mulf %562, %561 : vector<16x16xf32>
      %564 = arith.addf %552, %563 : vector<16x16xf32>
      %565 = vector.extract_strided_slice %536 {offsets = [0, 1], sizes = [16, 16], strides = [1, 1]} : vector<16x22xf32> to vector<16x16xf32>
      %566 = vector.broadcast %560 : f32 to vector<16x16xf32>
      %567 = arith.mulf %566, %565 : vector<16x16xf32>
      %568 = arith.addf %564, %567 : vector<16x16xf32>
      %c28_i32_153 = arith.constant 28 : i32
      %569 = arith.addi %3, %c28_i32_153 : i32
      %c2_i32_154 = arith.constant 2 : i32
      %570 = arith.addi %569, %c2_i32_154 : i32
      %571 = arith.index_cast %570 : i32 to index
      %572 = memref.load %arg5[%571] : memref<196xf32, #tpu.memory_space<smem>>
      %c28_i32_155 = arith.constant 28 : i32
      %573 = arith.addi %3, %c28_i32_155 : i32
      %c2_i32_156 = arith.constant 2 : i32
      %574 = arith.addi %573, %c2_i32_156 : i32
      %575 = arith.index_cast %574 : i32 to index
      %576 = memref.load %arg6[%575] : memref<196xf32, #tpu.memory_space<smem>>
      %577 = vector.extract_strided_slice %533 {offsets = [0, 2], sizes = [16, 16], strides = [1, 1]} : vector<16x22xf32> to vector<16x16xf32>
      %578 = vector.broadcast %572 : f32 to vector<16x16xf32>
      %579 = arith.mulf %578, %577 : vector<16x16xf32>
      %580 = arith.addf %568, %579 : vector<16x16xf32>
      %581 = vector.extract_strided_slice %536 {offsets = [0, 2], sizes = [16, 16], strides = [1, 1]} : vector<16x22xf32> to vector<16x16xf32>
      %582 = vector.broadcast %576 : f32 to vector<16x16xf32>
      %583 = arith.mulf %582, %581 : vector<16x16xf32>
      %584 = arith.addf %580, %583 : vector<16x16xf32>
      %c28_i32_157 = arith.constant 28 : i32
      %585 = arith.addi %3, %c28_i32_157 : i32
      %c3_i32_158 = arith.constant 3 : i32
      %586 = arith.addi %585, %c3_i32_158 : i32
      %587 = arith.index_cast %586 : i32 to index
      %588 = memref.load %arg5[%587] : memref<196xf32, #tpu.memory_space<smem>>
      %c28_i32_159 = arith.constant 28 : i32
      %589 = arith.addi %3, %c28_i32_159 : i32
      %c3_i32_160 = arith.constant 3 : i32
      %590 = arith.addi %589, %c3_i32_160 : i32
      %591 = arith.index_cast %590 : i32 to index
      %592 = memref.load %arg6[%591] : memref<196xf32, #tpu.memory_space<smem>>
      %593 = vector.extract_strided_slice %533 {offsets = [0, 3], sizes = [16, 16], strides = [1, 1]} : vector<16x22xf32> to vector<16x16xf32>
      %594 = vector.broadcast %588 : f32 to vector<16x16xf32>
      %595 = arith.mulf %594, %593 : vector<16x16xf32>
      %596 = arith.addf %584, %595 : vector<16x16xf32>
      %597 = vector.extract_strided_slice %536 {offsets = [0, 3], sizes = [16, 16], strides = [1, 1]} : vector<16x22xf32> to vector<16x16xf32>
      %598 = vector.broadcast %592 : f32 to vector<16x16xf32>
      %599 = arith.mulf %598, %597 : vector<16x16xf32>
      %600 = arith.addf %596, %599 : vector<16x16xf32>
      %c28_i32_161 = arith.constant 28 : i32
      %601 = arith.addi %3, %c28_i32_161 : i32
      %c4_i32_162 = arith.constant 4 : i32
      %602 = arith.addi %601, %c4_i32_162 : i32
      %603 = arith.index_cast %602 : i32 to index
      %604 = memref.load %arg5[%603] : memref<196xf32, #tpu.memory_space<smem>>
      %c28_i32_163 = arith.constant 28 : i32
      %605 = arith.addi %3, %c28_i32_163 : i32
      %c4_i32_164 = arith.constant 4 : i32
      %606 = arith.addi %605, %c4_i32_164 : i32
      %607 = arith.index_cast %606 : i32 to index
      %608 = memref.load %arg6[%607] : memref<196xf32, #tpu.memory_space<smem>>
      %609 = vector.extract_strided_slice %533 {offsets = [0, 4], sizes = [16, 16], strides = [1, 1]} : vector<16x22xf32> to vector<16x16xf32>
      %610 = vector.broadcast %604 : f32 to vector<16x16xf32>
      %611 = arith.mulf %610, %609 : vector<16x16xf32>
      %612 = arith.addf %600, %611 : vector<16x16xf32>
      %613 = vector.extract_strided_slice %536 {offsets = [0, 4], sizes = [16, 16], strides = [1, 1]} : vector<16x22xf32> to vector<16x16xf32>
      %614 = vector.broadcast %608 : f32 to vector<16x16xf32>
      %615 = arith.mulf %614, %613 : vector<16x16xf32>
      %616 = arith.addf %612, %615 : vector<16x16xf32>
      %c28_i32_165 = arith.constant 28 : i32
      %617 = arith.addi %3, %c28_i32_165 : i32
      %c5_i32_166 = arith.constant 5 : i32
      %618 = arith.addi %617, %c5_i32_166 : i32
      %619 = arith.index_cast %618 : i32 to index
      %620 = memref.load %arg5[%619] : memref<196xf32, #tpu.memory_space<smem>>
      %c28_i32_167 = arith.constant 28 : i32
      %621 = arith.addi %3, %c28_i32_167 : i32
      %c5_i32_168 = arith.constant 5 : i32
      %622 = arith.addi %621, %c5_i32_168 : i32
      %623 = arith.index_cast %622 : i32 to index
      %624 = memref.load %arg6[%623] : memref<196xf32, #tpu.memory_space<smem>>
      %625 = vector.extract_strided_slice %533 {offsets = [0, 5], sizes = [16, 16], strides = [1, 1]} : vector<16x22xf32> to vector<16x16xf32>
      %626 = vector.broadcast %620 : f32 to vector<16x16xf32>
      %627 = arith.mulf %626, %625 : vector<16x16xf32>
      %628 = arith.addf %616, %627 : vector<16x16xf32>
      %629 = vector.extract_strided_slice %536 {offsets = [0, 5], sizes = [16, 16], strides = [1, 1]} : vector<16x22xf32> to vector<16x16xf32>
      %630 = vector.broadcast %624 : f32 to vector<16x16xf32>
      %631 = arith.mulf %630, %629 : vector<16x16xf32>
      %632 = arith.addf %628, %631 : vector<16x16xf32>
      %c28_i32_169 = arith.constant 28 : i32
      %633 = arith.addi %3, %c28_i32_169 : i32
      %c6_i32_170 = arith.constant 6 : i32
      %634 = arith.addi %633, %c6_i32_170 : i32
      %635 = arith.index_cast %634 : i32 to index
      %636 = memref.load %arg5[%635] : memref<196xf32, #tpu.memory_space<smem>>
      %c28_i32_171 = arith.constant 28 : i32
      %637 = arith.addi %3, %c28_i32_171 : i32
      %c6_i32_172 = arith.constant 6 : i32
      %638 = arith.addi %637, %c6_i32_172 : i32
      %639 = arith.index_cast %638 : i32 to index
      %640 = memref.load %arg6[%639] : memref<196xf32, #tpu.memory_space<smem>>
      %641 = vector.extract_strided_slice %533 {offsets = [0, 6], sizes = [16, 16], strides = [1, 1]} : vector<16x22xf32> to vector<16x16xf32>
      %642 = vector.broadcast %636 : f32 to vector<16x16xf32>
      %643 = arith.mulf %642, %641 : vector<16x16xf32>
      %644 = arith.addf %632, %643 : vector<16x16xf32>
      %645 = vector.extract_strided_slice %536 {offsets = [0, 6], sizes = [16, 16], strides = [1, 1]} : vector<16x22xf32> to vector<16x16xf32>
      %646 = vector.broadcast %640 : f32 to vector<16x16xf32>
      %647 = arith.mulf %646, %645 : vector<16x16xf32>
      %648 = arith.addf %644, %647 : vector<16x16xf32>
      %c5_i32_173 = arith.constant 5 : i32
      %649 = arith.addi %57, %c5_i32_173 : i32
      %650 = arith.index_cast %649 : i32 to index
      %c0_174 = arith.constant 0 : index
      %651 = vector.load %arg9[%650, %c0_174] : memref<22x22xf32, #tpu.memory_space<vmem>>, vector<16x22xf32>
      %c5_i32_175 = arith.constant 5 : i32
      %652 = arith.addi %57, %c5_i32_175 : i32
      %653 = arith.index_cast %652 : i32 to index
      %c0_176 = arith.constant 0 : index
      %654 = vector.load %arg10[%653, %c0_176] : memref<22x22xf32, #tpu.memory_space<vmem>>, vector<16x22xf32>
      %c35_i32 = arith.constant 35 : i32
      %655 = arith.addi %3, %c35_i32 : i32
      %c0_i32_177 = arith.constant 0 : i32
      %656 = arith.addi %655, %c0_i32_177 : i32
      %657 = arith.index_cast %656 : i32 to index
      %658 = memref.load %arg5[%657] : memref<196xf32, #tpu.memory_space<smem>>
      %c35_i32_178 = arith.constant 35 : i32
      %659 = arith.addi %3, %c35_i32_178 : i32
      %c0_i32_179 = arith.constant 0 : i32
      %660 = arith.addi %659, %c0_i32_179 : i32
      %661 = arith.index_cast %660 : i32 to index
      %662 = memref.load %arg6[%661] : memref<196xf32, #tpu.memory_space<smem>>
      %663 = vector.extract_strided_slice %651 {offsets = [0, 0], sizes = [16, 16], strides = [1, 1]} : vector<16x22xf32> to vector<16x16xf32>
      %664 = vector.broadcast %658 : f32 to vector<16x16xf32>
      %665 = arith.mulf %664, %663 : vector<16x16xf32>
      %666 = arith.addf %648, %665 : vector<16x16xf32>
      %667 = vector.extract_strided_slice %654 {offsets = [0, 0], sizes = [16, 16], strides = [1, 1]} : vector<16x22xf32> to vector<16x16xf32>
      %668 = vector.broadcast %662 : f32 to vector<16x16xf32>
      %669 = arith.mulf %668, %667 : vector<16x16xf32>
      %670 = arith.addf %666, %669 : vector<16x16xf32>
      %c35_i32_180 = arith.constant 35 : i32
      %671 = arith.addi %3, %c35_i32_180 : i32
      %c1_i32_181 = arith.constant 1 : i32
      %672 = arith.addi %671, %c1_i32_181 : i32
      %673 = arith.index_cast %672 : i32 to index
      %674 = memref.load %arg5[%673] : memref<196xf32, #tpu.memory_space<smem>>
      %c35_i32_182 = arith.constant 35 : i32
      %675 = arith.addi %3, %c35_i32_182 : i32
      %c1_i32_183 = arith.constant 1 : i32
      %676 = arith.addi %675, %c1_i32_183 : i32
      %677 = arith.index_cast %676 : i32 to index
      %678 = memref.load %arg6[%677] : memref<196xf32, #tpu.memory_space<smem>>
      %679 = vector.extract_strided_slice %651 {offsets = [0, 1], sizes = [16, 16], strides = [1, 1]} : vector<16x22xf32> to vector<16x16xf32>
      %680 = vector.broadcast %674 : f32 to vector<16x16xf32>
      %681 = arith.mulf %680, %679 : vector<16x16xf32>
      %682 = arith.addf %670, %681 : vector<16x16xf32>
      %683 = vector.extract_strided_slice %654 {offsets = [0, 1], sizes = [16, 16], strides = [1, 1]} : vector<16x22xf32> to vector<16x16xf32>
      %684 = vector.broadcast %678 : f32 to vector<16x16xf32>
      %685 = arith.mulf %684, %683 : vector<16x16xf32>
      %686 = arith.addf %682, %685 : vector<16x16xf32>
      %c35_i32_184 = arith.constant 35 : i32
      %687 = arith.addi %3, %c35_i32_184 : i32
      %c2_i32_185 = arith.constant 2 : i32
      %688 = arith.addi %687, %c2_i32_185 : i32
      %689 = arith.index_cast %688 : i32 to index
      %690 = memref.load %arg5[%689] : memref<196xf32, #tpu.memory_space<smem>>
      %c35_i32_186 = arith.constant 35 : i32
      %691 = arith.addi %3, %c35_i32_186 : i32
      %c2_i32_187 = arith.constant 2 : i32
      %692 = arith.addi %691, %c2_i32_187 : i32
      %693 = arith.index_cast %692 : i32 to index
      %694 = memref.load %arg6[%693] : memref<196xf32, #tpu.memory_space<smem>>
      %695 = vector.extract_strided_slice %651 {offsets = [0, 2], sizes = [16, 16], strides = [1, 1]} : vector<16x22xf32> to vector<16x16xf32>
      %696 = vector.broadcast %690 : f32 to vector<16x16xf32>
      %697 = arith.mulf %696, %695 : vector<16x16xf32>
      %698 = arith.addf %686, %697 : vector<16x16xf32>
      %699 = vector.extract_strided_slice %654 {offsets = [0, 2], sizes = [16, 16], strides = [1, 1]} : vector<16x22xf32> to vector<16x16xf32>
      %700 = vector.broadcast %694 : f32 to vector<16x16xf32>
      %701 = arith.mulf %700, %699 : vector<16x16xf32>
      %702 = arith.addf %698, %701 : vector<16x16xf32>
      %c35_i32_188 = arith.constant 35 : i32
      %703 = arith.addi %3, %c35_i32_188 : i32
      %c3_i32_189 = arith.constant 3 : i32
      %704 = arith.addi %703, %c3_i32_189 : i32
      %705 = arith.index_cast %704 : i32 to index
      %706 = memref.load %arg5[%705] : memref<196xf32, #tpu.memory_space<smem>>
      %c35_i32_190 = arith.constant 35 : i32
      %707 = arith.addi %3, %c35_i32_190 : i32
      %c3_i32_191 = arith.constant 3 : i32
      %708 = arith.addi %707, %c3_i32_191 : i32
      %709 = arith.index_cast %708 : i32 to index
      %710 = memref.load %arg6[%709] : memref<196xf32, #tpu.memory_space<smem>>
      %711 = vector.extract_strided_slice %651 {offsets = [0, 3], sizes = [16, 16], strides = [1, 1]} : vector<16x22xf32> to vector<16x16xf32>
      %712 = vector.broadcast %706 : f32 to vector<16x16xf32>
      %713 = arith.mulf %712, %711 : vector<16x16xf32>
      %714 = arith.addf %702, %713 : vector<16x16xf32>
      %715 = vector.extract_strided_slice %654 {offsets = [0, 3], sizes = [16, 16], strides = [1, 1]} : vector<16x22xf32> to vector<16x16xf32>
      %716 = vector.broadcast %710 : f32 to vector<16x16xf32>
      %717 = arith.mulf %716, %715 : vector<16x16xf32>
      %718 = arith.addf %714, %717 : vector<16x16xf32>
      %c35_i32_192 = arith.constant 35 : i32
      %719 = arith.addi %3, %c35_i32_192 : i32
      %c4_i32_193 = arith.constant 4 : i32
      %720 = arith.addi %719, %c4_i32_193 : i32
      %721 = arith.index_cast %720 : i32 to index
      %722 = memref.load %arg5[%721] : memref<196xf32, #tpu.memory_space<smem>>
      %c35_i32_194 = arith.constant 35 : i32
      %723 = arith.addi %3, %c35_i32_194 : i32
      %c4_i32_195 = arith.constant 4 : i32
      %724 = arith.addi %723, %c4_i32_195 : i32
      %725 = arith.index_cast %724 : i32 to index
      %726 = memref.load %arg6[%725] : memref<196xf32, #tpu.memory_space<smem>>
      %727 = vector.extract_strided_slice %651 {offsets = [0, 4], sizes = [16, 16], strides = [1, 1]} : vector<16x22xf32> to vector<16x16xf32>
      %728 = vector.broadcast %722 : f32 to vector<16x16xf32>
      %729 = arith.mulf %728, %727 : vector<16x16xf32>
      %730 = arith.addf %718, %729 : vector<16x16xf32>
      %731 = vector.extract_strided_slice %654 {offsets = [0, 4], sizes = [16, 16], strides = [1, 1]} : vector<16x22xf32> to vector<16x16xf32>
      %732 = vector.broadcast %726 : f32 to vector<16x16xf32>
      %733 = arith.mulf %732, %731 : vector<16x16xf32>
      %734 = arith.addf %730, %733 : vector<16x16xf32>
      %c35_i32_196 = arith.constant 35 : i32
      %735 = arith.addi %3, %c35_i32_196 : i32
      %c5_i32_197 = arith.constant 5 : i32
      %736 = arith.addi %735, %c5_i32_197 : i32
      %737 = arith.index_cast %736 : i32 to index
      %738 = memref.load %arg5[%737] : memref<196xf32, #tpu.memory_space<smem>>
      %c35_i32_198 = arith.constant 35 : i32
      %739 = arith.addi %3, %c35_i32_198 : i32
      %c5_i32_199 = arith.constant 5 : i32
      %740 = arith.addi %739, %c5_i32_199 : i32
      %741 = arith.index_cast %740 : i32 to index
      %742 = memref.load %arg6[%741] : memref<196xf32, #tpu.memory_space<smem>>
      %743 = vector.extract_strided_slice %651 {offsets = [0, 5], sizes = [16, 16], strides = [1, 1]} : vector<16x22xf32> to vector<16x16xf32>
      %744 = vector.broadcast %738 : f32 to vector<16x16xf32>
      %745 = arith.mulf %744, %743 : vector<16x16xf32>
      %746 = arith.addf %734, %745 : vector<16x16xf32>
      %747 = vector.extract_strided_slice %654 {offsets = [0, 5], sizes = [16, 16], strides = [1, 1]} : vector<16x22xf32> to vector<16x16xf32>
      %748 = vector.broadcast %742 : f32 to vector<16x16xf32>
      %749 = arith.mulf %748, %747 : vector<16x16xf32>
      %750 = arith.addf %746, %749 : vector<16x16xf32>
      %c35_i32_200 = arith.constant 35 : i32
      %751 = arith.addi %3, %c35_i32_200 : i32
      %c6_i32_201 = arith.constant 6 : i32
      %752 = arith.addi %751, %c6_i32_201 : i32
      %753 = arith.index_cast %752 : i32 to index
      %754 = memref.load %arg5[%753] : memref<196xf32, #tpu.memory_space<smem>>
      %c35_i32_202 = arith.constant 35 : i32
      %755 = arith.addi %3, %c35_i32_202 : i32
      %c6_i32_203 = arith.constant 6 : i32
      %756 = arith.addi %755, %c6_i32_203 : i32
      %757 = arith.index_cast %756 : i32 to index
      %758 = memref.load %arg6[%757] : memref<196xf32, #tpu.memory_space<smem>>
      %759 = vector.extract_strided_slice %651 {offsets = [0, 6], sizes = [16, 16], strides = [1, 1]} : vector<16x22xf32> to vector<16x16xf32>
      %760 = vector.broadcast %754 : f32 to vector<16x16xf32>
      %761 = arith.mulf %760, %759 : vector<16x16xf32>
      %762 = arith.addf %750, %761 : vector<16x16xf32>
      %763 = vector.extract_strided_slice %654 {offsets = [0, 6], sizes = [16, 16], strides = [1, 1]} : vector<16x22xf32> to vector<16x16xf32>
      %764 = vector.broadcast %758 : f32 to vector<16x16xf32>
      %765 = arith.mulf %764, %763 : vector<16x16xf32>
      %766 = arith.addf %762, %765 : vector<16x16xf32>
      %c6_i32_204 = arith.constant 6 : i32
      %767 = arith.addi %57, %c6_i32_204 : i32
      %768 = arith.index_cast %767 : i32 to index
      %c0_205 = arith.constant 0 : index
      %769 = vector.load %arg9[%768, %c0_205] : memref<22x22xf32, #tpu.memory_space<vmem>>, vector<16x22xf32>
      %c6_i32_206 = arith.constant 6 : i32
      %770 = arith.addi %57, %c6_i32_206 : i32
      %771 = arith.index_cast %770 : i32 to index
      %c0_207 = arith.constant 0 : index
      %772 = vector.load %arg10[%771, %c0_207] : memref<22x22xf32, #tpu.memory_space<vmem>>, vector<16x22xf32>
      %c42_i32 = arith.constant 42 : i32
      %773 = arith.addi %3, %c42_i32 : i32
      %c0_i32_208 = arith.constant 0 : i32
      %774 = arith.addi %773, %c0_i32_208 : i32
      %775 = arith.index_cast %774 : i32 to index
      %776 = memref.load %arg5[%775] : memref<196xf32, #tpu.memory_space<smem>>
      %c42_i32_209 = arith.constant 42 : i32
      %777 = arith.addi %3, %c42_i32_209 : i32
      %c0_i32_210 = arith.constant 0 : i32
      %778 = arith.addi %777, %c0_i32_210 : i32
      %779 = arith.index_cast %778 : i32 to index
      %780 = memref.load %arg6[%779] : memref<196xf32, #tpu.memory_space<smem>>
      %781 = vector.extract_strided_slice %769 {offsets = [0, 0], sizes = [16, 16], strides = [1, 1]} : vector<16x22xf32> to vector<16x16xf32>
      %782 = vector.broadcast %776 : f32 to vector<16x16xf32>
      %783 = arith.mulf %782, %781 : vector<16x16xf32>
      %784 = arith.addf %766, %783 : vector<16x16xf32>
      %785 = vector.extract_strided_slice %772 {offsets = [0, 0], sizes = [16, 16], strides = [1, 1]} : vector<16x22xf32> to vector<16x16xf32>
      %786 = vector.broadcast %780 : f32 to vector<16x16xf32>
      %787 = arith.mulf %786, %785 : vector<16x16xf32>
      %788 = arith.addf %784, %787 : vector<16x16xf32>
      %c42_i32_211 = arith.constant 42 : i32
      %789 = arith.addi %3, %c42_i32_211 : i32
      %c1_i32_212 = arith.constant 1 : i32
      %790 = arith.addi %789, %c1_i32_212 : i32
      %791 = arith.index_cast %790 : i32 to index
      %792 = memref.load %arg5[%791] : memref<196xf32, #tpu.memory_space<smem>>
      %c42_i32_213 = arith.constant 42 : i32
      %793 = arith.addi %3, %c42_i32_213 : i32
      %c1_i32_214 = arith.constant 1 : i32
      %794 = arith.addi %793, %c1_i32_214 : i32
      %795 = arith.index_cast %794 : i32 to index
      %796 = memref.load %arg6[%795] : memref<196xf32, #tpu.memory_space<smem>>
      %797 = vector.extract_strided_slice %769 {offsets = [0, 1], sizes = [16, 16], strides = [1, 1]} : vector<16x22xf32> to vector<16x16xf32>
      %798 = vector.broadcast %792 : f32 to vector<16x16xf32>
      %799 = arith.mulf %798, %797 : vector<16x16xf32>
      %800 = arith.addf %788, %799 : vector<16x16xf32>
      %801 = vector.extract_strided_slice %772 {offsets = [0, 1], sizes = [16, 16], strides = [1, 1]} : vector<16x22xf32> to vector<16x16xf32>
      %802 = vector.broadcast %796 : f32 to vector<16x16xf32>
      %803 = arith.mulf %802, %801 : vector<16x16xf32>
      %804 = arith.addf %800, %803 : vector<16x16xf32>
      %c42_i32_215 = arith.constant 42 : i32
      %805 = arith.addi %3, %c42_i32_215 : i32
      %c2_i32_216 = arith.constant 2 : i32
      %806 = arith.addi %805, %c2_i32_216 : i32
      %807 = arith.index_cast %806 : i32 to index
      %808 = memref.load %arg5[%807] : memref<196xf32, #tpu.memory_space<smem>>
      %c42_i32_217 = arith.constant 42 : i32
      %809 = arith.addi %3, %c42_i32_217 : i32
      %c2_i32_218 = arith.constant 2 : i32
      %810 = arith.addi %809, %c2_i32_218 : i32
      %811 = arith.index_cast %810 : i32 to index
      %812 = memref.load %arg6[%811] : memref<196xf32, #tpu.memory_space<smem>>
      %813 = vector.extract_strided_slice %769 {offsets = [0, 2], sizes = [16, 16], strides = [1, 1]} : vector<16x22xf32> to vector<16x16xf32>
      %814 = vector.broadcast %808 : f32 to vector<16x16xf32>
      %815 = arith.mulf %814, %813 : vector<16x16xf32>
      %816 = arith.addf %804, %815 : vector<16x16xf32>
      %817 = vector.extract_strided_slice %772 {offsets = [0, 2], sizes = [16, 16], strides = [1, 1]} : vector<16x22xf32> to vector<16x16xf32>
      %818 = vector.broadcast %812 : f32 to vector<16x16xf32>
      %819 = arith.mulf %818, %817 : vector<16x16xf32>
      %820 = arith.addf %816, %819 : vector<16x16xf32>
      %c42_i32_219 = arith.constant 42 : i32
      %821 = arith.addi %3, %c42_i32_219 : i32
      %c3_i32_220 = arith.constant 3 : i32
      %822 = arith.addi %821, %c3_i32_220 : i32
      %823 = arith.index_cast %822 : i32 to index
      %824 = memref.load %arg5[%823] : memref<196xf32, #tpu.memory_space<smem>>
      %c42_i32_221 = arith.constant 42 : i32
      %825 = arith.addi %3, %c42_i32_221 : i32
      %c3_i32_222 = arith.constant 3 : i32
      %826 = arith.addi %825, %c3_i32_222 : i32
      %827 = arith.index_cast %826 : i32 to index
      %828 = memref.load %arg6[%827] : memref<196xf32, #tpu.memory_space<smem>>
      %829 = vector.extract_strided_slice %769 {offsets = [0, 3], sizes = [16, 16], strides = [1, 1]} : vector<16x22xf32> to vector<16x16xf32>
      %830 = vector.broadcast %824 : f32 to vector<16x16xf32>
      %831 = arith.mulf %830, %829 : vector<16x16xf32>
      %832 = arith.addf %820, %831 : vector<16x16xf32>
      %833 = vector.extract_strided_slice %772 {offsets = [0, 3], sizes = [16, 16], strides = [1, 1]} : vector<16x22xf32> to vector<16x16xf32>
      %834 = vector.broadcast %828 : f32 to vector<16x16xf32>
      %835 = arith.mulf %834, %833 : vector<16x16xf32>
      %836 = arith.addf %832, %835 : vector<16x16xf32>
      %c42_i32_223 = arith.constant 42 : i32
      %837 = arith.addi %3, %c42_i32_223 : i32
      %c4_i32_224 = arith.constant 4 : i32
      %838 = arith.addi %837, %c4_i32_224 : i32
      %839 = arith.index_cast %838 : i32 to index
      %840 = memref.load %arg5[%839] : memref<196xf32, #tpu.memory_space<smem>>
      %c42_i32_225 = arith.constant 42 : i32
      %841 = arith.addi %3, %c42_i32_225 : i32
      %c4_i32_226 = arith.constant 4 : i32
      %842 = arith.addi %841, %c4_i32_226 : i32
      %843 = arith.index_cast %842 : i32 to index
      %844 = memref.load %arg6[%843] : memref<196xf32, #tpu.memory_space<smem>>
      %845 = vector.extract_strided_slice %769 {offsets = [0, 4], sizes = [16, 16], strides = [1, 1]} : vector<16x22xf32> to vector<16x16xf32>
      %846 = vector.broadcast %840 : f32 to vector<16x16xf32>
      %847 = arith.mulf %846, %845 : vector<16x16xf32>
      %848 = arith.addf %836, %847 : vector<16x16xf32>
      %849 = vector.extract_strided_slice %772 {offsets = [0, 4], sizes = [16, 16], strides = [1, 1]} : vector<16x22xf32> to vector<16x16xf32>
      %850 = vector.broadcast %844 : f32 to vector<16x16xf32>
      %851 = arith.mulf %850, %849 : vector<16x16xf32>
      %852 = arith.addf %848, %851 : vector<16x16xf32>
      %c42_i32_227 = arith.constant 42 : i32
      %853 = arith.addi %3, %c42_i32_227 : i32
      %c5_i32_228 = arith.constant 5 : i32
      %854 = arith.addi %853, %c5_i32_228 : i32
      %855 = arith.index_cast %854 : i32 to index
      %856 = memref.load %arg5[%855] : memref<196xf32, #tpu.memory_space<smem>>
      %c42_i32_229 = arith.constant 42 : i32
      %857 = arith.addi %3, %c42_i32_229 : i32
      %c5_i32_230 = arith.constant 5 : i32
      %858 = arith.addi %857, %c5_i32_230 : i32
      %859 = arith.index_cast %858 : i32 to index
      %860 = memref.load %arg6[%859] : memref<196xf32, #tpu.memory_space<smem>>
      %861 = vector.extract_strided_slice %769 {offsets = [0, 5], sizes = [16, 16], strides = [1, 1]} : vector<16x22xf32> to vector<16x16xf32>
      %862 = vector.broadcast %856 : f32 to vector<16x16xf32>
      %863 = arith.mulf %862, %861 : vector<16x16xf32>
      %864 = arith.addf %852, %863 : vector<16x16xf32>
      %865 = vector.extract_strided_slice %772 {offsets = [0, 5], sizes = [16, 16], strides = [1, 1]} : vector<16x22xf32> to vector<16x16xf32>
      %866 = vector.broadcast %860 : f32 to vector<16x16xf32>
      %867 = arith.mulf %866, %865 : vector<16x16xf32>
      %868 = arith.addf %864, %867 : vector<16x16xf32>
      %c42_i32_231 = arith.constant 42 : i32
      %869 = arith.addi %3, %c42_i32_231 : i32
      %c6_i32_232 = arith.constant 6 : i32
      %870 = arith.addi %869, %c6_i32_232 : i32
      %871 = arith.index_cast %870 : i32 to index
      %872 = memref.load %arg5[%871] : memref<196xf32, #tpu.memory_space<smem>>
      %c42_i32_233 = arith.constant 42 : i32
      %873 = arith.addi %3, %c42_i32_233 : i32
      %c6_i32_234 = arith.constant 6 : i32
      %874 = arith.addi %873, %c6_i32_234 : i32
      %875 = arith.index_cast %874 : i32 to index
      %876 = memref.load %arg6[%875] : memref<196xf32, #tpu.memory_space<smem>>
      %877 = vector.extract_strided_slice %769 {offsets = [0, 6], sizes = [16, 16], strides = [1, 1]} : vector<16x22xf32> to vector<16x16xf32>
      %878 = vector.broadcast %872 : f32 to vector<16x16xf32>
      %879 = arith.mulf %878, %877 : vector<16x16xf32>
      %880 = arith.addf %868, %879 : vector<16x16xf32>
      %881 = vector.extract_strided_slice %772 {offsets = [0, 6], sizes = [16, 16], strides = [1, 1]} : vector<16x22xf32> to vector<16x16xf32>
      %882 = vector.broadcast %876 : f32 to vector<16x16xf32>
      %883 = arith.mulf %882, %881 : vector<16x16xf32>
      %884 = arith.addf %880, %883 : vector<16x16xf32>
      %885 = arith.negf %884 : vector<16x16xf32>
      %886 = math.exp %885 : vector<16x16xf32>
      %cst = arith.constant 1.000000e+00 : f32
      %887 = vector.broadcast %cst : f32 to vector<16x16xf32>
      %888 = arith.addf %887, %886 : vector<16x16xf32>
      %889 = arith.divf %887, %888 : vector<16x16xf32>
      %890 = arith.negf %889 : vector<16x16xf32>
      %891 = math.exp %890 : vector<16x16xf32>
      %cst_235 = arith.constant 1.000000e+00 : f32
      %892 = vector.broadcast %cst_235 : f32 to vector<16x16xf32>
      %893 = arith.addf %892, %891 : vector<16x16xf32>
      %894 = arith.divf %892, %893 : vector<16x16xf32>
      %c0_236 = arith.constant 0 : index
      %895 = arith.index_cast %arg11 : i32 to index
      %896 = arith.index_cast %57 : i32 to index
      %c0_237 = arith.constant 0 : index
      %897 = vector.load %arg2[%c0_236, %895, %896, %c0_237] : memref<1x4x16x16xf32, #tpu.memory_space<vmem>>, vector<1x1x16x16xf32>
      %898 = vector.shape_cast %897 : vector<1x1x16x16xf32> to vector<16x16xf32>
      %c0_238 = arith.constant 0 : index
      %899 = arith.index_cast %arg11 : i32 to index
      %900 = arith.index_cast %57 : i32 to index
      %c0_239 = arith.constant 0 : index
      %901 = vector.load %arg3[%c0_238, %899, %900, %c0_239] : memref<1x4x16x16xf32, #tpu.memory_space<vmem>>, vector<1x1x16x16xf32>
      %902 = vector.shape_cast %901 : vector<1x1x16x16xf32> to vector<16x16xf32>
      %903 = arith.mulf %894, %898 : vector<16x16xf32>
      %cst_240 = arith.constant 1.000000e+00 : f32
      %904 = vector.broadcast %cst_240 : f32 to vector<16x16xf32>
      %905 = arith.subf %904, %894 : vector<16x16xf32>
      %906 = arith.mulf %905, %902 : vector<16x16xf32>
      %907 = arith.addf %903, %906 : vector<16x16xf32>
      %c0_241 = arith.constant 0 : index
      %908 = arith.index_cast %arg11 : i32 to index
      %909 = arith.index_cast %57 : i32 to index
      %c0_242 = arith.constant 0 : index
      %910 = vector.load %arg8[%c0_241, %908, %909, %c0_242] : memref<1x4x16x16xf32, #tpu.memory_space<vmem>>, vector<1x1x16x16xf32>
      %911 = vector.shape_cast %910 : vector<1x1x16x16xf32> to vector<16x16xf32>
      %912 = vector.shape_cast %907 : vector<16x16xf32> to vector<1x1x16x16xf32>
      tpu.vector_store %arg8[%c0_241, %908, %909, %c0_242], %912 {strides = array<i32>} : memref<1x4x16x16xf32, #tpu.memory_space<vmem>>, vector<1x1x16x16xf32>,
      %c1_i32_243 = arith.constant 1 : i32
    }
    %c4_i32_0 = arith.constant 4 : i32
    return
  }
  func.func @transform_0(%arg0: i32, %arg1: i32) -> (i32, i32, i32, i32) {
    %c0_i32 = arith.constant 0 : i32
    %c0_i32_0 = arith.constant 0 : i32
    %c0_i32_1 = arith.constant 0 : i32
    return %arg0, %arg1, %c0_i32, %c0_i32_0 : i32, i32, i32, i32
  }
  func.func @transform_1(%arg0: i32, %arg1: i32) -> (i32, i32, i32, i32) {
    %c0_i32 = arith.constant 0 : i32
    %c0_i32_0 = arith.constant 0 : i32
    %c0_i32_1 = arith.constant 0 : i32
    return %arg0, %arg1, %c0_i32, %c0_i32_0 : i32, i32, i32, i32
  }
  func.func @transform_2(%arg0: i32, %arg1: i32) -> (i32, i32, i32, i32) {
    %c0_i32 = arith.constant 0 : i32
    %c0_i32_0 = arith.constant 0 : i32
    %c0_i32_1 = arith.constant 0 : i32
    return %arg0, %arg1, %c0_i32, %c0_i32_0 : i32, i32, i32, i32
  }
  func.func @transform_3(%arg0: i32, %arg1: i32) -> i32 {
    %c0_i32 = arith.constant 0 : i32
    %c0_i32_0 = arith.constant 0 : i32
    return %c0_i32 : i32
  }
  func.func @transform_4(%arg0: i32, %arg1: i32) -> i32 {
    %c0_i32 = arith.constant 0 : i32
    %c0_i32_0 = arith.constant 0 : i32
    return %c0_i32 : i32
  }
  func.func @transform_5(%arg0: i32, %arg1: i32) -> i32 {
    %c0_i32 = arith.constant 0 : i32
    %c0_i32_0 = arith.constant 0 : i32
    return %c0_i32 : i32
  }
  func.func @transform_6(%arg0: i32, %arg1: i32) -> (i32, i32, i32, i32) {
    %c0_i32 = arith.constant 0 : i32
    %c0_i32_0 = arith.constant 0 : i32
    %c0_i32_1 = arith.constant 0 : i32
    return %arg0, %arg1, %c0_i32, %c0_i32_0 : i32, i32, i32, i32
  }
}

</mosaic_0001>

<bundles_post_ra>
// kernel: tpu_custom_call.1
= control target key start
LH: loop header
LB: loop body
LE: loop exit
PB: predicated region body
PF: predicated region fallthrough
CT: control target
= control target key end

     0   :  { %s4290_s0 = inlined_call_operand.hbm [shape: f32[2,4,16,16], index: 0, kind: input, shape index: {}]   ;;  %s4291_s1 = inlined_call_operand.hbm [shape: f32[2,4,16,16], index: 1, kind: input, shape index: {}]   ;;  %s4292_s2 = inlined_call_operand.hbm [shape: f32[2,4,16,16], index: 2, kind: input, shape index: {}]   ;;  %s4293_s3 = inlined_call_operand.vmem [shape: f32[196], index: 3, kind: input, shape index: {}]   ;;  %s4294_s4 = inlined_call_operand.vmem [shape: f32[196], index: 4, kind: input, shape index: {}]   ;;  %s4295_s5 = inlined_call_operand.vmem [shape: f32[4], index: 5, kind: input, shape index: {}]   ;;  %s4296_s6 = inlined_call_operand.hbm [shape: f32[2,4,16,16], index: 6, kind: output, shape index: {}]  }
   0x1   :  { %4379 = sst [smem:[#allocation80_spill]] %s4290_s0 }
   0x2   :  { %4380 = sst [smem:[#allocation81_spill]] %s4291_s1 }
   0x3   :  { %4381 = sst [smem:[#allocation82_spill]] %s4292_s2 }
   0x4   :  { %4382 = sst [smem:[#allocation83_spill]] %s4293_s3 }
   0x5   :  { %4383 = sst [smem:[#allocation84_spill]] %s4294_s4 }
   0x6   :  { %4384 = sst [smem:[#allocation85_spill]] %s4295_s5 }
   0x7   :  { %4385 = sst [smem:[#allocation86_spill]] %s4296_s6 }
   0x8   :  { %11 = vsyncpa [#allocation5], 0 }
   0x9   :  { %13 = vsyncpa [#allocation5 + $0x1], 0 }
   0xa   :  { %14 = vsyncpa [#allocation9], 0 }
   0xb   :  { %16 = vsyncpa [#allocation9 + $0x1], 0 }
   0xc   :  { %17 = vsyncpa [#allocation7], 0 }
   0xd   :  { %18 = vsyncpa [#allocation13], 0 }
   0xe   :  { %19 = vsyncpa [#allocation6], 0 }
   0xf   :  { %21 = vsyncpa [#allocation6 + $0x1], 0  ;;  %s2713_s21 = smov 0   ;;  %s2715_s22 = smov 0  }
  0x10   :  { %s2717_s23 = smov 0   ;;  %s2719_s24 = smov 0  }
  0x11   :  { %s2721_s25 = smov 0   ;;  %s2723_s26 = smov 0  }
  0x12 LB: > { %4386 = sst [smem:[#allocation21_spill]] %s2629_s21  ;;  %s2744_s27 = sadd.s32 4294967295, %s2649_s26   ;;  %s2649_s26 = sphi %s2723_s26, %s27_s26   ;;  %s2645_s25 = sphi %s2721_s25, %s4580_s25   ;;  %s2641_s24 = sphi %s2719_s24, %s4579_s24   ;;  %s2637_s23 = sphi %s2717_s23, %s4578_s23   ;;  %s2633_s22 = sphi %s2715_s22, %s4577_s22   ;;  %s2629_s21 = sphi %s2713_s21, %s4576_s21  }
  0x13   : > { %4387 = sst [smem:[#allocation22_spill]] %s2633_s22  ;;  %s2233_s28 = sadd.s32 4294967294, %s2649_s26  }
  0x14   : > { %4388 = sst [smem:[#allocation23_spill]] %s2637_s23  ;;  %p55_p0 = scmp.ne.s32.totalorder %s2637_s23, %s2633_s22 }
  0x15   : > { %4389 = sst [smem:[#allocation24_spill]] %s2641_s24  ;;  %p56_p1 = scmp.eq.s32.totalorder %s2649_s26, 0 }
  0x16   : > { %4390 = sst [smem:[#allocation25_spill]] %s2645_s25  ;;  %p61_p2 = scmp.ne.s32.totalorder %s2633_s22, %s2629_s21 }
  0x17   : > { %4391 = sst [smem:[#allocation26_spill]] %s2649_s26  ;;  %p4297_p3 = scmp.eq.s32.totalorder %s2744_s27, 0 }
  0x18   : > { %p2753_p4 = por %p56_p1, %p55_p0  ;;  %p206_p5 = scmp.eq.s32.totalorder %s2744_s27, 1 }
  0x19   : > { %p2760_p6 = por %p4297_p3, %p61_p2  ;;  %p212_p7 = scmp.eq.s32.totalorder %s2233_s28, 1 }
  0x1a   : > { %p2764_p8 = por %p206_p5, %p55_p0  ;;  %p2234_p9 = scmp.ge.s32.totalorder %s2649_s26, 1 }
  0x1b   : > { %s4393_s30 = scalar_select %p2760_p6, 1, 0 }
  0x1c   : > { %s4394_s7 = scalar_select %p2764_p8, 1, 0 }
  0x1d   : > { %p2769_p10 = por %p212_p7, %p61_p2  ;;  %p219_p11 = scmp.lt.s32.totalorder %s2649_s26, 3 }
  0x1e   : > { %4395 = sst [smem:[#allocation27_spill]] %s4394_s7  ;;  %s48_s13 = sadd.s32 1, %s2637_s23 }
  0x1f   : > { %s4396_s8 = scalar_select %p2769_p10, 1, 0 }
  0x20   : > { %s4398_s4 = sld [smem:[#allocation84_spill]]  ;;  %p2777_p12 = pnand %p2234_p9, %p219_p11 }
  0x21   : > { %4397 = sst [smem:[#allocation28_spill]] %s4396_s8  ;;  %s39_s15 = sadd.s32 1, %s2645_s25 }
  0x22   : > { %s4399_s12 = scalar_select %p2777_p12, 1, 0 }
  0x23   : > { %p2290_p0 = pneg %p2777_p12  ;;  %p2792_p2 = scmp.ge.s32.totalorder %s39_s15, 2 }
  0x24   : > { %p2317_p5 = scmp.lt.s32.totalorder %s2649_s26, 2  ;;  %s4299_s17 = sand.u32 1, %s2637_s23  }
  0x25   : > { %p2787_p1 = pnand %p2290_p0, %p4297_p3 }
  0x26   : > { %s243_s11 = sshll.u32 %s4398_s4, 4  ;;  %s244_s11 = int_to_ptr.vmem [resolvable:$true] %s243_s11 }
  0x27   : > { %s2424_s18 = scalar_lea.vmem %s244_s11, 32  ;;  %p2426_p9 = pneg %p2787_p1 }
  0x28   : > { %p2425_p7 = scmp.ne.s32.totalorder %s244_s11, %s2424_s18  ;;  %p2432_p13 = scmp.lt.s32.totalorder %s244_s11, %s244_s11 }
  0x29   : > { %p2433_p3 = scmp.lt.s32.totalorder %s2424_s18, %s2424_s18 }
  0x2a   : > { %p2427_p11 = pnand %p2426_p9, %p2425_p7 }
  0x2b   : > { %p2434_p10 = por %p2433_p3, %p2432_p13 }
  0x2c   : > { %p2428_p0 = pneg %p2427_p11 }
  0x2e   : > { %p2435_p8 = pnand %p2434_p10, %p2428_p0 }
  0x30   : > { %2438 = shalt.err (!%p2435_p8)
}
  0x31   : > { %s2655_s19 = smov [#allocation12]   ;;  %s4582_s15 = smov (%p2792_p2, %s39_s15), 0 }
  0x32   : > { %2296 = dma.vmem_to_smem (!%p2787_p1), %s244_s11, 32, %s2655_s19, [#allocation13]  }
  0x33   : > { %4402 = sst [smem:[#allocation29_spill]] %s4582_s15  ;;  %s2811_s20 = sshll.u32 %s4299_s17, 6 }
  0x34   : > { %s2814_s28 = sshll.u32 %s2645_s25, 10  ;;  %s43_s9 = ssub.s32 %s2645_s25, %s4582_s15 }
  0x35   : > { %p2822_p3 = pnand %p2317_p5, %p2753_p4  ;;  %p46_p8 = scmp.eq.s32.totalorder %s43_s9, 0 }
  0x36   : > { %s289_s16 = sand.u32 1, %s2649_s26   ;;  %s4405_s1 = sld [smem:[#allocation81_spill]] }
  0x37   : > { %s4403_s10 = scalar_select %p2822_p3, 1, 0 }
  0x38   : > { %s2827_s11 = scalar_select %p46_p8, %s2637_s23, %s48_s13  }
  0x39   : > { %s293_s4 = scalar_lea.vmem [#allocation8], %s2811_s20  ;;  %s2835_s15 = scalar_lea.sflag [#allocation9], %s289_s16 }
  0x3a   : > { %4404 = sst [smem:[#allocation30_spill]] %s2827_s11  ;;  %s303_s8 = sshll.u32 %s293_s4, 4  ;;  %s304_s8 = int_to_ptr.vmem [resolvable:$true] %s303_s8 }
  0x3b   : > { %p4303_p4 = pneg %p2822_p3  ;;  %s2452_s29 = scalar_lea.vmem %s304_s8, 1024 }
  0x3c   : > { %s302_s17 = scalar_lea.hbm %s4405_s1, %s2814_s28  ;;  %p2453_p10 = scmp.ne.s32.totalorder %s304_s8, %s2452_s29 }
  0x3d   : > { %s2656_s13 = smov [#allocation8]  }
  0x3e   : > { %p2455_p13 = pnand %p2453_p10, %p4303_p4  ;;  %s2457_s9 = sshll.u32 %s2656_s13, 4  ;;  %s2458_s9 = int_to_ptr.vmem [resolvable:$false] %s2457_s9 }
  0x3f   : > { %s2459_s25 = scalar_lea.vmem %s2458_s9, 2048  ;;  %p2460_p5 = scmp.lt.s32.totalorder %s304_s8, %s2458_s9 }
  0x40   : > { %p2456_p2 = pneg %p2455_p13  ;;  %p2461_p7 = scmp.lt.s32.totalorder %s2459_s25, %s2452_s29 }
  0x42   : > { %p2462_p11 = por %p2461_p7, %p2460_p5 }
  0x44   : > { %p2463_p0 = pnand %p2462_p11, %p2456_p2 }
  0x46   : > { %2466 = shalt.err (!%p2463_p0)
}
  0x47   : > { %s4308_s4 = smov 128   ;;  %s4310_s16 = smov 8  }
  0x48   : > { %2306 = dma.hbm_to_vmem [thread:$0]  (!%p2822_p3), %s302_s17, 1024, %s304_s8, %s2835_s15, %s4308_s4, %s4308_s4, %s4310_s16  }
  0x49   : > { %s4406_s3 = sld [smem:[#allocation83_spill]] }
  0x4a   : > { %s4407_s5 = sld [smem:[#allocation85_spill]] }
  0x4f   : > { %s232_s13 = sshll.u32 %s4406_s3, 4  ;;  %s233_s13 = int_to_ptr.vmem [resolvable:$true] %s232_s13 }
  0x50   : > { %s254_s29 = sshll.u32 %s4407_s5, 4  ;;  %s2467_s1 = scalar_lea.vmem %s233_s13, 32  ;;  %s255_s29 = int_to_ptr.vmem [resolvable:$true] %s254_s29 }
  0x51   : > { %p2468_p8 = scmp.ne.s32.totalorder %s233_s13, %s2467_s1  ;;  %p2475_p2 = scmp.lt.s32.totalorder %s233_s13, %s233_s13 }
  0x52   : > { %p2476_p5 = scmp.lt.s32.totalorder %s2467_s1, %s2467_s1 }
  0x53   : > { %p2470_p10 = pnand %p2468_p8, %p2426_p9 }
  0x54   : > { %p2477_p7 = por %p2476_p5, %p2475_p2 }
  0x55   : > { %p2471_p13 = pneg %p2470_p10 }
  0x57   : > { %p2478_p11 = pnand %p2477_p7, %p2471_p13 }
  0x59   : > { %2481 = shalt.err (!%p2478_p11)
}
  0x5a   : > { %s2659_s8 = smov [#allocation11]   ;;  %s2482_s17 = scalar_lea.vmem %s255_s29, 16 }
  0x5b   : > { %2293 = dma.vmem_to_smem (!%p2787_p1), %s233_s13, 32, %s2659_s8, [#allocation7]  }
  0x5c   : > { %p2483_p0 = scmp.ne.s32.totalorder %s255_s29, %s2482_s17  ;;  %p2490_p12 = scmp.lt.s32.totalorder %s255_s29, %s255_s29 }
  0x5d   : > { %p2491_p8 = scmp.lt.s32.totalorder %s2482_s17, %s2482_s17 }
  0x5e   : > { %p2485_p4 = pnand %p2483_p0, %p2426_p9 }
  0x5f   : > { %p2492_p10 = por %p2491_p8, %p2490_p12 }
  0x60   : > { %p2486_p6 = pneg %p2485_p4 }
  0x62   : > { %p2493_p3 = pnand %p2492_p10, %p2486_p6 }
  0x64   : > { %2496 = shalt.err (!%p2493_p3)
}
  0x65   : > { %s2660_s1 = smov [#allocation14]   ;;  %s4408_s0 = sld [smem:[#allocation80_spill]] }
  0x66   : > { %2299 = dma.vmem_to_smem (!%p2787_p1), %s255_s29, 16, %s2660_s1, [#allocation13]  }
  0x67   : > { %s269_s9 = scalar_lea.vmem [#allocation4], %s2811_s20  ;;  %s4409_s8 = sand.u32 1, %s2637_s23  }
  0x68   : > { %s279_s25 = sshll.u32 %s269_s9, 4  ;;  %s266_s17 = scalar_lea.sflag [#allocation5], %s4409_s8  ;;  %s280_s25 = int_to_ptr.vmem [resolvable:$true] %s279_s25 }
  0x69   : > { %s2510_s4 = scalar_lea.vmem %s280_s25, 1024  ;;  %p4410_p12 = scmp.ne.s32.totalorder %s4403_s10, 0 }
  0x6a   : > { %p2511_p6 = scmp.ne.s32.totalorder %s280_s25, %s2510_s4  ;;  %s2661_s14 = smov [#allocation4]  }
  0x6b   : > { %s278_s13 = scalar_lea.hbm %s4408_s0, %s2814_s28  ;;  %p4411_p9 = pneg %p4410_p12 }
  0x6c   : > { %s2515_s16 = sshll.u32 %s2661_s14, 4  ;;  %s2516_s16 = int_to_ptr.vmem [resolvable:$false] %s2515_s16 }
  0x6d   : > { %p2513_p3 = pnand %p2511_p6, %p4411_p9  ;;  %s2517_s3 = scalar_lea.vmem %s2516_s16, 2048 }
  0x6e   : > { %p2518_p1 = scmp.lt.s32.totalorder %s280_s25, %s2516_s16  ;;  %p2519_p13 = scmp.lt.s32.totalorder %s2517_s3, %s2510_s4 }
  0x6f   : > { %p2514_p4 = pneg %p2513_p3 }
  0x70   : > { %p2520_p2 = por %p2519_p13, %p2518_p1 }
  0x72   : > { %p2521_p5 = pnand %p2520_p2, %p2514_p4 }
  0x74   : > { %2524 = shalt.err (!%p2521_p5)
}
  0x75   : > { %s4412_s29 = smov 8   ;;  %s4413_s1 = smov 128  }
  0x76   : > { %2303 = dma.hbm_to_vmem [thread:$0]  (!%p4410_p12), %s278_s13, 1024, %s280_s25, %s266_s17, %s4413_s1, %s4413_s1, %s4412_s29  }
  0x77   : > { %s4414_s2 = sld [smem:[#allocation82_spill]]  ;;  %s317_s8 = scalar_lea.vmem [#allocation10], %s2811_s20 }
  0x78   : > { %s327_s14 = sshll.u32 %s317_s8, 4  ;;  %p4415_p11 = pmov %p4411_p9  ;;  %s328_s14 = int_to_ptr.vmem [resolvable:$true] %s327_s14 }
  0x79   : > { %s2538_s3 = scalar_lea.vmem %s328_s14, 1024  ;;  %s2662_s4 = smov [#allocation10]  }
  0x7a   : > { %p2539_p7 = scmp.ne.s32.totalorder %s328_s14, %s2538_s3  ;;  %s2543_s16 = sshll.u32 %s2662_s4, 4  ;;  %s2544_s16 = int_to_ptr.vmem [resolvable:$false] %s2543_s16 }
  0x7b   : > { %s2545_s0 = scalar_lea.vmem %s2544_s16, 2048  ;;  %p2546_p10 = scmp.lt.s32.totalorder %s328_s14, %s2544_s16 }
  0x7c   : > { %p2541_p0 = pnand %p2539_p7, %p4415_p11  ;;  %p2547_p6 = scmp.lt.s32.totalorder %s2545_s0, %s2538_s3 }
  0x7d   : > { %s326_s9 = scalar_lea.hbm %s4414_s2, %s2814_s28 }
  0x7e   : > { %p2542_p8 = pneg %p2541_p0  ;;  %p2548_p9 = por %p2547_p6, %p2546_p10 }
  0x80   : > { %p2549_p3 = pnand %p2548_p9, %p2542_p8 }
  0x82   : > { %2552 = shalt.err (!%p2549_p3)
}
  0x83   : > { %2309 = dma.hbm_to_vmem [thread:$0]  (!%p4410_p12), %s326_s9, 1024, %s328_s14, %s2835_s15, %s4413_s1, %s4413_s1, %s4412_s29  }
  0x84   : > { %p4416_p4 = scmp.ne.s32.totalorder %s4399_s12, 0 }
  0x86   : > { %339 = sbr.rel (%p4416_p4) target bundleno = 966 (0x3c6), region = 44 }
  0x8b   : > { %s2896_s20 = sand.u32 1, %s2633_s22   ;;  %p4419_p1 = scmp.ne.s32.totalorder %s4393_s30, 0 }
  0x8c   : > { %4417 = sst [smem:[#allocation31_spill]] %s2896_s20  ;;  %s2899_s0 = sshll.u32 %s2896_s20, 6 }
  0x8d   : > { %4418 = sst [smem:[#allocation32_spill]] %s2899_s0  ;;  %s342_s28 = scalar_lea.sflag [#allocation5], %s2896_s20 }
  0x8e   : > { %2608 = dma.done.wait (%p4419_p1), %s342_s28, 1024  }
  0x8f   : > { %2610 = vsyncadd (%p4419_p1), %s342_s28, 4294966272  ;;  %s350_s12 = sand.u32 1, %s2744_s27  }
  0x90   : > { %s351_s15 = scalar_lea.sflag [#allocation9], %s350_s12 }
  0x91   : > { %2612 = dma.done.wait (%p4419_p1), %s351_s15, 2048  }
  0x92   : > { %2614 = vsyncadd (%p4419_p1), %s351_s15, 4294965248  ;;  %p4420_p12 = scmp.eq.s32.totalorder %s2744_s27, 0 }
  0x94   : > { %2616 = dma.done.wait (%p4420_p12), [#allocation7], 32   ;;  %p4421_p13 = pmov %p4420_p12 }
  0x95   : > { %p4422_p2 = pmov %p4420_p12 }
  0x96   : > { %2618 = vsyncadd (%p4421_p13), [#allocation7], 4294967264 }
  0x97   : > { %2620 = dma.done.wait (%p4422_p2), [#allocation13], 48   ;;  %p4423_p5 = pmov %p4422_p2 }
  0x99   : > { %2622 = vsyncadd (%p4423_p5), [#allocation13], 4294967248 }
  0x9a   : > { %380 = sfence }
  0x9b   : > { %s2923_s29 = smov 0  }
  0x9c LB: >> { %s4424_s0 = sld [smem:[#allocation32_spill]]  ;;  %s2929_s30 = sshll.u32 %s2653_s29, 4  ;;  %vm458_vm0 = vcmask 7168   ;;  %vm461_vm1 = vcmask 15360   ;;  %vm503_vm2 = vcmask 154624   ;;  %vm500_vm3 = vcmask 23552   ;;  %s2653_s29 = sphi %s2923_s29, %s424_s29  }
  0x9d   : >> { %4425 = sst [smem:[#allocation33_spill]] %s2653_s29  ;;  %s2663_s18 = smov 114   ;;  %vm506_vm4 = vcmask 179200   ;;  %vm516_vm5 = vcmask 1040384   ;;  %vm518_vm6 = vcmask 1041408   ;;  %vm520_vm7 = vcmask 174080  }
  0x9e   : >> { %4426 = sst [smem:[#allocation34_spill]] %s2929_s30  ;;  %s2664_s9 = smov 118   ;;  %vm2016_vm8 = vcmask 130048  }
  0x9f   : >> { %s2665_s8 = smov 116   ;;  %s4318_s14 = smov 127  }
  0xa0   : >> { %s4316_s3 = smov 125   ;;  %s2668_s4 = smov 3  }
  0xa1   : >> { %s2669_s16 = smov 1   ;;  %s2670_s28 = smov 19  }
  0xa2   : >> { %s4427_s25 = scalar_lea.vmem [#allocation10], %s4424_s0  ;;  %s4428_s13 = scalar_lea.vmem [#allocation4], %s4424_s0 }
  0xa3   : >> { %s532_s27 = scalar_lea.vmem %s4427_s25, %s2929_s30 [#allocation10]  ;;  %s2937_s1 = scalar_lea.vmem %s4428_s13, %s2929_s30 [#allocation4] }
  0xa4   : >> { %v533_v0 = vld [vmem:[%s532_s27] sm:$0xff]  ;;  %4429 = sst [smem:[#allocation35_spill]] %s2937_s1  ;;  %s4430_s10 = scalar_lea.vmem [#allocation8], %s4424_s0  ;;  %v432_v4 = vld [vmem:[%s2937_s1 + $0x8] sm:$0xff] }
  0xa5   : >> { %559 = vrot.lane.b32.xlu1 %v533_v0, %s2663_s18  ;;  %v431_v1 = vld [vmem:[%s2937_s1] sm:$0xff]  ;;  %s2943_s19 = scalar_lea.vmem %s4430_s10, %s2929_s30 [#allocation8]  ;;  %v534_v7 = vld [vmem:[%s532_s27 + $0x8] sm:$0xff]  ;;  %s2975_s12 = smul.u32 49, %s2653_s29 }
  0xa6   : >> { %4431 = sst [smem:[#allocation36_spill]] %s2943_s19  ;;  %v434_v2 = vld [vmem:[%s2943_s19] sm:$0xff]  ;;  %v435_v5 = vld [vmem:[%s2943_s19 + $0x8] sm:$0xff]  ;;  %s4327_s23 = smov 126  }
  0xa7   : >> { %v436_v3 = vadd.f32 %v434_v2, %v431_v1  ;;  %v437_v6 = vadd.f32 %v435_v5, %v432_v4  ;;  %s4314_s15 = sadd.s32 22, %s2975_s12  ;;  %s4313_s27 = sadd.s32 23, %s2975_s12 }
  0xa8   : >> { %s4315_s10 = sadd.s32 24, %s2975_s12  ;;  %s4324_s11 = sadd.s32 2, %s2975_s12 }
  0xa9   : >> { %464 = vrot.lane.b32.xlu0 %v436_v3, %s2663_s18  ;;  %476 = vrot.lane.b32.xlu1 %v436_v3, %s2664_s9  ;;  %s4444_s22 = smov 126   ;;  %s4342_s26 = sadd.s32 6, %s2975_s12 }
  0xaa   : >> { %s4337_s21 = smov 122   ;;  %s4348_s6 = sadd.s32 8, %s2975_s12 }
  0xab   : >> { %s4449_s7 = smov 124   ;;  %s4450_s20 = sadd.s32 26, %s2975_s12 }
  0xac   : >> { %s3265_s24 = sld [smem:[#allocation11 + %s4450_s20]]  ;;  %s4453_s30 = sadd.s32 27, %s2975_s12 }
  0xad   : >> { %470 = vrot.lane.b32.xlu0 %v436_v3, %s2665_s8  ;;  %571 = vrot.lane.b32.xlu1 %v533_v0, %s2664_s9  ;;  %s3280_s20 = sld [smem:[#allocation11 + %s4453_s30]]  ;;  %s4454_s19 = sadd.s32 21, %s2975_s12 }
  0xae   : >> { %s3289_s1 = sld [smem:[#allocation11 + %s4454_s19]] }
  0xb1   : >> { %565 = vrot.lane.b32.xlu0 %v533_v0, %s2665_s8  ;;  %472 = vrot.lane.b32.xlu1 %v437_v6, %s2665_s8 }
  0xb2   : >> { %4451 = sst [smem:[#allocation45_spill]] %s3265_s24 }
  0xb5   : >> { %466 = vrot.lane.b32.xlu0 %v437_v6, %s2663_s18  ;;  %561 = vrot.lane.b32.xlu1 %v534_v7, %s2663_s18  ;;  %s2983_s18 = sld [smem:[#allocation12 + %s4314_s15]] }
  0xb9   : >> { %478 = vrot.lane.b32.xlu0 %v437_v6, %s2664_s9  ;;  %573 = vrot.lane.b32.xlu1 %v534_v7, %s2664_s9  ;;  %s4312_s9 = sadd.s32 21, %s2975_s12 }
  0xba   : >> { %s3000_s13 = sld [smem:[#allocation12 + %s4312_s9]] }
  0xbb   : >> { %s3011_s9 = sld [smem:[#allocation12 + %s4315_s10]]  ;;  %s4320_s10 = sadd.s32 25, %s2975_s12  ;;  %v4375_v2 = vstv %s2983_s18 }
  0xbd   : >> { %567 = vrot.lane.b32.xlu0 %v534_v7, %s2665_s8  ;;  %446 = vrot.lane.b32.xlu1 %v436_v3, %s4318_s14  ;;  %s819_s8 = sadd.s32 7, %s2975_s12 }
  0xbe   : >> { %s3003_s25 = sld [smem:[#allocation12 + %s819_s8]] }
  0xbf   : >> { %s3020_s15 = sld [smem:[#allocation11 + %s819_s8]] }
  0xc0   : >> { %s3038_s8 = sld [smem:[#allocation12 + %s4320_s10]]  ;;  %s4434_s10 = smov 127  }
  0xc1   : >> { %440 = vrot.lane.b32.xlu0 %v436_v3, %s4316_s3  ;;  %486 = vrot.lane.b32.xlu1 %v436_v3, %s2668_s4  ;;  %4432 = sst [smem:[#allocation37_spill]] %s3011_s9 }
  0xc5   : >> { %452 = vrot.lane.b32.xlu0 %v436_v3, %s2669_s16  ;;  %543 = vrot.lane.b32.xlu1 %v533_v0, %s4318_s14 }
  0xc6   : >> { %4433 = sst [smem:[#allocation38_spill]] %s3038_s8 }
  0xc9   : >> { %537 = vrot.lane.b32.xlu0 %v533_v0, %s4316_s3  ;;  %549 = vrot.lane.b32.xlu1 %v533_v0, %s2669_s16 }
  0xcd   : >> { %442 = vrot.lane.b32.xlu0 %v437_v6, %s4316_s3  ;;  %448 = vrot.lane.b32.xlu1 %v437_v6, %s4318_s14 }
  0xd1   : >> { %581 = vrot.lane.b32.xlu0 %v533_v0, %s2668_s4  ;;  %454 = vrot.lane.b32.xlu1 %v437_v6, %s2669_s16 }
  0xd5   : >> { %539 = vrot.lane.b32.xlu0 %v534_v7, %s4316_s3  ;;  %488 = vrot.lane.b32.xlu1 %v437_v6, %s2668_s4 }
  0xd9   : >> { %583 = vrot.lane.b32.xlu0 %v534_v7, %s2668_s4  ;;  %545 = vrot.lane.b32.xlu1 %v534_v7, %s4318_s14  ;;  %s2989_s4 = sld [smem:[#allocation12 + %s4313_s27]] }
  0xda   : >> { %s3016_s27 = sld [smem:[#allocation11 + %s2975_s12]] }
  0xdb   : >> { %s3027_s14 = sld [smem:[#allocation14 + %s2653_s29]]  ;;  %s4452_s29 = smov 123  }
  0xdd   : >> { %551 = vrot.lane.b32.xlu1 %v534_v7, %s2669_s16  ;;  %s2993_s16 = sld [smem:[#allocation12 + %s2975_s12]] }
 0x117   : >> { %v560_v8 = vpop.permute.xlu1 %559 }
 0x11b   : >> { %v465_v9 = vpop.permute.xlu0 %464  ;;  %v477_v10 = vpop.permute.xlu1 %476 }
 0x11f   : >> { %v471_v11 = vpop.permute.xlu0 %470  ;;  %v572_v12 = vpop.permute.xlu1 %571 }
 0x120   : >> { %v482_v17 = vsel %vm458_vm0, %v465_v9, %v471_v11  ;;  %v4374_v9 = vstv %s2989_s4 }
 0x121   : >> { %v484_v20 = vsel %vm461_vm1, %v482_v17, %v477_v10  ;;  %v1215_v10 = vstv %s3000_s13  ;;  %s1055_s13 = sadd.s32 16, %s2975_s12 }
 0x123   : >> { %v566_v13 = vpop.permute.xlu0 %565  ;;  %v473_v14 = vpop.permute.xlu1 %472 }
 0x124   : >> { %v577_v15 = vsel %vm458_vm0, %v560_v8, %v566_v13 }
 0x125   : >> { %v579_v16 = vsel %vm461_vm1, %v577_v15, %v572_v12  ;;  %v633_v15 = vstv %s2993_s16 }
 0x126   : >> { %589 = vrot.lane.b32.xlu0 %v579_v16, %s2670_s28  ;;  %v827_v16 = vstv %s3003_s25  ;;  %s4440_s25 = sadd.s32 22, %s2975_s12 }
 0x127   : >> { %v467_v18 = vpop.permute.xlu0 %466  ;;  %v562_v19 = vpop.permute.xlu1 %561  ;;  %s3187_s16 = sld [smem:[#allocation11 + %s4440_s25]] }
 0x128   : >> { %v483_v21 = vsel %vm458_vm0, %v467_v18, %v473_v14 }
 0x12a   : >> { %494 = vrot.lane.b32.xlu0 %v484_v20, %s2670_s28 }
 0x12b   : >> { %v479_v22 = vpop.permute.xlu0 %478  ;;  %v574_v23 = vpop.permute.xlu1 %573 }
 0x12c   : >> { %v485_v24 = vsel %vm461_vm1, %v483_v21, %v479_v22  ;;  %v4373_v21 = vstv %s3011_s9 }
 0x12d   : >> { %4441 = sst [smem:[#allocation41_spill]] %s3187_s16 }
 0x12e   : >> { %496 = vrot.lane.b32.xlu0 %v485_v24, %s2670_s28 }
 0x12f   : >> { %v568_v25 = vpop.permute.xlu0 %567  ;;  %v447_v26 = vpop.permute.xlu1 %446 }
 0x130   : >> { %v578_v27 = vsel %vm458_vm0, %v562_v19, %v568_v25 }
 0x131   : >> { %v580_v28 = vsel %vm461_vm1, %v578_v27, %v574_v23 }
 0x132   : >> { %591 = vrot.lane.b32.xlu1 %v580_v28, %s2670_s28  ;;  %s1013_s28 = sadd.s32 14, %s2975_s12 }
 0x133   : >> { %v441_v29 = vpop.permute.xlu0 %440  ;;  %v487_v30 = vpop.permute.xlu1 %486  ;;  %s3005_s17 = sld [smem:[#allocation12 + %s1013_s28]] }
 0x134   : >> { %v459_v31 = vsel %vm458_vm0, %v441_v29, %v447_v26  ;;  %s3023_s3 = sld [smem:[#allocation11 + %s1013_s28]]  ;;  %s4321_s28 = sadd.s32 1, %s2975_s12  ;;  %v628_v26 = vstv %s3016_s27 }
 0x135   : >> { %s3059_s2 = sld [smem:[#allocation12 + %s4321_s28]]  ;;  %s4436_s28 = sadd.s32 27, %s2975_s12 }
 0x136   : >> { %s3081_s5 = sld [smem:[#allocation12 + %s4436_s28]]  ;;  %s4437_s27 = sadd.s32 26, %s2975_s12 }
 0x137   : >> { %v453_v32 = vpop.permute.xlu0 %452  ;;  %v544_v33 = vpop.permute.xlu1 %543  ;;  %s3102_s28 = sld [smem:[#allocation12 + %s4437_s27]]  ;;  %s4325_s27 = smov 124  }
 0x138   : >> { %v462_v34 = vsel %vm461_vm1, %v459_v31, %v453_v32 }
 0x139   : >> { %v501_v59 = vsel %vm500_vm3, %v462_v34, %v487_v30  ;;  %v1021_v17 = vstv %s3005_s17  ;;  %v822_v34 = vstv %s3020_s15  ;;  %s4439_s15 = smov 125   ;;  %s4330_s17 = sadd.s32 4, %s2975_s12 }
 0x13a   : >> { %s3200_s25 = sld [smem:[#allocation12 + %s4330_s17]] }
 0x13b   : >> { %v538_v35 = vpop.permute.xlu0 %537  ;;  %v550_v36 = vpop.permute.xlu1 %549 }
 0x13c   : >> { %v555_v37 = vsel %vm458_vm0, %v538_v35, %v544_v33  ;;  %v1016_v35 = vstv %s3023_s3  ;;  %s4323_s3 = sadd.s32 3, %s2975_s12 }
 0x13d   : >> { %v557_v38 = vsel %vm461_vm1, %v555_v37, %v550_v36  ;;  %4438 = sst [smem:[#allocation40_spill]] %s3102_s28 }
 0x13f   : >> { %v449_v39 = vpop.permute.xlu1 %448  ;;  %v443_v40 = vpop.permute.xlu0 %442 }
 0x140   : >> { %v460_v41 = vsel %vm458_vm0, %v443_v40, %v449_v39 }
 0x143   : >> { %v455_v42 = vpop.permute.xlu1 %454  ;;  %v582_v45 = vpop.permute.xlu0 %581 }
 0x144   : >> { %v463_v43 = vsel %vm461_vm1, %v460_v41, %v455_v42  ;;  %v595_v52 = vsel %vm500_vm3, %v557_v38, %v582_v45  ;;  %v621_v38 = vstv %s3027_s14  ;;  %s3134_s14 = sld [smem:[#allocation12 + %s4324_s11]] }
 0x147   : >> { %v489_v44 = vpop.permute.xlu1 %488  ;;  %v540_v47 = vpop.permute.xlu0 %539 }
 0x148   : >> { %v502_v3 = vsel %vm500_vm3, %v463_v43, %v489_v44  ;;  %v4372_v44 = vstv %s3038_s8 }
 0x14b   : >> { %v546_v46 = vpop.permute.xlu1 %545  ;;  %v2977_v51 = vpop.permute.xlu0 %583 }
 0x14c   : >> { %v556_v48 = vsel %vm458_vm0, %v540_v47, %v546_v46 }
 0x14f   : >> { %v552_v49 = vpop.permute.xlu1 %551 }
 0x150   : >> { %v2972_v50 = vsel %vm461_vm1, %v556_v48, %v552_v49 }
 0x151   : >> { %v596_v20 = vsel %vm500_vm3, %v2972_v50, %v2977_v51 }
 0x198   : >> { %v590_v53 = vpop.permute.xlu0 %589 }
 0x199   : >> { %v597_v54 = vsel %vm503_vm2, %v595_v52, %v590_v53 }
 0x19a   : >> { %599 = vst.msk [vmem:[#allocation3 + $0x3] sm:$0xff] %vm506_vm4, %v597_v54  ;;  %v602_v55 = vrot.slane %v597_v54, 3  ;;  %v604_v56 = vrot.slane %v597_v54, 1  ;;  %v606_v57 = vrot.slane %v597_v54, 7 }
 0x19c   : >> { %v608_v58 = vsel %vm516_vm5, %v602_v55, %v604_v56  ;;  %v495_v60 = vpop.permute.xlu0 %494 }
 0x19d   : >> { %v609_v61 = vsel %vm518_vm6, %v608_v58, %v606_v57  ;;  %v504_v62 = vsel %vm503_vm2, %v501_v59, %v495_v60 }
 0x19e   : >> { %610 = vst.msk [vmem:[#allocation3] sm:$0x7] %vm520_vm7, %v609_v61  ;;  %v510_v63 = vrot.slane %v504_v62, 3  ;;  %v512_v0 = vrot.slane %v504_v62, 1  ;;  %v514_v1 = vrot.slane %v504_v62, 7  ;;  %v654_v61 = vstv %s3059_s2  ;;  %s1026_s2 = sadd.s32 15, %s2975_s12 }
 0x19f   : >> { %507 = vst.msk [vmem:[#allocation2 + $0x3] sm:$0xff] %vm506_vm4, %v504_v62  ;;  %v1381_v62 = vstv %s3081_s5  ;;  %s3176_s5 = sld [smem:[#allocation12 + %s4323_s3]]  ;;  %s4442_s3 = sadd.s32 23, %s2975_s12 }
 0x1a0   : >> { %v517_v4 = vsel %vm516_vm5, %v510_v63, %v512_v0  ;;  %v497_v5 = vpop.permute.xlu0 %496  ;;  %s3207_s11 = sld [smem:[#allocation11 + %s4442_s3]]  ;;  %s4445_s3 = sadd.s32 24, %s2975_s12 }
 0x1a1   : >> { %v519_v6 = vsel %vm518_vm6, %v517_v4, %v514_v1  ;;  %v505_v7 = vsel %vm503_vm2, %v502_v3, %v497_v5  ;;  %v3033_v8 = vld [vmem:[#allocation3 + $0x3] sm:$0xff] }
 0x1a2   : >> { %521 = vst.msk [vmem:[#allocation2] sm:$0x7] %vm520_vm7, %v519_v6  ;;  %v523_v11 = vrot.slane %v505_v7, 6  ;;  %v525_v12 = vrot.slane %v505_v7, 4  ;;  %v527_v13 = vrot.slane %v505_v7, 2  ;;  %v1237_v14 = vmul.f32 %v4375_v2, %v3033_v8 }
 0x1a3   : >> { %508 = vst.msk [vmem:[#allocation2 + $0xb] sm:$0xff] %vm506_vm4, %v505_v7  ;;  %v3065_v22 = vmul.f32 %v1215_v10, %v3033_v8  ;;  %v1266_v29 = vmul.f32 %v4374_v9, %v3033_v8  ;;  %v1295_v43 = vmul.f32 %v4373_v21, %v3033_v8  ;;  %v1324_v60 = vmul.f32 %v4372_v44, %v3033_v8 }
 0x1a4   : >> { %v529_v18 = vsel %vm516_vm5, %v523_v11, %v525_v12  ;;  %v592_v19 = vpop.permute.xlu1 %591  ;;  %1241 = vrot.lane.b32.xlu0 %v1237_v14, %s4434_s10  ;;  %v4371_v6 = vstv %s3102_s28  ;;  %s1595_s28 = sadd.s32 35, %s2975_s12 }
 0x1a5   : >> { %4435 = vst [vmem:[#allocation39_spill] sm:$0xff] %v3065_v22  ;;  %v3067_v23 = vld [vmem:[#allocation3] sm:$0xff]  ;;  %v530_v27 = vsel %vm518_vm6, %v529_v18, %v527_v13  ;;  %v598_v28 = vsel %vm503_vm2, %v596_v20, %v592_v19  ;;  %v1353_v12 = vmul.f32 %v4371_v6, %v3033_v8  ;;  %v683_v13 = vstv %s3134_s14  ;;  %s3320_s9 = sld [smem:[#allocation12 + %s1595_s28]]  ;;  %s1084_s14 = sadd.s32 17, %s2975_s12 }
 0x1a6   : >> { %v3069_v24 = vld [vmem:[#allocation3 + $0x1] sm:$0xff]  ;;  %v634_v30 = vmul.f32 %v633_v15, %v3067_v23  ;;  %531 = vst.msk [vmem:[#allocation2 + $0x13] sm:$0x7] %vm520_vm7, %v530_v27  ;;  %v612_v33 = vrot.slane %v598_v28, 6  ;;  %v614_v36 = vrot.slane %v598_v28, 4  ;;  %v616_v37 = vrot.slane %v598_v28, 2 }
 0x1a7   : >> { %v3071_v25 = vld [vmem:[#allocation3 + $0x2] sm:$0xff]  ;;  %v3089_v31 = vmul.f32 %v827_v16, %v3069_v24  ;;  %600 = vst.msk [vmem:[#allocation3 + $0xb] sm:$0xff] %vm506_vm4, %v598_v28  ;;  %4443 = sst [smem:[#allocation42_spill]] %s3207_s11  ;;  %v3221_v18 = vld [vmem:[#allocation2 + $0x3] sm:$0xff]  ;;  %v4370_v19 = vstv %s3187_s16  ;;  %v741_v20 = vstv %s3200_s25  ;;  %v4369_v27 = vstv %s3207_s11  ;;  %s4455_s16 = smov 122  }
 0x1a8   : >> { %v3094_v32 = vmul.f32 %v1021_v17, %v3071_v25  ;;  %1270 = vrot.lane.b32.xlu0 %v1266_v29, %s4327_s23  ;;  %v618_v42 = vsel %vm516_vm5, %v612_v33, %v614_v36  ;;  %s4331_s23 = smov 123   ;;  %v1253_v28 = vmul.f32 %v4369_v27, %v3221_v18  ;;  %v684_v44 = vmul.f32 %v683_v13, %v3067_v23 }
 0x1a9   : >> { %v3107_v39 = vld [vmem:[#allocation2] sm:$0xff]  ;;  %v619_v51 = vsel %vm518_vm6, %v618_v42, %v616_v37 }
 0x1aa   : >> { %v3109_v40 = vld [vmem:[#allocation2 + $0x1] sm:$0xff]  ;;  %v629_v45 = vmul.f32 %v628_v26, %v3107_v39  ;;  %v3127_v49 = vld [vmem:[#allocation2 + $0x9] sm:$0xff]  ;;  %620 = vst.msk [vmem:[#allocation3 + $0x13] sm:$0x7] %vm520_vm7, %v619_v51 }
 0x1ab   : >> { %v3111_v41 = vld [vmem:[#allocation2 + $0x2] sm:$0xff]  ;;  %v3120_v46 = vmul.f32 %v822_v34, %v3109_v40  ;;  %v3129_v50 = vld [vmem:[#allocation2 + $0xa] sm:$0xff]  ;;  %v3138_v53 = vmul.f32 %v822_v34, %v3127_v49 }
 0x1ac   : >> { %v3123_v47 = vmul.f32 %v1016_v35, %v3111_v41  ;;  %v3125_v48 = vld [vmem:[#allocation2 + $0x8] sm:$0xff]  ;;  %v3141_v54 = vmul.f32 %v1016_v35, %v3129_v50  ;;  %v631_v55 = vadd.f32 %v629_v45, %v621_v38  ;;  %1299 = vrot.lane.b32.xlu0 %v1295_v43, %s4439_s15  ;;  %v4366_v45 = vstv %s3265_s24 }
 0x1ad   : >> { %v630_v52 = vmul.f32 %v628_v26, %v3125_v48  ;;  %v3322_v51 = vld [vmem:[#allocation2 + $0xb] sm:$0xff] }
 0x1ae   : >> { %v3146_v57 = vld [vmem:[#allocation3 + $0x8] sm:$0xff]  ;;  %v3157_v63 = vadd.f32 %v634_v30, %v631_v55 }
 0x1af   : >> { %v632_v56 = vadd.f32 %v630_v52, %v621_v38  ;;  %v3148_v58 = vld [vmem:[#allocation3 + $0x9] sm:$0xff]  ;;  %v635_v0 = vmul.f32 %v633_v15, %v3146_v57  ;;  %v656_v5 = vmul.f32 %v654_v61, %v3146_v57  ;;  %v685_v14 = vmul.f32 %v683_v13, %v3146_v57 }
 0x1b0   : >> { %v3150_v59 = vld [vmem:[#allocation3 + $0xa] sm:$0xff]  ;;  %v3165_v1 = vmul.f32 %v827_v16, %v3148_v58  ;;  %1328 = vrot.lane.b32.xlu0 %v1324_v60, %s4325_s27  ;;  %s4336_s27 = sadd.s32 5, %s2975_s12  ;;  %v1382_v15 = vmul.f32 %v1381_v62, %v3033_v8  ;;  %v712_v16 = vstv %s3176_s5  ;;  %v1224_v8 = vmul.f32 %v4370_v19, %v3221_v18  ;;  %s3465_s5 = sld [smem:[#allocation12 + %s1084_s14]] }
 0x1b1   : >> { %v3170_v3 = vmul.f32 %v1021_v17, %v3150_v59  ;;  %v3172_v4 = vld [vmem:[#allocation3 + $0xb] sm:$0xff]  ;;  %v3190_v11 = vadd.f32 %v635_v0, %v632_v56  ;;  %661 = vrot.lane.b32.xlu1 %v656_v5, %s4434_s10  ;;  %s3216_s17 = sld [smem:[#allocation12 + %s4336_s27]]  ;;  %v714_v17 = vmul.f32 %v712_v16, %v3146_v57  ;;  %v743_v26 = vmul.f32 %v741_v20, %v3146_v57 }
 0x1b2   : >> { %v3183_v7 = vmul.f32 %v1381_v62, %v3172_v4  ;;  %s3237_s27 = sld [smem:[#allocation12 + %s4342_s26]]  ;;  %v1340_v52 = vmul.f32 %v4366_v45, %v3221_v18  ;;  %v1210_v60 = vstv %s3289_s1  ;;  %v3344_v62 = vld [vmem:[#allocation2 + $0x4] sm:$0xff]  ;;  %v3346_v0 = vld [vmem:[#allocation3 + $0x4] sm:$0xff]  ;;  %s977_s1 = sadd.s32 13, %s2975_s12 }
 0x1b3   : >> { %s3256_s26 = sld [smem:[#allocation12 + %s4348_s6]]  ;;  %s1401_s6 = sadd.s32 28, %s2975_s12  ;;  %v3349_v5 = vmul.f32 %v1210_v60, %v3322_v51  ;;  %v3407_v45 = vld [vmem:[#allocation3 + $0xd] sm:$0xff] }
 0x1b4   : >> { %1357 = vrot.lane.b32.xlu0 %v1353_v12, %s4331_s23  ;;  %s3226_s23 = sld [smem:[#allocation11 + %s4445_s3]]  ;;  %s4447_s3 = sadd.s32 25, %s2975_s12  ;;  %v3354_v12 = vmul.f32 %v1215_v10, %v3172_v4  ;;  %v3371_v10 = vmul.f32 %v1210_v60, %v3221_v18  ;;  %v1784_v60 = vld [vmem:[#allocation2 + $0x6] sm:$0xff] }
 0x1b5   : >> { %690 = vrot.lane.b32.xlu1 %v685_v14, %s4444_s22  ;;  %s3293_s11 = sld [smem:[#allocation11 + %s1401_s6]]  ;;  %4456 = vst [vmem:[#allocation46_spill] sm:$0xff] %v3349_v5  ;;  %v1788_v19 = vld [vmem:[#allocation3 + $0xe] sm:$0xff] }
 0x1b6   : >> { %s3296_s30 = sld [smem:[#allocation12 + %s1401_s6]]  ;;  %s1789_s6 = sadd.s32 42, %s2975_s12  ;;  %4457 = vst [vmem:[#allocation47_spill] sm:$0xff] %v3354_v12  ;;  %4458 = vst [vmem:[#allocation48_spill] sm:$0xff] %v3371_v10 }
 0x1b7   : >> { %v770_v29 = vstv %s3216_s17 }
 0x1b8   : >> { %1386 = vrot.lane.b32.xlu0 %v1382_v15, %s4337_s21  ;;  %s3245_s21 = sld [smem:[#allocation11 + %s4447_s3]]  ;;  %s4350_s3 = sadd.s32 9, %s2975_s12  ;;  %v772_v30 = vmul.f32 %v770_v29, %v3146_v57  ;;  %v799_v35 = vstv %s3237_s27 }
 0x1b9   : >> { %719 = vrot.lane.b32.xlu1 %v714_v17, %s4439_s15  ;;  %s3271_s0 = sld [smem:[#allocation12 + %s4350_s3]]  ;;  %v801_v36 = vmul.f32 %v799_v35, %v3146_v57  ;;  %s4363_s3 = sadd.s32 10, %s2975_s12  ;;  %v848_v42 = vstv %s3256_s26  ;;  %v4365_v57 = vstv %s3280_s20 }
 0x1ba   : >> { %4446 = sst [smem:[#allocation43_spill]] %s3226_s23  ;;  %v4368_v33 = vstv %s3226_s23  ;;  %s4362_s23 = sadd.s32 11, %s2975_s12  ;;  %v850_v43 = vmul.f32 %v848_v42, %v3148_v58  ;;  %v1369_v17 = vmul.f32 %v4365_v57, %v3221_v18  ;;  %v1603_v57 = vstv %s3320_s9 }
 0x1bb   : >> { %v1282_v34 = vmul.f32 %v4368_v33, %v3221_v18  ;;  %s3305_s19 = sld [smem:[#allocation12 + %s4363_s3]]  ;;  %v1404_v14 = vstv %s3293_s11 }
 0x1bc   : >> { %1228 = vrot.lane.b32.xlu0 %v1224_v8, %s4434_s10  ;;  %s3313_s8 = sld [smem:[#allocation12 + %s4362_s23]]  ;;  %s948_s23 = sadd.s32 12, %s2975_s12  ;;  %v1409_v15 = vstv %s3296_s30 }
 0x1bd   : >> { %748 = vrot.lane.b32.xlu1 %v743_v26, %s4449_s7  ;;  %s3329_s3 = sld [smem:[#allocation11 + %s1789_s6]]  ;;  %v3362_v26 = vld [vmem:[#allocation2 + $0xc] sm:$0xff]  ;;  %s1142_s30 = sadd.s32 19, %s2975_s12 }
 0x1be   : >> { %4448 = sst [smem:[#allocation44_spill]] %s3245_s21  ;;  %v4367_v37 = vstv %s3245_s21 }
 0x1bf   : >> { %v1311_v38 = vmul.f32 %v4367_v37, %v3221_v18  ;;  %s3317_s21 = sld [smem:[#allocation11 + %s1595_s28]]  ;;  %v4378_v55 = vstv %s3271_s0  ;;  %v655_v18 = vmul.f32 %v654_v61, %v3067_v23  ;;  %v3405_v61 = vld [vmem:[#allocation2 + $0xd] sm:$0xff]  ;;  %v1787_v37 = vld [vmem:[#allocation3 + $0x6] sm:$0xff] }
 0x1c0   : >> { %1257 = vrot.lane.b32.xlu0 %v1253_v28, %s4444_s22  ;;  %v879_v56 = vmul.f32 %v4378_v55, %v3148_v58  ;;  %s3335_s28 = sld [smem:[#allocation12 + %s1789_s6]]  ;;  %s1171_s6 = sadd.s32 20, %s2975_s12 }
 0x1c1   : >> { %777 = vrot.lane.b32.xlu1 %v772_v30, %s4452_s29  ;;  %s3342_s24 = sld [smem:[#allocation12 + %s948_s23]]  ;;  %v4377_v8 = vstv %s3305_s19  ;;  %v3368_v30 = vld [vmem:[#allocation3 + $0xc] sm:$0xff] }
 0x1c2   : >> { %v908_v28 = vmul.f32 %v4377_v8, %v3148_v58  ;;  %s3390_s11 = sld [smem:[#allocation12 + %s977_s1]] }
 0x1c3   : >> { %v1792_v33 = vstv %s3329_s3  ;;  %s3453_s9 = sld [smem:[#allocation12 + %s1055_s13]]  ;;  %s1113_s3 = sadd.s32 18, %s2975_s12 }
 0x1c4   : >> { %1286 = vrot.lane.b32.xlu0 %v1282_v34, %s4439_s15  ;;  %v3375_v34 = vmul.f32 %v1404_v14, %v3344_v62  ;;  %v3433_v2 = vmul.f32 %v1792_v33, %v1784_v60  ;;  %s3477_s25 = sld [smem:[#allocation12 + %s1113_s3]]  ;;  %v800_v60 = vmul.f32 %v799_v35, %v3067_v23 }
 0x1c5   : >> { %806 = vrot.lane.b32.xlu1 %v801_v36, %s4455_s16  ;;  %v3378_v36 = vmul.f32 %v1409_v15, %v3346_v0  ;;  %s3489_s17 = sld [smem:[#allocation12 + %s1142_s30]] }
 0x1c6   : >> { %4459 = vst [vmem:[#allocation49_spill] sm:$0xff] %v3375_v34  ;;  %v1797_v27 = vstv %s3335_s28  ;;  %4467 = vst [vmem:[#allocation57_spill] sm:$0xff] %v3433_v2  ;;  %s3501_s27 = sld [smem:[#allocation12 + %s1171_s6]] }
 0x1c7   : >> { %4460 = vst [vmem:[#allocation50_spill] sm:$0xff] %v3378_v36  ;;  %v964_v6 = vstv %s3342_s24  ;;  %v3435_v13 = vmul.f32 %v1797_v27, %v1787_v37  ;;  %v3443_v55 = vmul.f32 %v1797_v27, %v1788_v19  ;;  %v713_v37 = vmul.f32 %v712_v16, %v3067_v23  ;;  %s4472_s26 = sld [smem:[#allocation37_spill]]  ;;  %s4482_s24 = sadd.s32 2, %s2975_s12 }
 0x1c8   : >> { %1315 = vrot.lane.b32.xlu0 %v1311_v38, %s4449_s7  ;;  %v4376_v38 = vstv %s3313_s8  ;;  %v742_v19 = vmul.f32 %v741_v20, %v3067_v23  ;;  %v771_v27 = vmul.f32 %v770_v29, %v3067_v23  ;;  %s4474_s28 = sld [smem:[#allocation38_spill]] }
 0x1c9   : >> { %855 = vrot.lane.b32.xlu1 %v850_v43, %s4434_s10  ;;  %v3383_v43 = vmul.f32 %v1404_v14, %v3362_v26  ;;  %v937_v14 = vmul.f32 %v4376_v38, %v3148_v58  ;;  %4468 = vst [vmem:[#allocation58_spill] sm:$0xff] %v3435_v13  ;;  %v966_v38 = vmul.f32 %v964_v6, %v3148_v58  ;;  %4470 = vst [vmem:[#allocation60_spill] sm:$0xff] %v3443_v55 }
 0x1cb   : >> { %4461 = vst [vmem:[#allocation51_spill] sm:$0xff] %v3383_v43  ;;  %v1158_v35 = vstv %s3489_s17  ;;  %s4487_s17 = sadd.s32 6, %s2975_s12 }
 0x1cc   : >> { %1344 = vrot.lane.b32.xlu0 %v1340_v52, %s4452_s29  ;;  %v3392_v52 = vld [vmem:[#allocation2 + $0x5] sm:$0xff] }
 0x1cd   : >> { %884 = vrot.lane.b32.xlu1 %v879_v56, %s4444_s22  ;;  %v3394_v56 = vld [vmem:[#allocation3 + $0x5] sm:$0xff] }
 0x1ce   : >> { %v3421_v9 = vmul.f32 %v1603_v57, %v3394_v56 }
 0x1d0   : >> { %1373 = vrot.lane.b32.xlu0 %v1369_v17, %s4455_s16  ;;  %v3397_v17 = vmul.f32 %v1409_v15, %v3368_v30  ;;  %v1785_v15 = vld [vmem:[#allocation2 + $0xe] sm:$0xff]  ;;  %4464 = vst [vmem:[#allocation54_spill] sm:$0xff] %v3421_v9 }
 0x1d1   : >> { %913 = vrot.lane.b32.xlu1 %v908_v28, %s4439_s15  ;;  %v1598_v28 = vstv %s3317_s21  ;;  %s3425_s21 = sld [smem:[#allocation12 + %s1026_s2]]  ;;  %v3441_v8 = vmul.f32 %v1792_v33, %v1785_v15  ;;  %v849_v15 = vmul.f32 %v848_v42, %v3069_v24  ;;  %v1187_v42 = vstv %s3501_s27 }
 0x1d2   : >> { %4462 = vst [vmem:[#allocation52_spill] sm:$0xff] %v3397_v17  ;;  %v3418_v21 = vmul.f32 %v1598_v28, %v3392_v52  ;;  %s3591_s27 = sld [smem:[#allocation11 + %s4487_s17]]  ;;  %v4514_v17 = vstv %s3280_s20  ;;  %s1501_s20 = sadd.s32 32, %s2975_s12 }
 0x1d3   : >> { %4469 = vst [vmem:[#allocation59_spill] sm:$0xff] %v3441_v8 }
 0x1d4   : >> { %659 = vrot.lane.b32.xlu0 %v655_v18, %s4434_s10  ;;  %4463 = vst [vmem:[#allocation53_spill] sm:$0xff] %v3418_v21  ;;  %v3428_v18 = vmul.f32 %v1598_v28, %v3405_v61  ;;  %v1129_v28 = vstv %s3477_s25 }
 0x1d5   : >> { %942 = vrot.lane.b32.xlu1 %v937_v14, %s4449_s7  ;;  %v3431_v14 = vmul.f32 %v1603_v57, %v3407_v45  ;;  %v993_v57 = vstv %s3390_s11  ;;  %v1131_v23 = vmul.f32 %v1129_v28, %v3150_v59 }
 0x1d6   : >> { %4465 = vst [vmem:[#allocation55_spill] sm:$0xff] %v3428_v18  ;;  %v995_v33 = vmul.f32 %v993_v57, %v3148_v58  ;;  %v1071_v58 = vstv %s3453_s9 }
 0x1d7   : >> { %4466 = vst [vmem:[#allocation56_spill] sm:$0xff] %v3431_v14  ;;  %v1073_v20 = vmul.f32 %v1071_v58, %v3150_v59 }
 0x1d8   : >> { %688 = vrot.lane.b32.xlu0 %v684_v44, %s4444_s22  ;;  %v1042_v44 = vstv %s3425_s21  ;;  %s4485_s21 = sadd.s32 4, %s2975_s12 }
 0x1d9   : >> { %971 = vrot.lane.b32.xlu1 %v966_v38, %s4452_s29  ;;  %v1044_v16 = vmul.f32 %v1042_v44, %v3150_v59  ;;  %v1100_v38 = vstv %s3465_s5  ;;  %s3573_s9 = sld [smem:[#allocation11 + %s4485_s21]]  ;;  %s4486_s5 = sadd.s32 5, %s2975_s12 }
 0x1da   : >> { %v1102_v29 = vmul.f32 %v1100_v38, %v3150_v59  ;;  %s3582_s25 = sld [smem:[#allocation11 + %s4486_s5]]  ;;  %s1414_s5 = sadd.s32 29, %s2975_s12 }
 0x1db   : >> { %s3661_s21 = sld [smem:[#allocation11 + %s977_s1]] }
 0x1dc   : >> { %717 = vrot.lane.b32.xlu0 %v713_v37, %s4439_s15  ;;  %v4471_v37 = vstv %s3271_s0  ;;  %s4477_s0 = sld [smem:[#allocation40_spill]] }
 0x1dd   : >> { %1000 = vrot.lane.b32.xlu1 %v995_v33, %s4455_s16  ;;  %v878_v33 = vmul.f32 %v4471_v37, %v3069_v24  ;;  %v4478_v37 = vstv %s2989_s4  ;;  %s3553_s4 = sld [smem:[#allocation11 + %s4482_s24]] }
 0x1de   : >> { %s3687_s1 = sld [smem:[#allocation11 + %s1055_s13]] }
 0x1df   : >> { %s3713_s13 = sld [smem:[#allocation11 + %s1113_s3]] }
 0x1e0   : >> { %746 = vrot.lane.b32.xlu0 %v742_v19, %s4449_s7  ;;  %v1160_v19 = vmul.f32 %v1158_v35, %v3150_v59  ;;  %s3739_s3 = sld [smem:[#allocation11 + %s1171_s6]] }
 0x1e1   : >> { %1049 = vrot.lane.b32.xlu1 %v1044_v16, %s4434_s10  ;;  %v4473_v16 = vstv %s3305_s19  ;;  %s4484_s19 = sadd.s32 3, %s2975_s12  ;;  %s4505_s6 = sld [smem:[#allocation42_spill]] }
 0x1e2   : >> { %s3564_s11 = sld [smem:[#allocation11 + %s4484_s19]] }
 0x1e3   : >> { %s3789_s17 = sld [smem:[#allocation11 + %s1414_s5]] }
 0x1e4   : >> { %775 = vrot.lane.b32.xlu0 %v771_v27, %s4452_s29  ;;  %v907_v27 = vmul.f32 %v4473_v16, %v3069_v24  ;;  %v4479_v16 = vstv %s4472_s26  ;;  %s4489_s26 = sadd.s32 8, %s2975_s12 }
 0x1e5   : >> { %1078 = vrot.lane.b32.xlu1 %v1073_v20, %s4444_s22  ;;  %v1189_v20 = vmul.f32 %v1187_v42, %v3150_v59  ;;  %v965_v59 = vmul.f32 %v964_v6, %v3069_v24  ;;  %v1043_v6 = vmul.f32 %v1042_v44, %v3071_v25  ;;  %v1116_v21 = vstv %s3713_s13 }
 0x1e8   : >> { %804 = vrot.lane.b32.xlu0 %v800_v60, %s4455_s16  ;;  %v4475_v60 = vstv %s3313_s8 }
 0x1e9   : >> { %1107 = vrot.lane.b32.xlu1 %v1102_v29, %s4439_s15  ;;  %v936_v29 = vmul.f32 %v4475_v60, %v3069_v24 }
 0x1ec   : >> { %853 = vrot.lane.b32.xlu0 %v849_v15, %s4434_s10  ;;  %v4476_v15 = vstv %s2983_s18  ;;  %s4480_s18 = sadd.s32 1, %s2975_s12 }
 0x1ed   : >> { %1136 = vrot.lane.b32.xlu1 %v1131_v23, %s4449_s7  ;;  %v1238_v23 = vmul.f32 %v4476_v15, %v3172_v4  ;;  %s3543_s8 = sld [smem:[#allocation11 + %s4480_s18]]  ;;  %v1101_v15 = vmul.f32 %v1100_v38, %v3071_v25  ;;  %v699_v38 = vstv %s3564_s11 }
 0x1ee   : >> { %s3648_s11 = sld [smem:[#allocation11 + %s948_s23]] }
 0x1ef   : >> { %s3674_s23 = sld [smem:[#allocation11 + %s1026_s2]] }
 0x1f0   : >> { %882 = vrot.lane.b32.xlu0 %v878_v33, %s4444_s22  ;;  %v1267_v33 = vmul.f32 %v4478_v37, %v3172_v4  ;;  %v1159_v37 = vmul.f32 %v1158_v35, %v3071_v25  ;;  %v757_v35 = vstv %s3582_s25  ;;  %s3700_s2 = sld [smem:[#allocation11 + %s1084_s14]] }
 0x1f1   : >> { %1165 = vrot.lane.b32.xlu1 %v1160_v19, %s4452_s29  ;;  %v994_v19 = vmul.f32 %v993_v57, %v3069_v24  ;;  %v1072_v24 = vmul.f32 %v1071_v58, %v3071_v25  ;;  %v4483_v57 = vstv %s4477_s0  ;;  %v670_v58 = vstv %s3553_s4  ;;  %s4491_s0 = sadd.s32 9, %s2975_s12  ;;  %s4495_s4 = sadd.s32 11, %s2975_s12 }
 0x1f2   : >> { %s3613_s18 = sld [smem:[#allocation11 + %s4491_s0]] }
 0x1f3   : >> { %v641_v44 = vstv %s3543_s8  ;;  %s4493_s8 = sadd.s32 10, %s2975_s12  ;;  %s3637_s19 = sld [smem:[#allocation11 + %s4495_s4]] }
 0x1f4   : >> { %911 = vrot.lane.b32.xlu0 %v907_v27, %s4439_s15  ;;  %v1296_v27 = vmul.f32 %v4479_v16, %v3172_v4  ;;  %v1188_v16 = vmul.f32 %v1187_v42, %v3071_v25  ;;  %s3624_s24 = sld [smem:[#allocation11 + %s4493_s8]]  ;;  %s1472_s8 = sadd.s32 31, %s2975_s12 }
 0x1f5   : >> { %1194 = vrot.lane.b32.xlu1 %v1189_v20, %s4455_s16  ;;  %v4481_v20 = vstv %s4474_s28  ;;  %s3602_s28 = sld [smem:[#allocation11 + %s4489_s26]]  ;;  %v1029_v55 = vstv %s3674_s23 }
 0x1f6   : >> { %v1325_v60 = vmul.f32 %v4481_v20, %v3172_v4  ;;  %v642_v20 = vmul.f32 %v641_v44, %v3107_v39  ;;  %v1031_v8 = vmul.f32 %v1029_v55, %v3129_v50  ;;  %s3726_s14 = sld [smem:[#allocation11 + %s1142_s30]]  ;;  %v1087_v2 = vstv %s3700_s2  ;;  %s1559_s2 = sadd.s32 34, %s2975_s12 }
 0x1f7   : >> { %v1089_v9 = vmul.f32 %v1087_v2, %v3129_v50  ;;  %s4504_s30 = sld [smem:[#allocation41_spill]] }
 0x1f8   : >> { %940 = vrot.lane.b32.xlu0 %v936_v29, %s4449_s7  ;;  %v1354_v29 = vmul.f32 %v4483_v57, %v3172_v4  ;;  %v1130_v4 = vmul.f32 %v1129_v28, %v3071_v25  ;;  %v728_v28 = vstv %s3573_s9  ;;  %v786_v25 = vstv %s3591_s27  ;;  %s4506_s9 = sld [smem:[#allocation43_spill]] }
 0x1f9   : >> { %1243 = vrot.lane.b32.xlu1 %v1238_v23, %s4434_s10  ;;  %v643_v23 = vmul.f32 %v641_v44, %v3125_v48  ;;  %v788_v57 = vmul.f32 %v786_v25, %v3125_v48  ;;  %s4509_s25 = sld [smem:[#allocation44_spill]] }
 0x1fa   : >> { %s4511_s27 = sld [smem:[#allocation45_spill]] }
 0x1fb   : >> { %s3801_s26 = sld [smem:[#allocation12 + %s1414_s5]] }
 0x1fc   : >> { %969 = vrot.lane.b32.xlu0 %v965_v59, %s4452_s29  ;;  %v672_v59 = vmul.f32 %v670_v58, %v3125_v48  ;;  %v1145_v18 = vstv %s3726_s14  ;;  %s3852_s4 = sld [smem:[#allocation12 + %s1472_s8]] }
 0x1fd   : >> { %1272 = vrot.lane.b32.xlu1 %v1267_v33, %s4444_s22  ;;  %v701_v33 = vmul.f32 %v699_v38, %v3125_v48  ;;  %s3909_s13 = sld [smem:[#allocation11 + %s1559_s2]] }
 0x1fe   : >> { %s3920_s14 = sld [smem:[#allocation12 + %s1559_s2]]  ;;  %s1831_s2 = sadd.s32 44, %s2975_s12 }
 0x200   : >> { %998 = vrot.lane.b32.xlu0 %v994_v19, %s4455_s16 }
 0x201   : >> { %1301 = vrot.lane.b32.xlu1 %v1296_v27, %s4439_s15  ;;  %v730_v27 = vmul.f32 %v728_v28, %v3125_v48 }
 0x202   : >> { %v1488_v22 = vstv %s3852_s4 }
 0x203   : >> { %v1490_v5 = vmul.f32 %v1488_v22, %v3368_v30 }
 0x204   : >> { %1047 = vrot.lane.b32.xlu0 %v1043_v6, %s4434_s10 }
 0x205   : >> { %1330 = vrot.lane.b32.xlu1 %v1325_v60, %s4449_s7  ;;  %v759_v60 = vmul.f32 %v757_v35, %v3125_v48  ;;  %v864_v48 = vstv %s3613_s18 }
 0x208   : >> { %1076 = vrot.lane.b32.xlu0 %v1072_v24, %s4444_s22  ;;  %v671_v24 = vmul.f32 %v670_v58, %v3107_v39 }
 0x209   : >> { %1359 = vrot.lane.b32.xlu1 %v1354_v29, %s4452_s29  ;;  %v835_v29 = vstv %s3602_s28  ;;  %s1443_s28 = sadd.s32 30, %s2975_s12 }
 0x20a   : >> { %v837_v58 = vmul.f32 %v835_v29, %v3127_v49  ;;  %s3815_s0 = sld [smem:[#allocation11 + %s1443_s28]] }
 0x20b   : >> { %s3828_s18 = sld [smem:[#allocation12 + %s1443_s28]]  ;;  %s1695_s28 = sadd.s32 39, %s2975_s12 }
 0x20c   : >> { %1105 = vrot.lane.b32.xlu0 %v1101_v15, %s4439_s15  ;;  %v700_v15 = vmul.f32 %v699_v38, %v3107_v39  ;;  %v866_v38 = vmul.f32 %v864_v48, %v3127_v49 }
 0x20d   : >> { %648 = vrot.lane.b32.xlu1 %v643_v23, %s4434_s10 }
 0x210   : >> { %1134 = vrot.lane.b32.xlu0 %v1130_v4, %s4449_s7  ;;  %v729_v4 = vmul.f32 %v728_v28, %v3107_v39  ;;  %v1446_v43 = vstv %s3815_s0  ;;  %s3990_s0 = sld [smem:[#allocation11 + %s1695_s28]] }
 0x211   : >> { %677 = vrot.lane.b32.xlu1 %v672_v59, %s4444_s22  ;;  %v1448_v10 = vmul.f32 %v1446_v43, %v3362_v26 }
 0x214   : >> { %1163 = vrot.lane.b32.xlu0 %v1159_v37, %s4452_s29 }
 0x215   : >> { %706 = vrot.lane.b32.xlu1 %v701_v33, %s4439_s15  ;;  %v893_v33 = vstv %s3624_s24  ;;  %s3842_s24 = sld [smem:[#allocation11 + %s1472_s8]]  ;;  %s1724_s8 = sadd.s32 40, %s2975_s12 }
 0x216   : >> { %v3594_v19 = vpop.permute.xlu0 %1241  ;;  %s4019_s4 = sld [smem:[#allocation12 + %s1724_s8]] }
 0x217   : >> { %4488 = vst [vmem:[#allocation61_spill] sm:$0xff] %v3594_v19 }
 0x218   : >> { %1192 = vrot.lane.b32.xlu0 %v1188_v16, %s4455_s16  ;;  %v758_v16 = vmul.f32 %v757_v35, %v3107_v39 }
 0x219   : >> { %735 = vrot.lane.b32.xlu1 %v730_v27, %s4449_s7 }
 0x21a   : >> { %v3605_v6 = vpop.permute.xlu0 %1270 }
 0x21b   : >> { %4490 = vst [vmem:[#allocation62_spill] sm:$0xff] %v3605_v6  ;;  %v1459_v6 = vstv %s3828_s18  ;;  %s3999_s18 = sld [smem:[#allocation12 + %s1695_s28]] }
 0x21c   : >> { %646 = vrot.lane.b32.xlu0 %v642_v20, %s4434_s10  ;;  %v895_v20 = vmul.f32 %v893_v33, %v3127_v49 }
 0x21d   : >> { %764 = vrot.lane.b32.xlu1 %v759_v60, %s4452_s29  ;;  %v922_v60 = vstv %s3637_s19  ;;  %s3865_s19 = sld [smem:[#allocation11 + %s1501_s20]] }
 0x21e   : >> { %v3616_v42 = vpop.permute.xlu0 %1299 }
 0x21f   : >> { %4492 = vst [vmem:[#allocation63_spill] sm:$0xff] %v3616_v42  ;;  %v1370_v42 = vmul.f32 %v4514_v17, %v3322_v51  ;;  %v1460_v17 = vmul.f32 %v1459_v6, %v3346_v0 }
 0x220   : >> { %675 = vrot.lane.b32.xlu0 %v671_v24, %s4444_s22  ;;  %v787_v24 = vmul.f32 %v786_v25, %v3107_v39 }
 0x221   : >> { %793 = vrot.lane.b32.xlu1 %v788_v57, %s4455_s16 }
 0x222   : >> { %v3627_v44 = vpop.permute.xlu0 %1328 }
 0x223   : >> { %4494 = vst [vmem:[#allocation64_spill] sm:$0xff] %v3627_v44  ;;  %v3630_v23 = vpop.permute.xlu1 %661  ;;  %v1417_v44 = vstv %s3789_s17  ;;  %s1666_s17 = sadd.s32 38, %s2975_s12 }
 0x224   : >> { %704 = vrot.lane.b32.xlu0 %v700_v15, %s4439_s15  ;;  %v924_v15 = vmul.f32 %v922_v60, %v3127_v49 }
 0x225   : >> { %842 = vrot.lane.b32.xlu1 %v837_v58, %s4434_s10  ;;  %v951_v58 = vstv %s3648_s11  ;;  %s3876_s11 = sld [smem:[#allocation12 + %s1501_s20]]  ;;  %s1753_s20 = sadd.s32 41, %s2975_s12 }
 0x226   : >> { %v3641_v59 = vpop.permute.xlu0 %1357  ;;  %v953_v25 = vmul.f32 %v951_v58, %v3127_v49 }
 0x227   : >> { %4496 = vst [vmem:[#allocation65_spill] sm:$0xff] %v3641_v59  ;;  %v3643_v37 = vpop.permute.xlu1 %690 }
 0x228   : >> { %733 = vrot.lane.b32.xlu0 %v729_v4, %s4449_s7  ;;  %v836_v4 = vmul.f32 %v835_v29, %v3109_v40 }
 0x229   : >> { %871 = vrot.lane.b32.xlu1 %v866_v38, %s4444_s22 }
 0x22a   : >> { %v3654_v27 = vpop.permute.xlu0 %1386 }
 0x22b   : >> { %4497 = vst [vmem:[#allocation66_spill] sm:$0xff] %v3654_v27  ;;  %v3656_v28 = vpop.permute.xlu1 %719 }
 0x22c   : >> { %762 = vrot.lane.b32.xlu0 %v758_v16, %s4452_s29  ;;  %v980_v16 = vstv %s3661_s21  ;;  %s1530_s21 = sadd.s32 33, %s2975_s12 }
 0x22d   : >> { %900 = vrot.lane.b32.xlu1 %v895_v20, %s4439_s15  ;;  %v865_v20 = vmul.f32 %v864_v48, %v3109_v40  ;;  %s3888_s23 = sld [smem:[#allocation11 + %s1530_s21]] }
 0x22e   : >> { %v3667_v57 = vpop.permute.xlu0 %1228 }
 0x22f   : >> { %4498 = vst [vmem:[#allocation67_spill] sm:$0xff] %v3667_v57  ;;  %v3669_v35 = vpop.permute.xlu1 %748 }
 0x230   : >> { %791 = vrot.lane.b32.xlu0 %v787_v24, %s4455_s16 }
 0x231   : >> { %929 = vrot.lane.b32.xlu1 %v924_v15, %s4449_s7  ;;  %v982_v15 = vmul.f32 %v980_v16, %v3127_v49  ;;  %v1058_v49 = vstv %s3687_s1  ;;  %s3899_s1 = sld [smem:[#allocation12 + %s1530_s21]]  ;;  %s1802_s21 = sadd.s32 43, %s2975_s12 }
 0x232   : >> { %v3680_v38 = vpop.permute.xlu0 %1257  ;;  %v1060_v13 = vmul.f32 %v1058_v49, %v3129_v50 }
 0x233   : >> { %4499 = vst [vmem:[#allocation68_spill] sm:$0xff] %v3680_v38  ;;  %v3682_v39 = vpop.permute.xlu1 %777  ;;  %v1475_v38 = vstv %s3842_s24  ;;  %s4010_s24 = sld [smem:[#allocation11 + %s1724_s8]] }
 0x234   : >> { %840 = vrot.lane.b32.xlu0 %v836_v4, %s4434_s10  ;;  %v894_v4 = vmul.f32 %v893_v33, %v3109_v40 }
 0x235   : >> { %958 = vrot.lane.b32.xlu1 %v953_v25, %s4452_s29 }
 0x236   : >> { %v3693_v24 = vpop.permute.xlu0 %1286 }
 0x237   : >> { %4500 = vst [vmem:[#allocation69_spill] sm:$0xff] %v3693_v24  ;;  %v3695_v29 = vpop.permute.xlu1 %806 }
 0x238   : >> { %869 = vrot.lane.b32.xlu0 %v865_v20, %s4444_s22  ;;  %v923_v20 = vmul.f32 %v922_v60, %v3109_v40 }
 0x239   : >> { %987 = vrot.lane.b32.xlu1 %v982_v15, %s4455_s16 }
 0x23a   : >> { %v3706_v25 = vpop.permute.xlu0 %1315 }
 0x23b   : >> { %4501 = vst [vmem:[#allocation70_spill] sm:$0xff] %v3706_v25  ;;  %v3708_v48 = vpop.permute.xlu1 %855 }
 0x23c   : >> { %898 = vrot.lane.b32.xlu0 %v894_v4, %s4439_s15 }
 0x23d   : >> { %1036 = vrot.lane.b32.xlu1 %v1031_v8, %s4434_s10  ;;  %v952_v8 = vmul.f32 %v951_v58, %v3109_v40  ;;  %v1118_v58 = vmul.f32 %v1116_v21, %v3129_v50 }
 0x23e   : >> { %v3719_v15 = vpop.permute.xlu0 %1344 }
 0x23f   : >> { %4502 = vst [vmem:[#allocation71_spill] sm:$0xff] %v3719_v15  ;;  %v3721_v33 = vpop.permute.xlu1 %884 }
 0x240   : >> { %927 = vrot.lane.b32.xlu0 %v923_v20, %s4449_s7 }
 0x241   : >> { %1065 = vrot.lane.b32.xlu1 %v1060_v13, %s4444_s22  ;;  %v981_v13 = vmul.f32 %v980_v16, %v3109_v40  ;;  %v1174_v40 = vstv %s3739_s3  ;;  %s1608_s3 = sadd.s32 36, %s2975_s12 }
 0x242   : >> { %v3731_v4 = vpop.permute.xlu0 %1373  ;;  %v1176_v27 = vmul.f32 %v1174_v40, %v3129_v50 }
 0x243   : >> { %4503 = vst [vmem:[#allocation72_spill] sm:$0xff] %v3731_v4  ;;  %v3734_v60 = vpop.permute.xlu1 %913 }
 0x244   : >> { %956 = vrot.lane.b32.xlu0 %v952_v8, %s4452_s29  ;;  %v1030_v8 = vmul.f32 %v1029_v55, %v3111_v41 }
 0x245   : >> { %1094 = vrot.lane.b32.xlu1 %v1089_v9, %s4439_s15  ;;  %v1147_v9 = vmul.f32 %v1145_v18, %v3129_v50 }
 0x246   : >> { %v3744_v20 = vpop.permute.xlu0 %659 }
 0x247   : >> { %v3747_v14 = vpop.permute.xlu1 %942 }
 0x248   : >> { %985 = vrot.lane.b32.xlu0 %v981_v13, %s4455_s16  ;;  %v1059_v13 = vmul.f32 %v1058_v49, %v3111_v41  ;;  %v4508_v49 = vstv %s4505_s6  ;;  %s3941_s6 = sld [smem:[#allocation12 + %s1608_s3]] }
 0x249   : >> { %1123 = vrot.lane.b32.xlu1 %v1118_v58, %s4449_s7 }
 0x24a   : >> { %v3753_v36 = vpop.permute.xlu0 %688 }
 0x24b   : >> { %v3756_v34 = vpop.permute.xlu1 %971 }
 0x24c   : >> { %1034 = vrot.lane.b32.xlu0 %v1030_v8, %s4434_s10  ;;  %v1088_v8 = vmul.f32 %v1087_v2, %v3111_v41 }
 0x24d   : >> { %1152 = vrot.lane.b32.xlu1 %v1147_v9, %s4452_s29  ;;  %v4507_v9 = vstv %s4504_s30  ;;  %s3931_s30 = sld [smem:[#allocation11 + %s1608_s3]]  ;;  %s1860_s3 = sadd.s32 45, %s2975_s12 }
 0x24e   : >> { %v3762_v16 = vpop.permute.xlu0 %717  ;;  %v1225_v4 = vmul.f32 %v4507_v9, %v3322_v51  ;;  %v4510_v9 = vstv %s4506_s9  ;;  %s1637_s9 = sadd.s32 37, %s2975_s12 }
 0x24f   : >> { %v3765_v58 = vpop.permute.xlu1 %1000  ;;  %s3951_s5 = sld [smem:[#allocation11 + %s1637_s9]] }
 0x250   : >> { %1063 = vrot.lane.b32.xlu0 %v1059_v13, %s4444_s22  ;;  %v1254_v13 = vmul.f32 %v4508_v49, %v3322_v51  ;;  %v1175_v49 = vmul.f32 %v1174_v40, %v3111_v41 }
 0x251   : >> { %1181 = vrot.lane.b32.xlu1 %v1176_v27, %s4455_s16  ;;  %v1117_v27 = vmul.f32 %v1116_v21, %v3111_v41  ;;  %v1283_v21 = vmul.f32 %v4510_v9, %v3322_v51 }
 0x252   : >> { %v3770_v55 = vpop.permute.xlu0 %746 }
 0x253   : >> { %v3776_v59 = vpop.permute.xlu1 %1049 }
 0x254   : >> { %1092 = vrot.lane.b32.xlu0 %v1088_v8, %s4439_s15 }
 0x255   : >> { %1230 = vrot.lane.b32.xlu1 %v1225_v4, %s4434_s10  ;;  %v1146_v4 = vmul.f32 %v1145_v18, %v3111_v41  ;;  %v4512_v18 = vstv %s4509_s25  ;;  %v4513_v41 = vstv %s4511_s27  ;;  %s3960_s25 = sld [smem:[#allocation12 + %s1637_s9]]  ;;  %s1889_s9 = sadd.s32 46, %s2975_s12 }
 0x256   : >> { %v3781_v50 = vpop.permute.xlu0 %775  ;;  %v1341_v40 = vmul.f32 %v4513_v41, %v3322_v51  ;;  %s3970_s27 = sld [smem:[#allocation11 + %s1666_s17]] }
 0x257   : >> { %v3787_v2 = vpop.permute.xlu1 %1078 }
 0x258   : >> { %1121 = vrot.lane.b32.xlu0 %v1117_v27, %s4449_s7 }
 0x259   : >> { %1259 = vrot.lane.b32.xlu1 %v1254_v13, %s4444_s22  ;;  %v1312_v13 = vmul.f32 %v4512_v18, %v3322_v51  ;;  %v1430_v18 = vstv %s3801_s26  ;;  %s3980_s26 = sld [smem:[#allocation12 + %s1666_s17]]  ;;  %s1918_s17 = sadd.s32 47, %s2975_s12 }
 0x25a   : >> { %v3793_v8 = vpop.permute.xlu0 %804  ;;  %v1432_v57 = vmul.f32 %v1430_v18, %v3368_v30 }
 0x25b   : >> { %v3799_v15 = vpop.permute.xlu1 %1107 }
 0x25c   : >> { %1150 = vrot.lane.b32.xlu0 %v1146_v4, %s4452_s29 }
 0x25d   : >> { %1288 = vrot.lane.b32.xlu1 %v1283_v21, %s4439_s15  ;;  %v1418_v21 = vmul.f32 %v1417_v44, %v3344_v62 }
 0x25e   : >> { %v3806_v27 = vpop.permute.xlu0 %853 }
 0x25f   : >> { %v3812_v9 = vpop.permute.xlu1 %1136 }
 0x260   : >> { %1179 = vrot.lane.b32.xlu0 %v1175_v49, %s4455_s16 }
 0x261   : >> { %1317 = vrot.lane.b32.xlu1 %v1312_v13, %s4449_s7  ;;  %v1431_v13 = vmul.f32 %v1430_v18, %v3346_v0 }
 0x262   : >> { %v3819_v4 = vpop.permute.xlu0 %882 }
 0x263   : >> { %v3825_v25 = vpop.permute.xlu1 %1165 }
 0x264   : >> { %1422 = vrot.lane.b32.xlu0 %v1418_v21, %s4434_s10 }
 0x265   : >> { %1346 = vrot.lane.b32.xlu1 %v1341_v40, %s4452_s29  ;;  %v1447_v40 = vmul.f32 %v1446_v43, %v3344_v62 }
 0x266   : >> { %v3833_v49 = vpop.permute.xlu0 %911 }
 0x267   : >> { %v3839_v41 = vpop.permute.xlu1 %1194 }
 0x268   : >> { %4515 = vst [vmem:[#allocation73_spill] sm:$0xff] %v3839_v41  ;;  %1435 = vrot.lane.b32.xlu0 %v1431_v13, %s4434_s10  ;;  %v1419_v13 = vmul.f32 %v1417_v44, %v3362_v26 }
 0x269   : >> { %1375 = vrot.lane.b32.xlu1 %v1370_v42, %s4455_s16 }
 0x26a   : >> { %v3846_v21 = vpop.permute.xlu0 %940 }
 0x26b   : >> { %v3849_v24 = vpop.permute.xlu1 %1243 }
 0x26c   : >> { %4516 = vst [vmem:[#allocation74_spill] sm:$0xff] %v3849_v24  ;;  %1451 = vrot.lane.b32.xlu0 %v1447_v40, %s4444_s22  ;;  %v1517_v24 = vstv %s3876_s11  ;;  %s4038_s11 = sld [smem:[#allocation12 + %s1753_s20]] }
 0x26d   : >> { %1388 = vrot.lane.b32.xlu1 %v3183_v7, %s4455_s16  ;;  %v1476_v7 = vmul.f32 %v1475_v38, %v3344_v62 }
 0x26e   : >> { %v3858_v51 = vpop.permute.xlu0 %969 }
 0x26f   : >> { %v3861_v42 = vpop.permute.xlu1 %1272 }
 0x270   : >> { %4517 = vst [vmem:[#allocation75_spill] sm:$0xff] %v3861_v42  ;;  %1464 = vrot.lane.b32.xlu0 %v1460_v17, %s4444_s22  ;;  %v1489_v17 = vmul.f32 %v1488_v22, %v3346_v0  ;;  %v1461_v42 = vmul.f32 %v1459_v6, %v3368_v30 }
 0x271   : >> { %1424 = vrot.lane.b32.xlu1 %v1419_v13, %s4434_s10 }
 0x272   : >> { %v3869_v40 = vpop.permute.xlu0 %998 }
 0x273   : >> { %v3872_v19 = vpop.permute.xlu1 %1301 }
 0x274   : >> { %4518 = vst [vmem:[#allocation76_spill] sm:$0xff] %v3872_v19  ;;  %1480 = vrot.lane.b32.xlu0 %v1476_v7, %s4439_s15  ;;  %v1504_v19 = vstv %s3865_s19  ;;  %s4029_s19 = sld [smem:[#allocation11 + %s1753_s20]] }
 0x275   : >> { %1437 = vrot.lane.b32.xlu1 %v1432_v57, %s4434_s10  ;;  %v1505_v57 = vmul.f32 %v1504_v19, %v3344_v62  ;;  %v1506_v22 = vmul.f32 %v1504_v19, %v3362_v26 }
 0x276   : >> { %v3881_v44 = vpop.permute.xlu0 %1047 }
 0x277   : >> { %v3884_v13 = vpop.permute.xlu1 %1330 }
 0x278   : >> { %4519 = vst [vmem:[#allocation77_spill] sm:$0xff] %v3884_v13  ;;  %1493 = vrot.lane.b32.xlu0 %v1489_v17, %s4439_s15  ;;  %v1477_v13 = vmul.f32 %v1475_v38, %v3362_v26  ;;  %v1546_v38 = vstv %s3899_s1  ;;  %s4058_s1 = sld [smem:[#allocation12 + %s1802_s21]] }
 0x279   : >> { %1453 = vrot.lane.b32.xlu1 %v1448_v10, %s4444_s22  ;;  %v1518_v10 = vmul.f32 %v1517_v24, %v3346_v0 }
 0x27a   : >> { %v3892_v18 = vpop.permute.xlu0 %1076 }
 0x27b   : >> { %v3895_v7 = vpop.permute.xlu1 %1359 }
 0x27c   : >> { %4520 = vst [vmem:[#allocation78_spill] sm:$0xff] %v3895_v7  ;;  %1509 = vrot.lane.b32.xlu0 %v1505_v57, %s4449_s7  ;;  %v1533_v7 = vstv %s3888_s23  ;;  %s4049_s23 = sld [smem:[#allocation11 + %s1802_s21]] }
 0x27d   : >> { %1466 = vrot.lane.b32.xlu1 %v1461_v42, %s4444_s22  ;;  %v1534_v12 = vmul.f32 %v1533_v7, %v3344_v62 }
 0x27e   : >> { %v3904_v43 = vpop.permute.xlu0 %1105 }
 0x27f   : >> { %4521 = vst [vmem:[#allocation79_spill] sm:$0xff] %v3904_v43  ;;  %v649_v17 = vpop.permute.xlu1 %648 }
 0x280   : >> { %v653_v6 = vadd.f32 %v649_v17, %v3190_v11  ;;  %1522 = vrot.lane.b32.xlu0 %v1518_v10, %s4449_s7  ;;  %v1562_v17 = vstv %s3909_s13  ;;  %s4067_s13 = sld [smem:[#allocation11 + %s1831_s2]] }
 0x281   : >> { %1482 = vrot.lane.b32.xlu1 %v1477_v13, %s4439_s15  ;;  %v1547_v13 = vmul.f32 %v1546_v38, %v3346_v0 }
 0x282   : >> { %v666_v57 = vadd.f32 %v3630_v23, %v653_v6  ;;  %v3915_v42 = vpop.permute.xlu0 %1134  ;;  %v1519_v6 = vmul.f32 %v1517_v24, %v3368_v30  ;;  %v1535_v24 = vmul.f32 %v1533_v7, %v3362_v26  ;;  %v1548_v7 = vmul.f32 %v1546_v38, %v3368_v30 }
 0x283   : >> { %v678_v43 = vpop.permute.xlu1 %677  ;;  %v1564_v38 = vmul.f32 %v1562_v17, %v3362_v26 }
 0x284   : >> { %v682_v41 = vadd.f32 %v678_v43, %v666_v57  ;;  %1538 = vrot.lane.b32.xlu0 %v1534_v12, %s4452_s29  ;;  %v1575_v57 = vstv %s3920_s14  ;;  %s4078_s14 = sld [smem:[#allocation12 + %s1831_s2]] }
 0x285   : >> { %1495 = vrot.lane.b32.xlu1 %v1490_v5, %s4439_s15 }
 0x286   : >> { %v695_v11 = vadd.f32 %v3643_v37, %v682_v41  ;;  %v3926_v23 = vpop.permute.xlu0 %1163  ;;  %v1563_v37 = vmul.f32 %v1562_v17, %v3344_v62  ;;  %v1577_v17 = vmul.f32 %v1575_v57, %v3368_v30 }
 0x287   : >> { %v707_v10 = vpop.permute.xlu1 %706 }
 0x288   : >> { %v711_v43 = vadd.f32 %v707_v10, %v695_v11  ;;  %1551 = vrot.lane.b32.xlu0 %v1547_v13, %s4452_s29  ;;  %v1576_v13 = vmul.f32 %v1575_v57, %v3346_v0  ;;  %v1669_v57 = vstv %s3970_s27  ;;  %s4133_s27 = sld [smem:[#allocation11 + %s1918_s17]] }
 0x289   : >> { %1511 = vrot.lane.b32.xlu1 %v1506_v22, %s4449_s7  ;;  %v1611_v22 = vstv %s3931_s30  ;;  %s4089_s30 = sld [smem:[#allocation11 + %s1860_s3]] }
 0x28a   : >> { %v724_v5 = vadd.f32 %v3656_v28, %v711_v43  ;;  %v3936_v12 = vpop.permute.xlu0 %1192  ;;  %v1613_v30 = vmul.f32 %v1611_v22, %v3405_v61 }
 0x28b   : >> { %v736_v41 = vpop.permute.xlu1 %735 }
 0x28c   : >> { %v740_v19 = vadd.f32 %v736_v41, %v724_v5  ;;  %1567 = vrot.lane.b32.xlu0 %v1563_v37, %s4455_s16  ;;  %v1612_v37 = vmul.f32 %v1611_v22, %v3392_v52 }
 0x28d   : >> { %1524 = vrot.lane.b32.xlu1 %v1519_v6, %s4449_s7  ;;  %v1624_v6 = vstv %s3941_s6  ;;  %s4097_s6 = sld [smem:[#allocation12 + %s1860_s3]] }
 0x28e   : >> { %v753_v11 = vadd.f32 %v3669_v35, %v740_v19  ;;  %v647_v28 = vpop.permute.xlu0 %646  ;;  %v1626_v22 = vmul.f32 %v1624_v6, %v3407_v45 }
 0x28f   : >> { %v765_v10 = vpop.permute.xlu1 %764  ;;  %v652_v62 = vadd.f32 %v647_v28, %v3157_v63  ;;  %v1625_v28 = vmul.f32 %v1624_v6, %v3394_v56 }
 0x290   : >> { %v769_v43 = vadd.f32 %v765_v10, %v753_v11  ;;  %1580 = vrot.lane.b32.xlu0 %v1576_v13, %s4455_s16 }
 0x291   : >> { %v665_v5 = vadd.f32 %v3744_v20, %v652_v62  ;;  %1540 = vrot.lane.b32.xlu1 %v1535_v24, %s4452_s29  ;;  %v1640_v62 = vstv %s3951_s5  ;;  %s4109_s5 = sld [smem:[#allocation11 + %s1889_s9]] }
 0x292   : >> { %v782_v35 = vadd.f32 %v3682_v39, %v769_v43  ;;  %v676_v0 = vpop.permute.xlu0 %675 }
 0x293   : >> { %v794_v41 = vpop.permute.xlu1 %793  ;;  %v681_v63 = vadd.f32 %v676_v0, %v665_v5  ;;  %v1641_v5 = vmul.f32 %v1640_v62, %v3392_v52  ;;  %v1653_v0 = vstv %s3960_s25  ;;  %s4121_s25 = sld [smem:[#allocation12 + %s1889_s9]] }
 0x294   : >> { %v798_v19 = vadd.f32 %v794_v41, %v782_v35  ;;  %1616 = vrot.lane.b32.xlu0 %v1612_v37, %s4434_s10  ;;  %v1654_v41 = vmul.f32 %v1653_v0, %v3394_v56 }
 0x295   : >> { %v694_v20 = vadd.f32 %v3753_v36, %v681_v63  ;;  %1553 = vrot.lane.b32.xlu1 %v1548_v7, %s4452_s29 }
 0x296   : >> { %v811_v39 = vadd.f32 %v3695_v29, %v798_v19  ;;  %v705_v11 = vpop.permute.xlu0 %704 }
 0x297   : >> { %v843_v13 = vpop.permute.xlu1 %842  ;;  %v710_v10 = vadd.f32 %v705_v11, %v694_v20 }
 0x298   : >> { %v826_v24 = vadd.f32 %v3138_v53, %v811_v39  ;;  %1629 = vrot.lane.b32.xlu0 %v1625_v28, %s4434_s10  ;;  %v1670_v39 = vmul.f32 %v1669_v57, %v3392_v52 }
 0x299   : >> { %v723_v36 = vadd.f32 %v3762_v16, %v710_v10  ;;  %1569 = vrot.lane.b32.xlu1 %v1564_v38, %s4455_s16 }
 0x29a   : >> { %v831_v29 = vadd.f32 %v3165_v1, %v826_v24  ;;  %v734_v43 = vpop.permute.xlu0 %733 }
 0x29b   : >> { %v872_v35 = vpop.permute.xlu1 %871  ;;  %v739_v26 = vadd.f32 %v734_v43, %v723_v36  ;;  %v1698_v43 = vstv %s3990_s0 }
 0x29c   : >> { %v847_v53 = vadd.f32 %v843_v13, %v831_v29  ;;  %1645 = vrot.lane.b32.xlu0 %v1641_v5, %s4444_s22  ;;  %v1682_v13 = vstv %s3980_s26  ;;  %v1642_v29 = vmul.f32 %v1640_v62, %v3405_v61  ;;  %v1655_v62 = vmul.f32 %v1653_v0, %v3407_v45  ;;  %s1947_s26 = sadd.s32 48, %s2975_s12  ;;  %s4559_s12 = sld [smem:[#allocation34_spill]] }
 0x29d   : >> { %v752_v16 = vadd.f32 %v3770_v55, %v739_v26  ;;  %1582 = vrot.lane.b32.xlu1 %v1577_v17, %s4455_s16  ;;  %v1683_v24 = vmul.f32 %v1682_v13, %v3394_v56  ;;  %v1699_v26 = vmul.f32 %v1698_v43, %v3392_v52  ;;  %v1671_v0 = vmul.f32 %v1669_v57, %v3405_v61  ;;  %s4157_s28 = sld [smem:[#allocation11 + %s1947_s26]] }
 0x29e   : >> { %v860_v1 = vadd.f32 %v3708_v48, %v847_v53  ;;  %v763_v37 = vpop.permute.xlu0 %762  ;;  %v1711_v53 = vstv %s3999_s18  ;;  %v1684_v57 = vmul.f32 %v1682_v13, %v3407_v45  ;;  %s4562_s18 = sld [smem:[#allocation33_spill]] }
 0x29f   : >> { %v901_v63 = vpop.permute.xlu1 %900  ;;  %v768_v7 = vadd.f32 %v763_v37, %v752_v16  ;;  %v1712_v37 = vmul.f32 %v1711_v53, %v3394_v56 }
 0x2a0   : >> { %v876_v19 = vadd.f32 %v872_v35, %v860_v1  ;;  %1658 = vrot.lane.b32.xlu0 %v1654_v41, %s4444_s22 }
 0x2a1   : >> { %v781_v55 = vadd.f32 %v3781_v50, %v768_v7  ;;  %1618 = vrot.lane.b32.xlu1 %v1613_v30, %s4434_s10  ;;  %v1727_v7 = vstv %s4010_s24 }
 0x2a2   : >> { %v889_v48 = vadd.f32 %v3721_v33, %v876_v19  ;;  %v792_v20 = vpop.permute.xlu0 %791 }
 0x2a3   : >> { %v930_v11 = vpop.permute.xlu1 %929  ;;  %v797_v28 = vadd.f32 %v792_v20, %v781_v55  ;;  %v1728_v55 = vmul.f32 %v1727_v7, %v3392_v52 }
 0x2a4   : >> { %v905_v10 = vadd.f32 %v901_v63, %v889_v48  ;;  %1674 = vrot.lane.b32.xlu0 %v1670_v39, %s4439_s15  ;;  %v1740_v39 = vstv %s4019_s4 }
 0x2a5   : >> { %v810_v50 = vadd.f32 %v3793_v8, %v797_v28  ;;  %1631 = vrot.lane.b32.xlu1 %v1626_v22, %s4434_s10  ;;  %v1741_v22 = vmul.f32 %v1740_v39, %v3394_v56 }
 0x2a6   : >> { %v918_v33 = vadd.f32 %v3734_v60, %v905_v10  ;;  %v841_v38 = vpop.permute.xlu0 %840 }
 0x2a7   : >> { %v825_v36 = vadd.f32 %v3120_v46, %v810_v50  ;;  %v959_v6 = vpop.permute.xlu1 %958  ;;  %v1700_v50 = vmul.f32 %v1698_v43, %v3405_v61 }
 0x2a8   : >> { %v934_v5 = vadd.f32 %v930_v11, %v918_v33  ;;  %1687 = vrot.lane.b32.xlu0 %v1683_v24, %s4439_s15  ;;  %v1756_v33 = vstv %s4029_s19 }
 0x2a9   : >> { %v830_v8 = vadd.f32 %v3089_v31, %v825_v36  ;;  %1647 = vrot.lane.b32.xlu1 %v1642_v29, %s4444_s22  ;;  %v1757_v56 = vmul.f32 %v1756_v33, %v3392_v52  ;;  %v1769_v29 = vstv %s4038_s11  ;;  %v2413_v52 = vld [vmem:[#allocation3 + $0x5] sm:$0xff] }
 0x2aa   : >> { %v947_v60 = vadd.f32 %v3747_v14, %v934_v5  ;;  %v870_v35 = vpop.permute.xlu0 %869 }
 0x2ab   : >> { %v846_v46 = vadd.f32 %v841_v38, %v830_v8  ;;  %v988_v17 = vpop.permute.xlu1 %987  ;;  %v1770_v8 = vmul.f32 %v2413_v52, %v1769_v29 }
 0x2ac   : >> { %v963_v16 = vadd.f32 %v959_v6, %v947_v60  ;;  %1703 = vrot.lane.b32.xlu0 %v1699_v26, %s4449_s7  ;;  %v1713_v6 = vmul.f32 %v1711_v53, %v3407_v45  ;;  %v1729_v45 = vmul.f32 %v1727_v7, %v3405_v61  ;;  %v1805_v26 = vstv %s4049_s23 }
 0x2ad   : >> { %v859_v31 = vadd.f32 %v3806_v27, %v846_v46  ;;  %1660 = vrot.lane.b32.xlu1 %v1655_v62, %s4444_s22  ;;  %v4073_v62 = vld [vmem:[#allocation2 + $0x6] sm:$0xff] }
 0x2ae   : >> { %v976_v14 = vadd.f32 %v3756_v34, %v963_v16  ;;  %v899_v1 = vpop.permute.xlu0 %898  ;;  %v1806_v53 = vmul.f32 %v4073_v62, %v1805_v26 }
 0x2af   : >> { %v875_v41 = vadd.f32 %v870_v35, %v859_v31  ;;  %v1037_v63 = vpop.permute.xlu1 %1036  ;;  %v2415_v31 = vld [vmem:[#allocation3 + $0xd] sm:$0xff] }
 0x2b0   : >> { %v992_v30 = vadd.f32 %v988_v17, %v976_v14  ;;  %1716 = vrot.lane.b32.xlu0 %v1712_v37, %s4449_s7  ;;  %v1742_v14 = vmul.f32 %v2415_v31, %v1740_v39  ;;  %v1771_v39 = vmul.f32 %v2415_v31, %v1769_v29 }
 0x2b1   : >> { %v888_v27 = vadd.f32 %v3819_v4, %v875_v41  ;;  %1676 = vrot.lane.b32.xlu1 %v1671_v0, %s4439_s15 }
 0x2b2   : >> { %v1005_v34 = vadd.f32 %v3765_v58, %v992_v30  ;;  %v928_v19 = vpop.permute.xlu0 %927  ;;  %v2417_v30 = vld [vmem:[#allocation2 + $0xd] sm:$0xff] }
 0x2b3   : >> { %v904_v48 = vadd.f32 %v899_v1, %v888_v27  ;;  %v1066_v20 = vpop.permute.xlu1 %1065  ;;  %v1818_v1 = vstv %s4058_s1  ;;  %v1758_v27 = vmul.f32 %v2417_v30, %v1756_v33 }
 0x2b4   : >> { %v1020_v11 = vadd.f32 %v3141_v54, %v1005_v34  ;;  %1732 = vrot.lane.b32.xlu0 %v1728_v55, %s4452_s29  ;;  %v1834_v34 = vstv %s4067_s13 }
 0x2b5   : >> { %v917_v4 = vadd.f32 %v3833_v49, %v904_v48  ;;  %1689 = vrot.lane.b32.xlu1 %v1684_v57, %s4439_s15  ;;  %v1835_v48 = vmul.f32 %v4073_v62, %v1834_v34 }
 0x2b6   : >> { %v1025_v58 = vadd.f32 %v3170_v3, %v1020_v11  ;;  %v957_v28 = vpop.permute.xlu0 %956  ;;  %v1847_v11 = vstv %s4078_s14 }
 0x2b7   : >> { %v933_v10 = vadd.f32 %v928_v19, %v917_v4  ;;  %v1095_v13 = vpop.permute.xlu1 %1094 }
 0x2b8   : >> { %v1041_v54 = vadd.f32 %v1037_v63, %v1025_v58  ;;  %1745 = vrot.lane.b32.xlu0 %v1741_v22, %s4452_s29  ;;  %v4085_v63 = vld [vmem:[#allocation3 + $0x6] sm:$0xff]  ;;  %v4522_v58 = vld [vmem:[#allocation73_spill] sm:$0xff] }
 0x2b9   : >> { %v946_v49 = vadd.f32 %v3846_v21, %v933_v10  ;;  %1705 = vrot.lane.b32.xlu1 %v1700_v50, %s4449_s7  ;;  %v1848_v22 = vmul.f32 %v4085_v63, %v1847_v11  ;;  %v4105_v50 = vld [vmem:[#allocation2 + $0xe] sm:$0xff] }
 0x2ba   : >> { %v1054_v3 = vadd.f32 %v3776_v59, %v1041_v54  ;;  %v986_v38 = vpop.permute.xlu0 %985  ;;  %v1807_v33 = vmul.f32 %v4105_v50, %v1805_v26  ;;  %v1863_v54 = vstv %s4089_s30 }
 0x2bb   : >> { %v962_v24 = vadd.f32 %v957_v28, %v946_v49  ;;  %v1124_v36 = vpop.permute.xlu1 %1123  ;;  %v4523_v49 = vld [vmem:[#allocation46_spill] sm:$0xff] }
 0x2bc   : >> { %v1070_v43 = vadd.f32 %v1066_v20, %v1054_v3  ;;  %1761 = vrot.lane.b32.xlu0 %v1757_v56, %s4455_s16  ;;  %v4524_v3 = vld [vmem:[#allocation79_spill] sm:$0xff] }
 0x2bd   : >> { %v975_v21 = vadd.f32 %v3858_v51, %v962_v24  ;;  %1718 = vrot.lane.b32.xlu1 %v1713_v6, %s4449_s7  ;;  %v4525_v56 = vld [vmem:[#allocation47_spill] sm:$0xff]  ;;  %v1864_v6 = vmul.f32 %v4073_v62, %v1863_v54 }
 0x2be   : >> { %v1083_v59 = vadd.f32 %v3787_v2, %v1070_v43  ;;  %v1035_v5 = vpop.permute.xlu0 %1034 }
 0x2bf   : >> { %v991_v60 = vadd.f32 %v986_v38, %v975_v21  ;;  %v1153_v35 = vpop.permute.xlu1 %1152  ;;  %v4117_v21 = vld [vmem:[#allocation3 + $0xe] sm:$0xff] }
 0x2c0   : >> { %v1099_v46 = vadd.f32 %v1095_v13, %v1083_v59  ;;  %1774 = vrot.lane.b32.xlu0 %v1770_v8, %s4455_s16  ;;  %v1820_v59 = vmul.f32 %v4117_v21, %v1818_v1 }
 0x2c1   : >> { %v1004_v51 = vadd.f32 %v3869_v40, %v991_v60  ;;  %1734 = vrot.lane.b32.xlu1 %v1729_v45, %s4452_s29  ;;  %v4526_v60 = vld [vmem:[#allocation74_spill] sm:$0xff] }
 0x2c2   : >> { %v1112_v2 = vadd.f32 %v3799_v15, %v1099_v46  ;;  %v1064_v17 = vpop.permute.xlu0 %1063 }
 0x2c3   : >> { %v1019_v61 = vadd.f32 %v3123_v47, %v1004_v51  ;;  %v1182_v16 = vpop.permute.xlu1 %1181  ;;  %v1819_v47 = vmul.f32 %v4085_v63, %v1818_v1 }
 0x2c4   : >> { %v1128_v37 = vadd.f32 %v1124_v36, %v1112_v2  ;;  %1810 = vrot.lane.b32.xlu0 %v1806_v53, %s4434_s10  ;;  %v1836_v2 = vmul.f32 %v4105_v50, %v1834_v34 }
 0x2c5   : >> { %v1024_v15 = vadd.f32 %v3094_v32, %v1019_v61  ;;  %1747 = vrot.lane.b32.xlu1 %v1742_v14, %s4452_s29  ;;  %v4527_v61 = vld [vmem:[#allocation75_spill] sm:$0xff] }
 0x2c6   : >> { %v1141_v40 = vadd.f32 %v3812_v9, %v1128_v37  ;;  %v1093_v41 = vpop.permute.xlu0 %1092 }
 0x2c7   : >> { %v1040_v0 = vadd.f32 %v1035_v5, %v1024_v15  ;;  %v1231_v7 = vpop.permute.xlu1 %1230  ;;  %v1876_v5 = vstv %s4097_s6  ;;  %v1849_v15 = vmul.f32 %v4117_v21, %v1847_v11 }
 0x2c8   : >> { %v1157_v19 = vadd.f32 %v1153_v35, %v1141_v40  ;;  %1823 = vrot.lane.b32.xlu0 %v1819_v47, %s4434_s10  ;;  %v1877_v26 = vmul.f32 %v4085_v63, %v1876_v5  ;;  %v1905_v40 = vstv %s4121_s25  ;;  %v4528_v47 = vld [vmem:[#allocation76_spill] sm:$0xff] }
 0x2c9   : >> { %v1053_v32 = vadd.f32 %v3881_v44, %v1040_v0  ;;  %1763 = vrot.lane.b32.xlu1 %v1758_v27, %s4455_s16  ;;  %v1906_v30 = vmul.f32 %v4085_v63, %v1905_v40  ;;  %v4529_v27 = vld [vmem:[#allocation48_spill] sm:$0xff] }
 0x2ca   : >> { %v1170_v9 = vadd.f32 %v3825_v25, %v1157_v19  ;;  %v1122_v55 = vpop.permute.xlu0 %1121 }
 0x2cb   : >> { %v1069_v20 = vadd.f32 %v1064_v17, %v1053_v32  ;;  %v1260_v57 = vpop.permute.xlu1 %1259  ;;  %v1892_v17 = vstv %s4109_s5  ;;  %v1865_v32 = vmul.f32 %v4105_v50, %v1863_v54 }
 0x2cc   : >> { %v1186_v4 = vadd.f32 %v1182_v16, %v1170_v9  ;;  %1839 = vrot.lane.b32.xlu0 %v1835_v48, %s4444_s22  ;;  %v1893_v14 = vmul.f32 %v4073_v62, %v1892_v17  ;;  %v1921_v9 = vstv %s4133_s27 }
 0x2cd   : >> { %v1082_v44 = vadd.f32 %v3892_v18, %v1069_v20  ;;  %1776 = vrot.lane.b32.xlu1 %v1771_v39, %s4455_s16  ;;  %v4531_v20 = vld [vmem:[#allocation77_spill] sm:$0xff]  ;;  %v1922_v11 = vmul.f32 %v4073_v62, %v1921_v9 }
 0x2ce   : >> { %v1199_v25 = vadd.f32 %v4522_v58, %v1186_v4  ;;  %v1151_v28 = vpop.permute.xlu0 %1150  ;;  %v4532_v4 = vld [vmem:[#allocation67_spill] sm:$0xff] }
 0x2cf   : >> { %v1098_v10 = vadd.f32 %v1093_v41, %v1082_v44  ;;  %v1289_v13 = vpop.permute.xlu1 %1288 }
 0x2d0   : >> { %v1214_v18 = vadd.f32 %v4523_v49, %v1199_v25  ;;  %1852 = vrot.lane.b32.xlu0 %v1848_v22, %s4444_s22  ;;  %v1878_v25 = vmul.f32 %v4117_v21, %v1876_v5 }
 0x2d1   : >> { %v1111_v38 = vadd.f32 %v4524_v3, %v1098_v10  ;;  %1812 = vrot.lane.b32.xlu1 %v1807_v33, %s4434_s10  ;;  %v4533_v10 = vld [vmem:[#allocation61_spill] sm:$0xff]  ;;  %v4534_v33 = vld [vmem:[#allocation78_spill] sm:$0xff]  ;;  %v4535_v3 = vld [vmem:[#allocation68_spill] sm:$0xff] }
 0x2d2   : >> { %v1219_v24 = vadd.f32 %v4525_v56, %v1214_v18  ;;  %v1180_v36 = vpop.permute.xlu0 %1179 }
 0x2d3   : >> { %v1127_v29 = vadd.f32 %v1122_v55, %v1111_v38  ;;  %v1318_v43 = vpop.permute.xlu1 %1317 }
 0x2d4   : >> { %v1235_v52 = vadd.f32 %v1231_v7, %v1219_v24  ;;  %1868 = vrot.lane.b32.xlu0 %v1864_v6, %s4439_s15  ;;  %v1894_v24 = vmul.f32 %v4105_v50, %v1892_v17  ;;  %v4539_v17 = vld [vmem:[#allocation63_spill] sm:$0xff] }
 0x2d5   : >> { %v1140_v8 = vadd.f32 %v3915_v42, %v1127_v29  ;;  %1825 = vrot.lane.b32.xlu1 %v1820_v59, %s4434_s10  ;;  %s4144_s10 = sld [smem:[#allocation12 + %s1918_s17]]  ;;  %v4536_v29 = vld [vmem:[#allocation62_spill] sm:$0xff] }
 0x2d6   : >> { %v1248_v35 = vadd.f32 %v4526_v60, %v1235_v52  ;;  %v4128_v45 = vpop.permute.xlu0 %1422 }
 0x2d7   : >> { %v1156_v46 = vadd.f32 %v1151_v28, %v1140_v8  ;;  %v1347_v51 = vpop.permute.xlu1 %1346  ;;  %v4537_v8 = vld [vmem:[#allocation69_spill] sm:$0xff] }
 0x2d8   : >> { %v1264_v53 = vadd.f32 %v1260_v57, %v1248_v35  ;;  %1881 = vrot.lane.b32.xlu0 %v1877_v26, %s4439_s15  ;;  %v1907_v26 = vmul.f32 %v4117_v21, %v1905_v40 }
 0x2d9   : >> { %v1169_v42 = vadd.f32 %v3926_v23, %v1156_v46  ;;  %1841 = vrot.lane.b32.xlu1 %v1836_v2, %s4444_s22 }
 0x2da   : >> { %v1277_v16 = vadd.f32 %v4527_v61, %v1264_v53  ;;  %v4139_v31 = vpop.permute.xlu0 %1435 }
 0x2db   : >> { %v1185_v1 = vadd.f32 %v1180_v36, %v1169_v42  ;;  %v1376_v37 = vpop.permute.xlu1 %1375  ;;  %v1934_v28 = vstv %s4144_s10  ;;  %v1950_v36 = vstv %s4157_s28  ;;  %v4540_v42 = vld [vmem:[#allocation52_spill] sm:$0xff] }
 0x2dc   : >> { %v1293_v41 = vadd.f32 %v1289_v13, %v1277_v16  ;;  %1897 = vrot.lane.b32.xlu0 %v1893_v14, %s4449_s7  ;;  %v1935_v18 = vmul.f32 %v4085_v63, %v1934_v28  ;;  %v1951_v52 = vmul.f32 %v4073_v62, %v1950_v36  ;;  %v4541_v62 = vld [vmem:[#allocation70_spill] sm:$0xff] }
 0x2dd   : >> { %v1198_v23 = vadd.f32 %v3936_v12, %v1185_v1  ;;  %1854 = vrot.lane.b32.xlu1 %v1849_v15, %s4444_s22  ;;  %v4530_v12 = vld [vmem:[#allocation39_spill] sm:$0xff]  ;;  %s4169_s22 = sld [smem:[#allocation12 + %s1947_s26]]  ;;  %v1923_v15 = vmul.f32 %v4105_v50, %v1921_v9 }
 0x2de   : >> { %v1306_v0 = vadd.f32 %v4528_v47, %v1293_v41  ;;  %v4151_v7 = vpop.permute.xlu0 %1451  ;;  %v4542_v41 = vld [vmem:[#allocation64_spill] sm:$0xff] }
 0x2df   : >> { %v1213_v34 = vadd.f32 %v4529_v27, %v1198_v23  ;;  %v1389_v19 = vpop.permute.xlu1 %1388 }
 0x2e0   : >> { %v1322_v55 = vadd.f32 %v1318_v43, %v1306_v0  ;;  %1910 = vrot.lane.b32.xlu0 %v1906_v30, %s4449_s7  ;;  %v4543_v30 = vld [vmem:[#allocation71_spill] sm:$0xff] }
 0x2e1   : >> { %v1218_v48 = vadd.f32 %v4530_v12, %v1213_v34  ;;  %1870 = vrot.lane.b32.xlu1 %v1865_v32, %s4439_s15  ;;  %v4545_v12 = vld [vmem:[#allocation72_spill] sm:$0xff] }
 0x2e2   : >> { %v1335_v57 = vadd.f32 %v4531_v20, %v1322_v55  ;;  %v4163_v39 = vpop.permute.xlu0 %1464 }
 0x2e3   : >> { %v1234_v44 = vadd.f32 %v4532_v4, %v1218_v48  ;;  %v1425_v58 = vpop.permute.xlu1 %1424  ;;  %v1963_v46 = vstv %s4169_s22 }
 0x2e4   : >> { %v1351_v22 = vadd.f32 %v1347_v51, %v1335_v57  ;;  %1926 = vrot.lane.b32.xlu0 %v1922_v11, %s4452_s29  ;;  %v4538_v51 = vld [vmem:[#allocation51_spill] sm:$0xff]  ;;  %v1964_v14 = vmul.f32 %v4085_v63, %v1963_v46  ;;  %v4544_v63 = vld [vmem:[#allocation65_spill] sm:$0xff]  ;;  %v1952_v57 = vmul.f32 %v4105_v50, %v1950_v36  ;;  %v4546_v11 = vld [vmem:[#allocation66_spill] sm:$0xff] }
 0x2e5   : >> { %v1247_v13 = vadd.f32 %v4533_v10, %v1234_v44  ;;  %1883 = vrot.lane.b32.xlu1 %v1878_v25, %s4439_s15  ;;  %v4547_v25 = vld [vmem:[#allocation49_spill] sm:$0xff]  ;;  %v1965_v10 = vmul.f32 %v4117_v21, %v1963_v46  ;;  %s4560_s15 = sld [smem:[#allocation32_spill]] }
 0x2e6   : >> { %v1364_v54 = vadd.f32 %v4534_v33, %v1351_v22  ;;  %v4175_v49 = vpop.permute.xlu0 %1480 }
 0x2e7   : >> { %v1263_v38 = vadd.f32 %v4535_v3, %v1247_v13  ;;  %v1438_v56 = vpop.permute.xlu1 %1437  ;;  %v4548_v13 = vld [vmem:[#allocation50_spill] sm:$0xff] }
 0x2e8   : >> { %v1380_v6 = vadd.f32 %v1376_v37, %v1364_v54  ;;  %1939 = vrot.lane.b32.xlu0 %v1935_v18, %s4452_s29 }
 0x2e9   : >> { %v1276_v43 = vadd.f32 %v4536_v29, %v1263_v38  ;;  %1899 = vrot.lane.b32.xlu1 %v1894_v24, %s4449_s7 }
 0x2ea   : >> { %v1393_v59 = vadd.f32 %v1389_v19, %v1380_v6  ;;  %v1494_v5 = vpop.permute.xlu0 %1493  ;;  %v1936_v19 = vmul.f32 %v4117_v21, %v1934_v28 }
 0x2eb   : >> { %v1292_v60 = vadd.f32 %v4537_v8, %v1276_v43  ;;  %v1454_v35 = vpop.permute.xlu1 %1453 }
 0x2ec   : >> { %v1408_v2 = vadd.f32 %v4538_v51, %v1393_v59  ;;  %1955 = vrot.lane.b32.xlu0 %v1951_v52, %s4455_s16 }
 0x2ed   : >> { %v1305_v53 = vadd.f32 %v4539_v17, %v1292_v60  ;;  %1912 = vrot.lane.b32.xlu1 %v1907_v26, %s4449_s7  ;;  %s4557_s7 = sld [smem:[#allocation35_spill]] }
 0x2ee   : >> { %v1413_v61 = vadd.f32 %v4540_v42, %v1408_v2  ;;  %v1510_v16 = vpop.permute.xlu0 %1509 }
 0x2ef   : >> { %v1321_v1 = vadd.f32 %v4541_v62, %v1305_v53  ;;  %v1467_v37 = vpop.permute.xlu1 %1466 }
 0x2f0   : >> { %v1429_v40 = vadd.f32 %v1425_v58, %v1413_v61  ;;  %1968 = vrot.lane.b32.xlu0 %v1964_v14, %s4455_s16 }
 0x2f1   : >> { %v1334_v23 = vadd.f32 %v4542_v41, %v1321_v1  ;;  %1928 = vrot.lane.b32.xlu1 %v1923_v15, %s4452_s29  ;;  %v4551_v41 = vld [vmem:[#allocation53_spill] sm:$0xff] }
 0x2f2   : >> { %v1442_v47 = vadd.f32 %v1438_v56, %v1429_v40  ;;  %v1523_v0 = vpop.permute.xlu0 %1522 }
 0x2f3   : >> { %v1350_v27 = vadd.f32 %v4543_v30, %v1334_v23  ;;  %v1483_v34 = vpop.permute.xlu1 %1482 }
 0x2f4   : >> { %v1458_v55 = vadd.f32 %v1454_v35, %v1442_v47  ;;  %v4552_v47 = vld [vmem:[#allocation54_spill] sm:$0xff] }
 0x2f5   : >> { %v1363_v32 = vadd.f32 %v4544_v63, %v1350_v27  ;;  %1941 = vrot.lane.b32.xlu1 %v1936_v19, %s4452_s29  ;;  %s4558_s29 = sld [smem:[#allocation36_spill]] }
 0x2f6   : >> { %v1539_v9 = vpop.permute.xlu0 %1538  ;;  %v1471_v44 = vadd.f32 %v1467_v37, %v1458_v55  ;;  %v4550_v37 = vld [vmem:[#allocation56_spill] sm:$0xff] }
 0x2f7   : >> { %v1379_v48 = vadd.f32 %v4545_v12, %v1363_v32  ;;  %v1496_v20 = vpop.permute.xlu1 %1495 }
 0x2f8   : >> { %v1487_v54 = vadd.f32 %v1483_v34, %v1471_v44 }
 0x2f9   : >> { %v1392_v4 = vadd.f32 %v4546_v11, %v1379_v48  ;;  %1957 = vrot.lane.b32.xlu1 %v1952_v57, %s4455_s16 }
 0x2fa   : >> { %v1552_v58 = vpop.permute.xlu0 %1551  ;;  %v1500_v56 = vadd.f32 %v1496_v20, %v1487_v54 }
 0x2fb   : >> { %v1407_v22 = vadd.f32 %v4547_v25, %v1392_v4  ;;  %v1512_v28 = vpop.permute.xlu1 %1511 }
 0x2fc   : >> { %v1516_v43 = vadd.f32 %v1512_v28, %v1500_v56 }
 0x2fd   : >> { %v1412_v33 = vadd.f32 %v4548_v13, %v1407_v22  ;;  %1970 = vrot.lane.b32.xlu1 %v1965_v10, %s4455_s16  ;;  %s4561_s16 = scalar_lea.vmem [#allocation15], %s4560_s15 }
 0x2fe   : >> { %v1568_v18 = vpop.permute.xlu0 %1567  ;;  %s2015_s0 = scalar_lea.vmem %s4561_s16, %s4559_s12 [#allocation15] }
 0x2ff   : >> { %v1428_v3 = vadd.f32 %v4128_v45, %v1412_v33  ;;  %v1525_v50 = vpop.permute.xlu1 %1524 }
 0x300   : >> { %v1529_v8 = vadd.f32 %v1525_v50, %v1516_v43  ;;  %v4553_v43 = vld [vmem:[#allocation57_spill] sm:$0xff] }
 0x301   : >> { %v1441_v38 = vadd.f32 %v4139_v31, %v1428_v3 }
 0x302   : >> { %v1581_v24 = vpop.permute.xlu0 %1580 }
 0x303   : >> { %v1457_v36 = vadd.f32 %v4151_v7, %v1441_v38  ;;  %v1541_v6 = vpop.permute.xlu1 %1540 }
 0x304   : >> { %v1545_v35 = vadd.f32 %v1541_v6, %v1529_v8 }
 0x305   : >> { %v1470_v29 = vadd.f32 %v4163_v39, %v1457_v36  ;;  %v4549_v39 = vld [vmem:[#allocation55_spill] sm:$0xff] }
 0x306   : >> { %v1617_v21 = vpop.permute.xlu0 %1616 }
 0x307   : >> { %v1486_v59 = vadd.f32 %v4175_v49, %v1470_v29  ;;  %v1554_v52 = vpop.permute.xlu1 %1553 }
 0x308   : >> { %v1558_v51 = vadd.f32 %v1554_v52, %v1545_v35 }
 0x309   : >> { %v1499_v60 = vadd.f32 %v1494_v5, %v1486_v59 }
 0x30a   : >> { %v1630_v26 = vpop.permute.xlu0 %1629 }
 0x30b   : >> { %v1515_v45 = vadd.f32 %v1510_v16, %v1499_v60  ;;  %v1570_v46 = vpop.permute.xlu1 %1569  ;;  %v4554_v60 = vld [vmem:[#allocation58_spill] sm:$0xff] }
 0x30c   : >> { %v1574_v2 = vadd.f32 %v1570_v46, %v1558_v51 }
 0x30d   : >> { %v1528_v31 = vadd.f32 %v1523_v0, %v1515_v45 }
 0x30e   : >> { %v1646_v17 = vpop.permute.xlu0 %1645 }
 0x30f   : >> { %v1544_v53 = vadd.f32 %v1539_v9, %v1528_v31  ;;  %v1583_v7 = vpop.permute.xlu1 %1582 }
 0x310   : >> { %v1587_v42 = vadd.f32 %v1583_v7, %v1574_v2 }
 0x311   : >> { %v1557_v61 = vadd.f32 %v1552_v58, %v1544_v53 }
 0x312   : >> { %v1602_v14 = vadd.f32 %v4549_v39, %v1587_v42  ;;  %v1659_v62 = vpop.permute.xlu0 %1658  ;;  %v4555_v42 = vld [vmem:[#allocation59_spill] sm:$0xff] }
 0x313   : >> { %v1573_v1 = vadd.f32 %v1568_v18, %v1557_v61  ;;  %v1619_v49 = vpop.permute.xlu1 %1618 }
 0x314   : >> { %v1607_v15 = vadd.f32 %v4550_v37, %v1602_v14 }
 0x315   : >> { %v1586_v5 = vadd.f32 %v1581_v24, %v1573_v1 }
 0x316   : >> { %v1675_v40 = vpop.permute.xlu0 %1674  ;;  %v1623_v58 = vadd.f32 %v1619_v49, %v1607_v15 }
 0x317   : >> { %v1601_v16 = vadd.f32 %v4551_v41, %v1586_v5  ;;  %v1632_v23 = vpop.permute.xlu1 %1631 }
 0x318   : >> { %v1636_v13 = vadd.f32 %v1632_v23, %v1623_v58 }
 0x319   : >> { %v1606_v0 = vadd.f32 %v4552_v47, %v1601_v16 }
 0x31a   : >> { %v1688_v30 = vpop.permute.xlu0 %1687 }
 0x31b   : >> { %v1622_v27 = vadd.f32 %v1617_v21, %v1606_v0  ;;  %v1648_v34 = vpop.permute.xlu1 %1647 }
 0x31c   : >> { %v1652_v54 = vadd.f32 %v1648_v34, %v1636_v13 }
 0x31d   : >> { %v1635_v19 = vadd.f32 %v1630_v26, %v1622_v27 }
 0x31e   : >> { %v1704_v63 = vpop.permute.xlu0 %1703 }
 0x31f   : >> { %v1651_v32 = vadd.f32 %v1646_v17, %v1635_v19  ;;  %v1661_v55 = vpop.permute.xlu1 %1660 }
 0x320   : >> { %v1665_v50 = vadd.f32 %v1661_v55, %v1652_v54 }
 0x321   : >> { %v1664_v9 = vadd.f32 %v1659_v62, %v1651_v32  ;;  %v4556_v62 = vld [vmem:[#allocation60_spill] sm:$0xff] }
 0x322   : >> { %v1717_v12 = vpop.permute.xlu0 %1716 }
 0x323   : >> { %v1680_v48 = vadd.f32 %v1675_v40, %v1664_v9  ;;  %v1677_v20 = vpop.permute.xlu1 %1676 }
 0x324   : >> { %v1681_v56 = vadd.f32 %v1677_v20, %v1665_v50 }
 0x325   : >> { %v1693_v57 = vadd.f32 %v1688_v30, %v1680_v48 }
 0x326   : >> { %v1733_v11 = vpop.permute.xlu0 %1732 }
 0x327   : >> { %v1709_v4 = vadd.f32 %v1704_v63, %v1693_v57  ;;  %v1690_v44 = vpop.permute.xlu1 %1689 }
 0x328   : >> { %v1694_v29 = vadd.f32 %v1690_v44, %v1681_v56 }
 0x329   : >> { %v1722_v25 = vadd.f32 %v1717_v12, %v1709_v4 }
 0x32a   : >> { %v1746_v22 = vpop.permute.xlu0 %1745 }
 0x32b   : >> { %v1738_v28 = vadd.f32 %v1733_v11, %v1722_v25  ;;  %v1706_v10 = vpop.permute.xlu1 %1705 }
 0x32c   : >> { %v1710_v59 = vadd.f32 %v1706_v10, %v1694_v29 }
 0x32d   : >> { %v1751_v33 = vadd.f32 %v1746_v22, %v1738_v28 }
 0x32e   : >> { %v1762_v18 = vpop.permute.xlu0 %1761 }
 0x32f   : >> { %v1719_v3 = vpop.permute.xlu1 %1718  ;;  %v1767_v38 = vadd.f32 %v1762_v18, %v1751_v33 }
 0x330   : >> { %v1723_v26 = vadd.f32 %v1719_v3, %v1710_v59 }
 0x332   : >> { %v1775_v24 = vpop.permute.xlu0 %1774 }
 0x333   : >> { %v1735_v36 = vpop.permute.xlu1 %1734  ;;  %v1780_v6 = vadd.f32 %v1775_v24, %v1767_v38 }
 0x334   : >> { %v1739_v45 = vadd.f32 %v1735_v36, %v1723_v26 }
 0x335   : >> { %v1795_v21 = vadd.f32 %v4553_v43, %v1780_v6 }
 0x336   : >> { %v1811_v52 = vpop.permute.xlu0 %1810 }
 0x337   : >> { %v1748_v8 = vpop.permute.xlu1 %1747  ;;  %v1800_v35 = vadd.f32 %v4554_v60, %v1795_v21 }
 0x338   : >> { %v1752_v31 = vadd.f32 %v1748_v8, %v1739_v45 }
 0x339   : >> { %v1816_v5 = vadd.f32 %v1811_v52, %v1800_v35 }
 0x33a   : >> { %v1824_v46 = vpop.permute.xlu0 %1823 }
 0x33b   : >> { %v1764_v51 = vpop.permute.xlu1 %1763  ;;  %v1829_v16 = vadd.f32 %v1824_v46, %v1816_v5 }
 0x33c   : >> { %v1768_v2 = vadd.f32 %v1764_v51, %v1752_v31 }
 0x33e   : >> { %v1840_v17 = vpop.permute.xlu0 %1839 }
 0x33f   : >> { %v1777_v53 = vpop.permute.xlu1 %1776  ;;  %v1845_v47 = vadd.f32 %v1840_v17, %v1829_v16 }
 0x340   : >> { %v1781_v7 = vadd.f32 %v1777_v53, %v1768_v2 }
 0x342   : >> { %v1796_v61 = vadd.f32 %v4555_v42, %v1781_v7  ;;  %v1853_v39 = vpop.permute.xlu0 %1852 }
 0x343   : >> { %v1813_v14 = vpop.permute.xlu1 %1812  ;;  %v1858_v30 = vadd.f32 %v1853_v39, %v1845_v47 }
 0x344   : >> { %v1801_v1 = vadd.f32 %v4556_v62, %v1796_v61  ;;  %v2420_v61 = vld [vmem:[%s4557_s7] sm:$0xff] }
 0x346   : >> { %v1869_v49 = vpop.permute.xlu0 %1868  ;;  %v1817_v55 = vadd.f32 %v1813_v14, %v1801_v1  ;;  %v2421_v14 = vld [vmem:[%s4558_s29] sm:$0xff] }
 0x347   : >> { %v1826_v37 = vpop.permute.xlu1 %1825  ;;  %v1874_v34 = vadd.f32 %v1869_v49, %v1858_v30 }
 0x348   : >> { %v1830_v57 = vadd.f32 %v1826_v37, %v1817_v55 }
 0x34a   : >> { %v1882_v15 = vpop.permute.xlu0 %1881 }
 0x34b   : >> { %v1842_v40 = vpop.permute.xlu1 %1841  ;;  %v1887_v63 = vadd.f32 %v1882_v15, %v1874_v34  ;;  %v2422_v15 = vld [vmem:[%s4557_s7 + $0x8] sm:$0xff] }
 0x34c   : >> { %v1846_v4 = vadd.f32 %v1842_v40, %v1830_v57  ;;  %v2423_v40 = vld [vmem:[%s4558_s29 + $0x8] sm:$0xff]  ;;  %s424_s29 = sadd.s32 1, %s4562_s18  }
 0x34d   : >> { %p421_p7 = scmp.ge.s32.totalorder %s424_s29, 4  }
 0x34e   : >> { %v1898_v41 = vpop.permute.xlu0 %1897  ;;  %s4563_s8 = sld [smem:[#allocation24_spill]] (%p421_p7)  ;;  %s2675_s6 = smov (%p421_p7), [#allocation15]  }
 0x34f   : >> { %v1855_v23 = vpop.permute.xlu1 %1854  ;;  %v1903_v9 = vadd.f32 %v1898_v41, %v1887_v63  ;;  %s4564_s24 = sld [smem:[#allocation32_spill]] (%p421_p7)  ;;  %s2557_s9 = sshll.u32 (%p421_p7), %s2675_s6, 4  ;;  %s2558_s9 = int_to_ptr.vmem [resolvable:$false] %s2557_s9 }
 0x350   : >> { %v1859_v22 = vadd.f32 %v1855_v23, %v1846_v4  ;;  %s4565_s4 = sld [smem:[#allocation31_spill]] (%p421_p7)  ;;  %s2559_s5 = scalar_lea.vmem (%p421_p7), %s2558_s9, 2048 }
 0x351   : > { %s4566_s20 = sld [smem:[#allocation27_spill]] (%p421_p7) }
 0x352   : >> { %v1911_v0 = vpop.permute.xlu0 %1910  ;;  %s4567_s23 = sld [smem:[#allocation86_spill]] (%p421_p7) }
 0x353   : >> { %v1871_v27 = vpop.permute.xlu1 %1870  ;;  %v1916_v48 = vadd.f32 %v1911_v0, %v1903_v9 }
 0x354   : >> { %v1875_v10 = vadd.f32 %v1871_v27, %v1859_v22  ;;  %s2269_s19 = sshll.u32 (%p421_p7), %s4563_s8, 10 }
 0x355   : > { %s4569_s13 = scalar_lea.vmem (%p421_p7), [#allocation15], %s4564_s24 }
 0x356   : >> { %v1927_v19 = vpop.permute.xlu0 %1926  ;;  %s2036_s14 = sshll.u32 (%p421_p7), %s4569_s13, 4  ;;  %s2020_s3 = scalar_lea.sflag (%p421_p7), [#allocation6], %s4565_s4  ;;  %s4242_s14 = int_to_ptr.vmem [resolvable:$true] %s2036_s14 }
 0x357   : >> { %v1884_v32 = vpop.permute.xlu1 %1883  ;;  %v1932_v11 = vadd.f32 %v1927_v19, %v1916_v48  ;;  %s2553_s30 = scalar_lea.vmem (%p421_p7), %s4242_s14, 1024  ;;  %p4570_p0 = scmp.ne.s32.totalorder (%p421_p7), %s4566_s20, 0 }
 0x358   : >> { %v1888_v18 = vadd.f32 %v1884_v32, %v1875_v10  ;;  %s4568_s1 = smov (%p421_p7), %s4567_s23  ;;  %s4238_s2 = scalar_lea.hbm (%p421_p7), %s4567_s23, %s2269_s19 }
 0x359   : > { %p2554_p11 = scmp.ne.s32.totalorder (%p421_p7), %s4242_s14, %s2553_s30  ;;  %p2560_p6 = scmp.lt.s32.totalorder (%p421_p7), %s4242_s14, %s2558_s9 }
 0x35a   : >> { %v1940_v12 = vpop.permute.xlu0 %1939  ;;  %p2561_p9 = scmp.lt.s32.totalorder (%p421_p7), %s2559_s5, %s2553_s30 }
 0x35b   : >> { %v1900_v20 = vpop.permute.xlu1 %1899  ;;  %v1945_v58 = vadd.f32 %v1940_v12, %v1932_v11  ;;  %p2555_p8 = pnand (%p421_p7), %p2554_p11, %p4570_p0 }
 0x35c   : >> { %v1904_v50 = vadd.f32 %v1900_v20, %v1888_v18  ;;  %p2562_p3 = por (%p421_p7), %p2561_p9, %p2560_p6 }
 0x35d   : > { %p2556_p10 = pneg (%p421_p7), %p2555_p8 }
 0x35e   : >> { %v1956_v44 = vpop.permute.xlu0 %1955 }
 0x35f   : >> { %v1913_v25 = vpop.permute.xlu1 %1912  ;;  %v1961_v28 = vadd.f32 %v1956_v44, %v1945_v58  ;;  %p2563_p4 = pnand (%p421_p7), %p2562_p3, %p2556_p10 }
 0x360   : >> { %v1917_v56 = vadd.f32 %v1913_v25, %v1904_v50 }
 0x362   : >> { %v1969_v13 = vpop.permute.xlu0 %1968 }
 0x363   : >> { %v1929_v33 = vpop.permute.xlu1 %1928  ;;  %v1974_v54 = vadd.f32 %v1969_v13, %v1961_v28 }
 0x364   : >> { %v1933_v24 = vadd.f32 %v1929_v33, %v1917_v56 }
 0x365   : >> { %v2257_v3 = vmul.f32 -1.442695, %v1974_v54 }
 0x367   : >> { %2397 = vpow2.f32 %v2257_v3  ;;  %v1942_v38 = vpop.permute.xlu1 %1941 }
 0x368   : >> { %v1946_v6 = vadd.f32 %v1942_v38, %v1933_v24 }
 0x36b   : >> { %v1958_v36 = vpop.permute.xlu1 %1957 }
 0x36c   : >> { %v1962_v29 = vadd.f32 %v1958_v36, %v1946_v6 }
 0x36f   : >> { %v1971_v43 = vpop.permute.xlu1 %1970 }
 0x370   : >> { %v1975_v21 = vadd.f32 %v1971_v43, %v1962_v29 }
 0x372   : >> { %v2258_v59 = vmul.f32 -1.442695, %v1975_v21 }
 0x374   : >> { %v2398_v52 = vpop.eup %2397  ;;  %2399 = vpow2.f32 %v2258_v59 }
 0x375   : >> { %v1982_v8 = vadd.f32 1.0, %v2398_v52 }
 0x377   : >> { %2401 = vrcp.f32 %v1982_v8 }
 0x381   : >> { %v2400_v60 = vpop.eup %2399 }
 0x382   : >> { %v1983_v35 = vadd.f32 1.0, %v2400_v60 }
 0x384   : >> { %v2402_v26 = vpop.eup %2401  ;;  %2403 = vrcp.f32 %v1983_v35 }
 0x385   : >> { %v2259_v45 = vmul.f32 -1.442695, %v2402_v26 }
 0x387   : >> { %2405 = vpow2.f32 %v2259_v45 }
 0x391   : >> { %v2404_v46 = vpop.eup %2403 }
 0x392   : >> { %v2260_v51 = vmul.f32 -1.442695, %v2404_v46 }
 0x394   : >> { %v2406_v31 = vpop.eup %2405  ;;  %2407 = vpow2.f32 %v2260_v51 }
 0x395   : >> { %v1994_v2 = vadd.f32 1.0, %v2406_v31 }
 0x397   : >> { %2409 = vrcp.f32 %v1994_v2 }
 0x3a1   : >> { %v2408_v17 = vpop.eup %2407 }
 0x3a2   : >> { %v1995_v53 = vadd.f32 1.0, %v2408_v17 }
 0x3a4   : >> { %v2410_v7 = vpop.eup %2409  ;;  %2411 = vrcp.f32 %v1995_v53 }
 0x3a5   : >> { %v2009_v42 = vsub.f32 1.0, %v2410_v7  ;;  %v2007_v39 = vmul.f32 %v2420_v61, %v2410_v7 }
 0x3a7   : >> { %v2011_v62 = vmul.f32 %v2421_v14, %v2009_v42 }
 0x3a9   : >> { %v2013_v1 = vadd.f32 %v2011_v62, %v2007_v39 }
 0x3ab   : >> { %2017 = vst.msk [vmem:[%s2015_s0] sm:$0xff] %vm2016_vm8, %v2013_v1 }
 0x3b1   : >> { %v2412_v49 = vpop.eup %2411 }
 0x3b2   : >> { %v2010_v37 = vsub.f32 1.0, %v2412_v49  ;;  %v2008_v5 = vmul.f32 %v2422_v15, %v2412_v49 }
 0x3b4   : >> { %v2012_v41 = vmul.f32 %v2423_v40, %v2010_v37  ;;  %423 = sbr.rel (!%p421_p7) target bundleno = 156 (0x9c), region = 151 }
 0x3b6   : >> { %v2014_v16 = vadd.f32 %v2012_v41, %v2008_v5 }
 0x3b8   : >> { %2018 = vst.msk [vmem:[%s2015_s0 + $0x8] sm:$0xff] %vm2016_vm8, %v2014_v16 }
 0x3b9   : > { %2566 = shalt.err (!%p2563_p4)
}
 0x3ba   : > { %s2567_s25 = scalar_lea.hbm %s4238_s2, 1024  ;;  %s2571_s10 = scalar_lea.hbm %s4568_s1, 2048 }
 0x3bb   : > { %p2568_p1 = scmp.ne.s32.totalorder %s4238_s2, %s2567_s25  ;;  %p2572_p2 = scmp.lt.s32.totalorder %s4238_s2, %s4568_s1 }
 0x3bc   : > { %p2573_p5 = scmp.lt.s32.totalorder %s2571_s10, %s2567_s25 }
 0x3bd   : > { %p2569_p12 = pnand %p2568_p1, %p4570_p0 }
 0x3be   : > { %p2574_p7 = por %p2573_p5, %p2572_p2 }
 0x3bf   : > { %p2570_p13 = pneg %p2569_p12 }
 0x3c1   : > { %p2575_p11 = pnand %p2574_p7, %p2570_p13 }
 0x3c3   : > { %2578 = shalt.err (!%p2575_p11)
}
 0x3c4   : > { %s2676_s22 = smov 128   ;;  %s2677_s7 = smov 8  }
 0x3c5   : > { %2288 = dma.vmem_to_hbm [thread:$0]  (%p4570_p0), %s4242_s14, 1024, %s4238_s2, %s2020_s3, %s2676_s22, %s2676_s22, %s2677_s7  }
 0x3c6 PF: > { %s4571_s29 = sld [smem:[#allocation21_spill]] }
 0x3c7   : > { %s4572_s12 = sld [smem:[#allocation28_spill]] }
 0x3c8   : > { %s4573_s15 = sld [smem:[#allocation26_spill]] }
 0x3cc   : > { %s2051_s16 = sand.u32 1, %s4571_s29  }
 0x3cd   : > { %p4574_p8 = scmp.ne.s32.totalorder %s4572_s12, 0  ;;  %s2052_s0 = scalar_lea.sflag [#allocation6], %s2051_s16 }
 0x3ce   : > { %p4575_p10 = scmp.ge.s32.totalorder %s4573_s15, 2 }
 0x3d0   : > { %p2311_p6 = pnand %p4575_p10, %p4574_p8 }
 0x3d2   : > { %p2312_p9 = pneg %p2311_p6 }
 0x3d4   : > { %2624 = dma.done.wait (%p2312_p9), %s2052_s0, 1024  }
 0x3d5   : > { %2626 = vsyncadd (%p2312_p9), %s2052_s0, 4294966272  ;;  %s27_s26 = sadd.s32 1, %s4573_s15   ;;  %s4576_s21 = sld [smem:[#allocation22_spill]] }
 0x3d6   : > { %p24_p3 = scmp.ge.s32.totalorder %s27_s26, 4   ;;  %s4577_s22 = sld [smem:[#allocation23_spill]] }
 0x3d7   : > { %s4578_s23 = sld [smem:[#allocation30_spill]] }
 0x3d8   : > { %s4579_s24 = sld [smem:[#allocation25_spill]]  ;;  %26 = sbr.rel (!%p24_p3) target bundleno = 18 (0x12), region = 162 }
 0x3d9   : > { %s4580_s25 = sld [smem:[#allocation29_spill]] }
 0x3dd   :  { %2057 = vsyncpa [#allocation5], 1 }
 0x3de   :  { %2059 = vsyncpa [#allocation5 + $0x1], 1 }
 0x3df   :  { %2060 = vsyncpa [#allocation9], 1 }
 0x3e0   :  { %2062 = vsyncpa [#allocation9 + $0x1], 1 }
 0x3e1   :  { %2063 = vsyncpa [#allocation6], 1 }
 0x3e2   :  { %2065 = vsyncpa [#allocation6 + $0x1], 1 }
 0x3e3   :  { %2066 = vsyncpa [#allocation7], 1 }
 0x3e4   :  { %2068 = vsyncpa [#allocation7 + $0x1], 1 }
 0x3e5   :  { %2069 = vsyncpa [#allocation13], 1 }

</bundles_post_ra>
